<compile_context>
chip_gen: v5e
topology: v5e:2x2
jax: 0.10.0
libtpu: 0.0.40
codegen_flags: <defaults>
</compile_context>

<pallas_src>
import jax
import jax.numpy as jnp
from jax import lax
from jax.experimental import pallas as pl
from jax.experimental.pallas import tpu as pltpu

EPS = 1e-5
_C3 = 256          # conv3 output-channel chunk size (4 chunks of 256)


# ----------------------------- Pallas kernels ------------------------------

def _mlp_max_kernel(x_ref, w1_ref, t1_ref, w2_ref, t2_ref, w3_ref, t3_ref,
                    out_ref):
    """Per-point MLP k->64->128->1024 (+folded BN, ReLU) and running max.

    x_ref:  (1, k, TN)  bf16-castable input tile (PyTorch channels-first)
    w*_ref: (Cin, Cout) bf16 weights (BN scale folded in)
    t*_ref: (1, Cout)   f32 folded shifts (lane-dense rows)
    out_ref:(1, 1, 1024) f32 resident running max (lane-dense)
    """
    n = pl.program_id(1)

    @pl.when(n == 0)
    def _init():
        # ReLU outputs are >= 0, so 0 is a safe running-max identity.
        out_ref[...] = jnp.zeros_like(out_ref)

    x = x_ref[0].astype(jnp.bfloat16)                               # (k, TN)
    # Contract x's channel axis (dim 0) against w1's input axis (dim 0):
    # result is points-on-sublanes (TN, 64) without a separate transpose op.
    h = lax.dot_general(x, w1_ref[...],
                        (((0,), (0,)), ((), ())),
                        preferred_element_type=jnp.float32)          # (TN, 64)
    h = jnp.maximum(h + t1_ref[...], 0.0).astype(jnp.bfloat16)
    h = jnp.dot(h, w2_ref[...], preferred_element_type=jnp.float32)  # (TN, 128)
    h = jnp.maximum(h + t2_ref[...], 0.0).astype(jnp.bfloat16)

    for c in range(w3_ref.shape[1] // _C3):          # 4 chunks of 256 channels
        lo = c * _C3
        hc = jnp.dot(h, w3_ref[:, lo:lo + _C3],
                     preferred_element_type=jnp.float32)             # (TN, 256)
        hc = jnp.maximum(hc + t3_ref[:, lo:lo + _C3], 0.0)
        part = jnp.max(hc, axis=0, keepdims=True)                    # (1, 256)
        out_ref[0, :, lo:lo + _C3] = jnp.maximum(
            out_ref[0, :, lo:lo + _C3], part)


def _head_kernel(f_ref, w4_ref, t4_ref, w5_ref, t5_ref, w6_ref, b6_ref,
                 out_ref):
    """FC head 1024 -> 512 -> 256 -> k*k (BN folded, identity folded into bias)."""
    f = f_ref[...].astype(jnp.bfloat16)                              # (B, 1024)
    h = jnp.dot(f, w4_ref[...], preferred_element_type=jnp.float32)
    h = jnp.maximum(h + t4_ref[...], 0.0).astype(jnp.bfloat16)       # (B, 512)
    h = jnp.dot(h, w5_ref[...], preferred_element_type=jnp.float32)
    h = jnp.maximum(h + t5_ref[...], 0.0).astype(jnp.bfloat16)       # (B, 256)
    h = jnp.dot(h, w6_ref[...], preferred_element_type=jnp.float32)
    out_ref[...] = h + b6_ref[...]                                   # (B, k*k)


# ------------------------------- wrapper -----------------------------------

def _fold_bn(bias, gamma, beta, mean, var):
    """Fold eval-mode BatchNorm1d (+ preceding layer bias) into scale/shift."""
    scale = gamma / jnp.sqrt(var + EPS)
    shift = beta + scale * (bias - mean)
    return scale, shift


def _pick_tn(n):
    if n >= 1024:
        return 1024
    if n >= 512:
        return 512
    if n >= 256:
        return 256
    return 128


def stnkd_forward(x_bkn, p, k):
    """x_bkn: (B, k, N) float32, PyTorch layout.  Returns (B, k, k)."""
    B, _, N = x_bkn.shape
    x = x_bkn.astype(jnp.float32)

    TN = _pick_tn(N)
    n_pad = ((N + TN - 1) // TN) * TN
    nt = n_pad // TN
    if n_pad != N:
        # Edge padding replicates a real point: duplicates can't change the
        # max, so no in-kernel masking is needed.
        x = jnp.pad(x, ((0, 0), (0, 0), (0, n_pad - N)), mode="edge")

    s1, t1 = _fold_bn(p["b1"], p["g1"], p["be1"], p["m1"], p["v1"])
    s2, t2 = _fold_bn(p["b2"], p["g2"], p["be2"], p["m2"], p["v2"])
    s3, t3 = _fold_bn(p["b3"], p["g3"], p["be3"], p["m3"], p["v3"])
    s4, t4 = _fold_bn(p["b4"], p["g4"], p["be4"], p["m4"], p["v4"])
    s5, t5 = _fold_bn(p["b5"], p["g5"], p["be5"], p["m5"], p["v5"])

    # BN scale folded into the weights; operands cast to bf16 once, here.
    # Weights stay (Cin, Cout): the kernel works points-on-sublanes.
    w1b = (p["w1"] * s1[None, :]).astype(jnp.bfloat16)          # (k, 64)
    w2b = (p["w2"] * s2[None, :]).astype(jnp.bfloat16)          # (64, 128)
    w3b = (p["w3"] * s3[None, :]).astype(jnp.bfloat16)          # (128, 1024)
    t1r = t1.reshape(1, -1)                                     # lane-dense rows
    t2r = t2.reshape(1, -1)
    t3r = t3.reshape(1, -1)

    w4b = (p["w4"] * s4[None, :]).astype(jnp.bfloat16)          # (1024, 512)
    w5b = (p["w5"] * s5[None, :]).astype(jnp.bfloat16)          # (512, 256)
    w6b = p["w6"].astype(jnp.bfloat16)                          # (256, k*k)
    t4r = t4.reshape(1, -1)
    t5r = t5.reshape(1, -1)
    b6r = (p["b6"] + jnp.eye(k, dtype=jnp.float32).reshape(-1)).reshape(1, -1)

    # Kernel 1: per-point MLP + max over points, tiled over (batch, point-tile).
    feat = pl.pallas_call(
        _mlp_max_kernel,
        out_shape=jax.ShapeDtypeStruct((B, 1, 1024), jnp.float32),
        grid_spec=pltpu.PrefetchScalarGridSpec(
            num_scalar_prefetch=0,
            grid=(B, nt),
            in_specs=[
                pl.BlockSpec((1, k, TN), lambda b, n: (b, 0, n)),
                pl.BlockSpec((k, 64), lambda b, n: (0, 0)),
                pl.BlockSpec((1, 64), lambda b, n: (0, 0)),
                pl.BlockSpec((64, 128), lambda b, n: (0, 0)),
                pl.BlockSpec((1, 128), lambda b, n: (0, 0)),
                pl.BlockSpec((128, 1024), lambda b, n: (0, 0)),
                pl.BlockSpec((1, 1024), lambda b, n: (0, 0)),
            ],
            out_specs=pl.BlockSpec((1, 1, 1024), lambda b, n: (b, 0, 0)),
        ),
        compiler_params=pltpu.CompilerParams(
            dimension_semantics=("parallel", "arbitrary"),
            vmem_limit_bytes=32 * 1024 * 1024),
    )(x, w1b, t1r, w2b, t2r, w3b, t3r)

    # Kernel 2: tiny FC head on the (B, 1024) global features (single block).
    # TODO(synk): at very small B this could equally run in plain XLA to shave
    # one launch; kept as a Pallas kernel to keep the full forward in-kernel.
    out = pl.pallas_call(
        _head_kernel,
        out_shape=jax.ShapeDtypeStruct((B, k * k), jnp.float32),
    )(feat.reshape(B, 1024), w4b, t4r, w5b, t5r, w6b, b6r)

    return out.reshape(B, k, k)


# --------------------------- reference (pure JAX) ---------------------------

def stnkd_reference(x_bkn, p, k):
    def bn(h, g, be, m, v):
        return g * (h - m) / jnp.sqrt(v + EPS) + be

    x = jnp.transpose(x_bkn, (0, 2, 1))                         # (B, N, k)
    h = jax.nn.relu(bn(jnp.einsum("bnc,cd->bnd", x, p["w1"]) + p["b1"],
                       p["g1"], p["be1"], p["m1"], p["v1"]))
    h = jax.nn.relu(bn(jnp.einsum("bnc,cd->bnd", h, p["w2"]) + p["b2"],
                       p["g2"], p["be2"], p["m2"], p["v2"]))
    h = jax.nn.relu(bn(jnp.einsum("bnc,cd->bnd", h, p["w3"]) + p["b3"],
                       p["g3"], p["be3"], p["m3"], p["v3"]))
    f = jnp.max(h, axis=1)                                      # (B, 1024)
    f = jax.nn.relu(bn(f @ p["w4"] + p["b4"],
                       p["g4"], p["be4"], p["m4"], p["v4"]))
    f = jax.nn.relu(bn(f @ p["w5"] + p["b5"],
                       p["g5"], p["be5"], p["m5"], p["v5"]))
    f = f @ p["w6"] + p["b6"]
    f = f + jnp.eye(k, dtype=jnp.float32).reshape(1, k * k)
    return f.reshape(-1, k, k)


# --------------------------------- params -----------------------------------

def init_params(key, k):
    dims = [(k, 64), (64, 128), (128, 1024), (1024, 512), (512, 256),
            (256, k * k)]
    p = {}
    keys = jax.random.split(key, 6 * 2 + 5 * 4)
    ki = 0
    for i, (cin, cout) in enumerate(dims, start=1):
        p[f"w{i}"] = 0.05 * jax.random.normal(keys[ki], (cin, cout),
                                              jnp.float32); ki += 1
        p[f"b{i}"] = 0.01 * jax.random.normal(keys[ki], (cout,),
                                              jnp.float32); ki += 1
    bn_dims = [64, 128, 1024, 512, 256]
    for i, c in enumerate(bn_dims, start=1):
        p[f"g{i}"] = 1.0 + 0.1 * jax.random.normal(keys[ki], (c,),
                                                   jnp.float32); ki += 1
        p[f"be{i}"] = 0.05 * jax.random.normal(keys[ki], (c,),
                                               jnp.float32); ki += 1
        p[f"m{i}"] = 0.05 * jax.random.normal(keys[ki], (c,),
                                              jnp.float32); ki += 1
        p[f"v{i}"] = 1.0 + 0.1 * jax.nn.softplus(
            jax.random.normal(keys[ki], (c,), jnp.float32)); ki += 1
    return p


# ----------------------------------- main ------------------------------------

if __name__ == "__main__":
    B, K, N = 2, 16, 128                      # small shapes: batch=2, k=16, 128 points
    root = jax.random.PRNGKey(0)
    k_x, k_x2, k_p = jax.random.split(root, 3)
    params = init_params(k_p, K)

    fwd = jax.jit(stnkd_forward, static_argnums=2)

    # Case 1: N a multiple of the point tile (single tile per batch).
    x = jax.random.normal(k_x, (B, K, N), jnp.float32)          # PyTorch layout (B, k, N)
    out = jax.block_until_ready(fwd(x, params, K))
    ref = stnkd_reference(x, params, K)
    assert out.shape == (B, K, K)
    assert jnp.allclose(out, ref, atol=3e-2, rtol=3e-2), "mismatch vs reference"

    # Case 2: ragged point count (exercises N-tiling, edge padding, running max).
    N2 = 200
    x2 = jax.random.normal(k_x2, (B, K, N2), jnp.float32)
    out2 = jax.block_until_ready(fwd(x2, params, K))
    ref2 = stnkd_reference(x2, params, K)
    assert jnp.allclose(out2, ref2, atol=3e-2, rtol=3e-2), "mismatch vs reference (ragged N)"

    print("KERNEL_OK")
</pallas_src>

<mosaic_0001>
module attributes {stable_mosaic.version = 11 : i64} {
  func.func @_mlp_max_kernel(%arg0: i32, %arg1: i32, %arg2: memref<1x16x128xf32, #tpu.memory_space<vmem>>, %arg3: memref<16x64xbf16, #tpu.memory_space<vmem>>, %arg4: memref<1x64xf32, #tpu.memory_space<vmem>>, %arg5: memref<64x128xbf16, #tpu.memory_space<vmem>>, %arg6: memref<1x128xf32, #tpu.memory_space<vmem>>, %arg7: memref<128x1024xbf16, #tpu.memory_space<vmem>>, %arg8: memref<1x1024xf32, #tpu.memory_space<vmem>>, %arg9: memref<1x1x1024xf32, #tpu.memory_space<vmem>>) attributes {dimension_semantics = [#tpu.dimension_semantics<parallel>, #tpu.dimension_semantics<arbitrary>], iteration_bounds = array<i64: 2, 1>, scalar_prefetch = 0 : i64, scratch_operands = 0 : i64, tpu.core_type = #tpu.core_type<tc>, window_params = [{transform_indices = @transform_0, window_bounds = array<i64: 1, 16, 128>}, {pipeline_mode = #tpu.pipeline_mode<synchronous>, transform_indices = @transform_1, window_bounds = array<i64: 16, 64>}, {pipeline_mode = #tpu.pipeline_mode<synchronous>, transform_indices = @transform_2, window_bounds = array<i64: 1, 64>}, {pipeline_mode = #tpu.pipeline_mode<synchronous>, transform_indices = @transform_3, window_bounds = array<i64: 64, 128>}, {pipeline_mode = #tpu.pipeline_mode<synchronous>, transform_indices = @transform_4, window_bounds = array<i64: 1, 128>}, {pipeline_mode = #tpu.pipeline_mode<synchronous>, transform_indices = @transform_5, window_bounds = array<i64: 128, 1024>}, {pipeline_mode = #tpu.pipeline_mode<synchronous>, transform_indices = @transform_6, window_bounds = array<i64: 1, 1024>}, {transform_indices = @transform_7, window_bounds = array<i64: 1, 1, 1024>}]} {
    %c0_i32 = arith.constant 0 : i32
    %0 = arith.cmpi eq, %arg1, %c0_i32 : i32
    %1 = arith.extui %0 : i1 to i32
    %c0_i32_0 = arith.constant 0 : i32
    %2 = arith.cmpi ne, %1, %c0_i32_0 : i32
    scf.if %2 {
      %cst_63 = arith.constant 0.000000e+00 : f32
      %82 = vector.broadcast %cst_63 : f32 to vector<1x1x1024xf32>
      %c0_64 = arith.constant 0 : index
      %c0_65 = arith.constant 0 : index
      %c0_66 = arith.constant 0 : index
      %83 = vector.load %arg9[%c0_64, %c0_65, %c0_66] : memref<1x1x1024xf32, #tpu.memory_space<vmem>>, vector<1x1x1024xf32>
      tpu.vector_store %arg9[%c0_64, %c0_65, %c0_66], %82 {strides = array<i32>} : memref<1x1x1024xf32, #tpu.memory_space<vmem>>, vector<1x1x1024xf32>,
    } else {
    }
    %c0 = arith.constant 0 : index
    %c0_1 = arith.constant 0 : index
    %c0_2 = arith.constant 0 : index
    %3 = vector.load %arg2[%c0, %c0_1, %c0_2] : memref<1x16x128xf32, #tpu.memory_space<vmem>>, vector<1x16x128xf32>
    %4 = vector.shape_cast %3 : vector<1x16x128xf32> to vector<16x128xf32>
    %5 = arith.truncf %4 : vector<16x128xf32> to vector<16x128xbf16>
    %c0_3 = arith.constant 0 : index
    %c0_4 = arith.constant 0 : index
    %6 = vector.load %arg3[%c0_3, %c0_4] : memref<16x64xbf16, #tpu.memory_space<vmem>>, vector<16x64xbf16>
    %cst = arith.constant dense<0.000000e+00> : vector<128x64xf32>
    %7 = tpu.matmul %5, %6, %cst {dimension_numbers = #tpu.dot_dimension_numbers<[0], [0], [1], [1], [0, 1, 1, 1], [], []>} : vector<16x128xbf16>, vector<16x64xbf16>, vector<128x64xf32> -> vector<128x64xf32>
    %c0_5 = arith.constant 0 : index
    %c0_6 = arith.constant 0 : index
    %8 = vector.load %arg4[%c0_5, %c0_6] : memref<1x64xf32, #tpu.memory_space<vmem>>, vector<1x64xf32>
    %9 = vector.broadcast %8 : vector<1x64xf32> to vector<128x64xf32>
    %10 = arith.addf %7, %9 : vector<128x64xf32>
    %cst_7 = arith.constant 0.000000e+00 : f32
    %11 = vector.broadcast %cst_7 : f32 to vector<128x64xf32>
    %12 = arith.maximumf %10, %11 : vector<128x64xf32>
    %13 = arith.truncf %12 : vector<128x64xf32> to vector<128x64xbf16>
    %c0_8 = arith.constant 0 : index
    %c0_9 = arith.constant 0 : index
    %14 = vector.load %arg5[%c0_8, %c0_9] : memref<64x128xbf16, #tpu.memory_space<vmem>>, vector<64x128xbf16>
    %cst_10 = arith.constant dense<0.000000e+00> : vector<128x128xf32>
    %15 = tpu.matmul %13, %14, %cst_10 {dimension_numbers = #tpu.dot_dimension_numbers<[1], [0], [0], [1], [0, 0, 1, 1], [], []>} : vector<128x64xbf16>, vector<64x128xbf16>, vector<128x128xf32> -> vector<128x128xf32>
    %c0_11 = arith.constant 0 : index
    %c0_12 = arith.constant 0 : index
    %16 = vector.load %arg6[%c0_11, %c0_12] : memref<1x128xf32, #tpu.memory_space<vmem>>, vector<1x128xf32>
    %17 = vector.broadcast %16 : vector<1x128xf32> to vector<128x128xf32>
    %18 = arith.addf %15, %17 : vector<128x128xf32>
    %cst_13 = arith.constant 0.000000e+00 : f32
    %19 = vector.broadcast %cst_13 : f32 to vector<128x128xf32>
    %20 = arith.maximumf %18, %19 : vector<128x128xf32>
    %21 = arith.truncf %20 : vector<128x128xf32> to vector<128x128xbf16>
    %c0_14 = arith.constant 0 : index
    %c0_15 = arith.constant 0 : index
    %22 = vector.load %arg7[%c0_14, %c0_15] : memref<128x1024xbf16, #tpu.memory_space<vmem>>, vector<128x256xbf16>
    %cst_16 = arith.constant dense<0.000000e+00> : vector<128x256xf32>
    %23 = tpu.matmul %21, %22, %cst_16 {dimension_numbers = #tpu.dot_dimension_numbers<[1], [0], [0], [1], [0, 0, 1, 1], [], []>} : vector<128x128xbf16>, vector<128x256xbf16>, vector<128x256xf32> -> vector<128x256xf32>
    %c0_17 = arith.constant 0 : index
    %c0_18 = arith.constant 0 : index
    %24 = vector.load %arg8[%c0_17, %c0_18] : memref<1x1024xf32, #tpu.memory_space<vmem>>, vector<1x256xf32>
    %25 = vector.broadcast %24 : vector<1x256xf32> to vector<128x256xf32>
    %26 = arith.addf %23, %25 : vector<128x256xf32>
    %cst_19 = arith.constant 0.000000e+00 : f32
    %27 = vector.broadcast %cst_19 : f32 to vector<128x256xf32>
    %28 = arith.maximumf %26, %27 : vector<128x256xf32>
    %cst_20 = arith.constant dense<0xFF800000> : vector<256xf32>
    %29 = vector.multi_reduction <maximumf>, %28, %cst_20 [0] : vector<128x256xf32> to vector<256xf32>
    %30 = vector.shape_cast %29 : vector<256xf32> to vector<1x256xf32>
    %c0_21 = arith.constant 0 : index
    %c0_22 = arith.constant 0 : index
    %c0_23 = arith.constant 0 : index
    %31 = vector.load %arg9[%c0_21, %c0_22, %c0_23] : memref<1x1x1024xf32, #tpu.memory_space<vmem>>, vector<1x1x256xf32>
    %32 = vector.shape_cast %31 : vector<1x1x256xf32> to vector<1x256xf32>
    %33 = arith.maximumf %32, %30 : vector<1x256xf32>
    %c0_24 = arith.constant 0 : index
    %c0_25 = arith.constant 0 : index
    %c0_26 = arith.constant 0 : index
    %34 = vector.load %arg9[%c0_24, %c0_25, %c0_26] : memref<1x1x1024xf32, #tpu.memory_space<vmem>>, vector<1x1x256xf32>
    %35 = vector.shape_cast %34 : vector<1x1x256xf32> to vector<1x256xf32>
    %36 = vector.shape_cast %33 : vector<1x256xf32> to vector<1x1x256xf32>
    tpu.vector_store %arg9[%c0_24, %c0_25, %c0_26], %36 {strides = array<i32>} : memref<1x1x1024xf32, #tpu.memory_space<vmem>>, vector<1x1x256xf32>,
    %c0_27 = arith.constant 0 : index
    %c256 = arith.constant 256 : index
    %37 = vector.load %arg7[%c0_27, %c256] : memref<128x1024xbf16, #tpu.memory_space<vmem>>, vector<128x256xbf16>
    %cst_28 = arith.constant dense<0.000000e+00> : vector<128x256xf32>
    %38 = tpu.matmul %21, %37, %cst_28 {dimension_numbers = #tpu.dot_dimension_numbers<[1], [0], [0], [1], [0, 0, 1, 1], [], []>} : vector<128x128xbf16>, vector<128x256xbf16>, vector<128x256xf32> -> vector<128x256xf32>
    %c0_29 = arith.constant 0 : index
    %c256_30 = arith.constant 256 : index
    %39 = vector.load %arg8[%c0_29, %c256_30] : memref<1x1024xf32, #tpu.memory_space<vmem>>, vector<1x256xf32>
    %40 = vector.broadcast %39 : vector<1x256xf32> to vector<128x256xf32>
    %41 = arith.addf %38, %40 : vector<128x256xf32>
    %cst_31 = arith.constant 0.000000e+00 : f32
    %42 = vector.broadcast %cst_31 : f32 to vector<128x256xf32>
    %43 = arith.maximumf %41, %42 : vector<128x256xf32>
    %cst_32 = arith.constant dense<0xFF800000> : vector<256xf32>
    %44 = vector.multi_reduction <maximumf>, %43, %cst_32 [0] : vector<128x256xf32> to vector<256xf32>
    %45 = vector.shape_cast %44 : vector<256xf32> to vector<1x256xf32>
    %c0_33 = arith.constant 0 : index
    %c0_34 = arith.constant 0 : index
    %c256_35 = arith.constant 256 : index
    %46 = vector.load %arg9[%c0_33, %c0_34, %c256_35] : memref<1x1x1024xf32, #tpu.memory_space<vmem>>, vector<1x1x256xf32>
    %47 = vector.shape_cast %46 : vector<1x1x256xf32> to vector<1x256xf32>
    %48 = arith.maximumf %47, %45 : vector<1x256xf32>
    %c0_36 = arith.constant 0 : index
    %c0_37 = arith.constant 0 : index
    %c256_38 = arith.constant 256 : index
    %49 = vector.load %arg9[%c0_36, %c0_37, %c256_38] : memref<1x1x1024xf32, #tpu.memory_space<vmem>>, vector<1x1x256xf32>
    %50 = vector.shape_cast %49 : vector<1x1x256xf32> to vector<1x256xf32>
    %51 = vector.shape_cast %48 : vector<1x256xf32> to vector<1x1x256xf32>
    tpu.vector_store %arg9[%c0_36, %c0_37, %c256_38], %51 {strides = array<i32>} : memref<1x1x1024xf32, #tpu.memory_space<vmem>>, vector<1x1x256xf32>,
    %c0_39 = arith.constant 0 : index
    %c512 = arith.constant 512 : index
    %52 = vector.load %arg7[%c0_39, %c512] : memref<128x1024xbf16, #tpu.memory_space<vmem>>, vector<128x256xbf16>
    %cst_40 = arith.constant dense<0.000000e+00> : vector<128x256xf32>
    %53 = tpu.matmul %21, %52, %cst_40 {dimension_numbers = #tpu.dot_dimension_numbers<[1], [0], [0], [1], [0, 0, 1, 1], [], []>} : vector<128x128xbf16>, vector<128x256xbf16>, vector<128x256xf32> -> vector<128x256xf32>
    %c0_41 = arith.constant 0 : index
    %c512_42 = arith.constant 512 : index
    %54 = vector.load %arg8[%c0_41, %c512_42] : memref<1x1024xf32, #tpu.memory_space<vmem>>, vector<1x256xf32>
    %55 = vector.broadcast %54 : vector<1x256xf32> to vector<128x256xf32>
    %56 = arith.addf %53, %55 : vector<128x256xf32>
    %cst_43 = arith.constant 0.000000e+00 : f32
    %57 = vector.broadcast %cst_43 : f32 to vector<128x256xf32>
    %58 = arith.maximumf %56, %57 : vector<128x256xf32>
    %cst_44 = arith.constant dense<0xFF800000> : vector<256xf32>
    %59 = vector.multi_reduction <maximumf>, %58, %cst_44 [0] : vector<128x256xf32> to vector<256xf32>
    %60 = vector.shape_cast %59 : vector<256xf32> to vector<1x256xf32>
    %c0_45 = arith.constant 0 : index
    %c0_46 = arith.constant 0 : index
    %c512_47 = arith.constant 512 : index
    %61 = vector.load %arg9[%c0_45, %c0_46, %c512_47] : memref<1x1x1024xf32, #tpu.memory_space<vmem>>, vector<1x1x256xf32>
    %62 = vector.shape_cast %61 : vector<1x1x256xf32> to vector<1x256xf32>
    %63 = arith.maximumf %62, %60 : vector<1x256xf32>
    %c0_48 = arith.constant 0 : index
    %c0_49 = arith.constant 0 : index
    %c512_50 = arith.constant 512 : index
    %64 = vector.load %arg9[%c0_48, %c0_49, %c512_50] : memref<1x1x1024xf32, #tpu.memory_space<vmem>>, vector<1x1x256xf32>
    %65 = vector.shape_cast %64 : vector<1x1x256xf32> to vector<1x256xf32>
    %66 = vector.shape_cast %63 : vector<1x256xf32> to vector<1x1x256xf32>
    tpu.vector_store %arg9[%c0_48, %c0_49, %c512_50], %66 {strides = array<i32>} : memref<1x1x1024xf32, #tpu.memory_space<vmem>>, vector<1x1x256xf32>,
    %c0_51 = arith.constant 0 : index
    %c768 = arith.constant 768 : index
    %67 = vector.load %arg7[%c0_51, %c768] : memref<128x1024xbf16, #tpu.memory_space<vmem>>, vector<128x256xbf16>
    %cst_52 = arith.constant dense<0.000000e+00> : vector<128x256xf32>
    %68 = tpu.matmul %21, %67, %cst_52 {dimension_numbers = #tpu.dot_dimension_numbers<[1], [0], [0], [1], [0, 0, 1, 1], [], []>} : vector<128x128xbf16>, vector<128x256xbf16>, vector<128x256xf32> -> vector<128x256xf32>
    %c0_53 = arith.constant 0 : index
    %c768_54 = arith.constant 768 : index
    %69 = vector.load %arg8[%c0_53, %c768_54] : memref<1x1024xf32, #tpu.memory_space<vmem>>, vector<1x256xf32>
    %70 = vector.broadcast %69 : vector<1x256xf32> to vector<128x256xf32>
    %71 = arith.addf %68, %70 : vector<128x256xf32>
    %cst_55 = arith.constant 0.000000e+00 : f32
    %72 = vector.broadcast %cst_55 : f32 to vector<128x256xf32>
    %73 = arith.maximumf %71, %72 : vector<128x256xf32>
    %cst_56 = arith.constant dense<0xFF800000> : vector<256xf32>
    %74 = vector.multi_reduction <maximumf>, %73, %cst_56 [0] : vector<128x256xf32> to vector<256xf32>
    %75 = vector.shape_cast %74 : vector<256xf32> to vector<1x256xf32>
    %c0_57 = arith.constant 0 : index
    %c0_58 = arith.constant 0 : index
    %c768_59 = arith.constant 768 : index
    %76 = vector.load %arg9[%c0_57, %c0_58, %c768_59] : memref<1x1x1024xf32, #tpu.memory_space<vmem>>, vector<1x1x256xf32>
    %77 = vector.shape_cast %76 : vector<1x1x256xf32> to vector<1x256xf32>
    %78 = arith.maximumf %77, %75 : vector<1x256xf32>
    %c0_60 = arith.constant 0 : index
    %c0_61 = arith.constant 0 : index
    %c768_62 = arith.constant 768 : index
    %79 = vector.load %arg9[%c0_60, %c0_61, %c768_62] : memref<1x1x1024xf32, #tpu.memory_space<vmem>>, vector<1x1x256xf32>
    %80 = vector.shape_cast %79 : vector<1x1x256xf32> to vector<1x256xf32>
    %81 = vector.shape_cast %78 : vector<1x256xf32> to vector<1x1x256xf32>
    tpu.vector_store %arg9[%c0_60, %c0_61, %c768_62], %81 {strides = array<i32>} : memref<1x1x1024xf32, #tpu.memory_space<vmem>>, vector<1x1x256xf32>,
    return
  }
  func.func @transform_0(%arg0: i32, %arg1: i32) -> (i32, i32, i32) {
    %c0_i32 = arith.constant 0 : i32
    %c0_i32_0 = arith.constant 0 : i32
    return %arg0, %c0_i32, %arg1 : i32, i32, i32
  }
  func.func @transform_1(%arg0: i32, %arg1: i32) -> (i32, i32) {
    %c0_i32 = arith.constant 0 : i32
    %c0_i32_0 = arith.constant 0 : i32
    %c0_i32_1 = arith.constant 0 : i32
    return %c0_i32, %c0_i32_0 : i32, i32
  }
  func.func @transform_2(%arg0: i32, %arg1: i32) -> (i32, i32) {
    %c0_i32 = arith.constant 0 : i32
    %c0_i32_0 = arith.constant 0 : i32
    %c0_i32_1 = arith.constant 0 : i32
    return %c0_i32, %c0_i32_0 : i32, i32
  }
  func.func @transform_3(%arg0: i32, %arg1: i32) -> (i32, i32) {
    %c0_i32 = arith.constant 0 : i32
    %c0_i32_0 = arith.constant 0 : i32
    %c0_i32_1 = arith.constant 0 : i32
    return %c0_i32, %c0_i32_0 : i32, i32
  }
  func.func @transform_4(%arg0: i32, %arg1: i32) -> (i32, i32) {
    %c0_i32 = arith.constant 0 : i32
    %c0_i32_0 = arith.constant 0 : i32
    %c0_i32_1 = arith.constant 0 : i32
    return %c0_i32, %c0_i32_0 : i32, i32
  }
  func.func @transform_5(%arg0: i32, %arg1: i32) -> (i32, i32) {
    %c0_i32 = arith.constant 0 : i32
    %c0_i32_0 = arith.constant 0 : i32
    %c0_i32_1 = arith.constant 0 : i32
    return %c0_i32, %c0_i32_0 : i32, i32
  }
  func.func @transform_6(%arg0: i32, %arg1: i32) -> (i32, i32) {
    %c0_i32 = arith.constant 0 : i32
    %c0_i32_0 = arith.constant 0 : i32
    %c0_i32_1 = arith.constant 0 : i32
    return %c0_i32, %c0_i32_0 : i32, i32
  }
  func.func @transform_7(%arg0: i32, %arg1: i32) -> (i32, i32, i32) {
    %c0_i32 = arith.constant 0 : i32
    %c0_i32_0 = arith.constant 0 : i32
    %c0_i32_1 = arith.constant 0 : i32
    return %arg0, %c0_i32, %c0_i32_0 : i32, i32, i32
  }
}

module attributes {stable_mosaic.version = 11 : i64} {
  func.func @_head_kernel(%arg0: memref<2x1024xf32, #tpu.memory_space<vmem>>, %arg1: memref<1024x512xbf16, #tpu.memory_space<vmem>>, %arg2: memref<1x512xf32, #tpu.memory_space<vmem>>, %arg3: memref<512x256xbf16, #tpu.memory_space<vmem>>, %arg4: memref<1x256xf32, #tpu.memory_space<vmem>>, %arg5: memref<256x256xbf16, #tpu.memory_space<vmem>>, %arg6: memref<1x256xf32, #tpu.memory_space<vmem>>, %arg7: memref<2x256xf32, #tpu.memory_space<vmem>>) attributes {dimension_semantics = [], scalar_prefetch = 0 : i64, scratch_operands = 0 : i64, tpu.core_type = #tpu.core_type<tc>} {
    %c0 = arith.constant 0 : index
    %c0_0 = arith.constant 0 : index
    %0 = vector.load %arg0[%c0, %c0_0] : memref<2x1024xf32, #tpu.memory_space<vmem>>, vector<2x1024xf32>
    %1 = arith.truncf %0 : vector<2x1024xf32> to vector<2x1024xbf16>
    %c0_1 = arith.constant 0 : index
    %c0_2 = arith.constant 0 : index
    %2 = vector.load %arg1[%c0_1, %c0_2] : memref<1024x512xbf16, #tpu.memory_space<vmem>>, vector<1024x512xbf16>
    %cst = arith.constant dense<0.000000e+00> : vector<2x512xf32>
    %3 = tpu.matmul %1, %2, %cst {dimension_numbers = #tpu.dot_dimension_numbers<[1], [0], [0], [1], [0, 0, 1, 1], [], []>} : vector<2x1024xbf16>, vector<1024x512xbf16>, vector<2x512xf32> -> vector<2x512xf32>
    %c0_3 = arith.constant 0 : index
    %c0_4 = arith.constant 0 : index
    %4 = vector.load %arg2[%c0_3, %c0_4] : memref<1x512xf32, #tpu.memory_space<vmem>>, vector<1x512xf32>
    %5 = vector.broadcast %4 : vector<1x512xf32> to vector<2x512xf32>
    %6 = arith.addf %3, %5 : vector<2x512xf32>
    %cst_5 = arith.constant 0.000000e+00 : f32
    %7 = vector.broadcast %cst_5 : f32 to vector<2x512xf32>
    %8 = arith.maximumf %6, %7 : vector<2x512xf32>
    %9 = arith.truncf %8 : vector<2x512xf32> to vector<2x512xbf16>
    %c0_6 = arith.constant 0 : index
    %c0_7 = arith.constant 0 : index
    %10 = vector.load %arg3[%c0_6, %c0_7] : memref<512x256xbf16, #tpu.memory_space<vmem>>, vector<512x256xbf16>
    %cst_8 = arith.constant dense<0.000000e+00> : vector<2x256xf32>
    %11 = tpu.matmul %9, %10, %cst_8 {dimension_numbers = #tpu.dot_dimension_numbers<[1], [0], [0], [1], [0, 0, 1, 1], [], []>} : vector<2x512xbf16>, vector<512x256xbf16>, vector<2x256xf32> -> vector<2x256xf32>
    %c0_9 = arith.constant 0 : index
    %c0_10 = arith.constant 0 : index
    %12 = vector.load %arg4[%c0_9, %c0_10] : memref<1x256xf32, #tpu.memory_space<vmem>>, vector<1x256xf32>
    %13 = vector.broadcast %12 : vector<1x256xf32> to vector<2x256xf32>
    %14 = arith.addf %11, %13 : vector<2x256xf32>
    %cst_11 = arith.constant 0.000000e+00 : f32
    %15 = vector.broadcast %cst_11 : f32 to vector<2x256xf32>
    %16 = arith.maximumf %14, %15 : vector<2x256xf32>
    %17 = arith.truncf %16 : vector<2x256xf32> to vector<2x256xbf16>
    %c0_12 = arith.constant 0 : index
    %c0_13 = arith.constant 0 : index
    %18 = vector.load %arg5[%c0_12, %c0_13] : memref<256x256xbf16, #tpu.memory_space<vmem>>, vector<256x256xbf16>
    %cst_14 = arith.constant dense<0.000000e+00> : vector<2x256xf32>
    %19 = tpu.matmul %17, %18, %cst_14 {dimension_numbers = #tpu.dot_dimension_numbers<[1], [0], [0], [1], [0, 0, 1, 1], [], []>} : vector<2x256xbf16>, vector<256x256xbf16>, vector<2x256xf32> -> vector<2x256xf32>
    %c0_15 = arith.constant 0 : index
    %c0_16 = arith.constant 0 : index
    %20 = vector.load %arg6[%c0_15, %c0_16] : memref<1x256xf32, #tpu.memory_space<vmem>>, vector<1x256xf32>
    %21 = vector.broadcast %20 : vector<1x256xf32> to vector<2x256xf32>
    %22 = arith.addf %19, %21 : vector<2x256xf32>
    %c0_17 = arith.constant 0 : index
    %c0_18 = arith.constant 0 : index
    %23 = vector.load %arg7[%c0_17, %c0_18] : memref<2x256xf32, #tpu.memory_space<vmem>>, vector<2x256xf32>
    tpu.vector_store %arg7[%c0_17, %c0_18], %22 {strides = array<i32>} : memref<2x256xf32, #tpu.memory_space<vmem>>, vector<2x256xf32>,
    return
  }
}

</mosaic_0001>

<bundles_post_ra>
// kernel: stnkd_forward.2
= control target key start
LH: loop header
LB: loop body
LE: loop exit
PB: predicated region body
PF: predicated region fallthrough
CT: control target
= control target key end

     0   :  { %12 = vsyncpa [#allocation3], 0  ;;  %s3297_s0 = inlined_call_operand.hbm [shape: f32[2,16,128], index: 0, kind: input, shape index: {}]   ;;  %s3298_s1 = inlined_call_operand.vmem [shape: bf16[16,64], index: 1, kind: input, shape index: {}]   ;;  %s3299_s2 = inlined_call_operand.vmem [shape: f32[1,64], index: 2, kind: input, shape index: {}]   ;;  %s3300_s3 = inlined_call_operand.vmem [shape: bf16[64,128], index: 3, kind: input, shape index: {}]   ;;  %s3301_s4 = inlined_call_operand.vmem [shape: f32[1,128], index: 4, kind: input, shape index: {}]   ;;  %s3302_s5 = inlined_call_operand.vmem [shape: bf16[128,1024], index: 5, kind: input, shape index: {}]   ;;  %s3303_s6 = inlined_call_operand.vmem [shape: f32[1,1024], index: 6, kind: input, shape index: {}]   ;;  %s3304_s7 = inlined_call_operand.vmem [shape: f32[2,1,1024], index: 7, kind: output, shape index: {}]  }
   0x1   :  { %14 = vsyncpa [#allocation3 + $0x1], 0  ;;  %s2364_s24 = smov 0   ;;  %s2366_s25 = smov 0  }
   0x2   :  { %s2368_s26 = smov 0   ;;  %s2370_s27 = smov 0  }
   0x3   :  { %s2372_s28 = smov 0   ;;  %s2374_s29 = smov 0  }
   0x4 LB: > { %s1791_s30 = sadd.s32 4294967295, %s2319_s29   ;;  %s32_s8 = sadd.s32 1, %s2315_s28  ;;  %s2319_s29 = sphi %s2374_s29, %s20_s29   ;;  %s2315_s28 = sphi %s2372_s28, %s3313_s28   ;;  %s2311_s27 = sphi %s2370_s27, %s3312_s27   ;;  %s2307_s26 = sphi %s2368_s26, %s3311_s26   ;;  %s2303_s25 = sphi %s2366_s25, %s3310_s25   ;;  %s2299_s24 = sphi %s2364_s24, %s3309_s24  }
   0x5   : > { %p34_p0 = scmp.ge.s32.totalorder %s32_s8, 2  ;;  %s41_s9 = sadd.s32 1, %s2307_s26 }
   0x6   : > { %p48_p1 = scmp.ne.s32.totalorder %s2307_s26, %s2303_s25  ;;  %p49_p2 = scmp.eq.s32.totalorder %s2319_s29, 0 }
   0x7   : > { %s3315_s8 = smov (%p34_p0, %s32_s8), 0  ;;  %p54_p4 = scmp.ne.s32.totalorder %s2303_s25, %s2299_s24 }
   0x8   : > { %p2400_p3 = por %p49_p2, %p48_p1  ;;  %s36_s11 = ssub.s32 %s2315_s28, %s3315_s8 }
   0x9   : > { %p55_p5 = scmp.eq.s32.totalorder %s1791_s30, 0  ;;  %p39_p6 = scmp.eq.s32.totalorder %s36_s11, 0 }
   0xa   : > { %p2184_p8 = scmp.lt.s32.totalorder %s2319_s29, 2  ;;  %s248_s14 = sand.u32 1, %s2307_s26  }
   0xb   : > { %p2407_p7 = por %p55_p5, %p54_p4  ;;  %s2095_s15 = sshll.u32 %s2315_s28, 4 }
   0xc   : > { %s2413_s13 = scalar_select %p39_p6, %s2307_s26, %s41_s9  }
   0xd   : > { %s1795_s16 = sshll.u32 %s248_s14, 4  ;;  %s258_s19 = scalar_lea.hbm %s3297_s0, %s2095_s15 }
   0xe   : > { %s259_s20 = sshll.u32 %s258_s19, 4  ;;  %s252_s21 = scalar_lea.vmem [#allocation2], %s1795_s16  ;;  %s260_s20 = int_to_ptr.hbm [resolvable:$true] %s259_s20 }
   0xf   : > { %s261_s22 = sshll.u32 %s252_s21, 4  ;;  %p2181_p9 = pnand %p2184_p8, %p2400_p3  ;;  %s262_s22 = int_to_ptr.vmem [resolvable:$true] %s261_s22 }
  0x10   : > { %p1798_p10 = scmp.ge.s32.totalorder %s2319_s29, 1  ;;  %p269_p11 = scmp.lt.s32.totalorder %s2319_s29, 3 }
  0x11   : > { %s249_s23 = scalar_lea.sflag [#allocation3], %s248_s14  ;;  %s2321_s24 = smov 128  }
  0x12   : > { %s2322_s30 = smov 8   ;;  %p270_p12 = pnand %p1798_p10, %p269_p11 }
  0x13   : > { %2183 = dma.hbm_to_vmem [thread:$0]  (!%p2181_p9), %s260_s20, 256, %s262_s22, %s249_s23, %s2321_s24, %s2321_s24, %s2322_s30  }
  0x14   : > { %273 = sbr.rel (%p270_p12) target bundleno = 916 (0x394), region = 48  ;;  %s275_s9 = sand.u32 (!%p270_p12), 1, %s2303_s25  }
  0x15   : > { %s1799_s11 = sshll.u32 (!%p270_p12), %s275_s9, 4  ;;  %s276_s15 = scalar_lea.sflag (!%p270_p12), [#allocation3], %s275_s9 }
  0x16   : > { %s279_s17 = scalar_lea.vmem (!%p270_p12), [#allocation2], %s1799_s11 }
  0x19   : > { %2294 = dma.done.wait (%p2407_p7), %s276_s15, 256  }
  0x1a   : > { %2296 = vsyncadd (%p2407_p7), %s276_s15, 4294967040  ;;  %v320_v0 = vld [vmem:[%s279_s17] sm:$0xff]  ;;  %v321_v1 = vld [vmem:[%s279_s17 + $0x8] sm:$0xff]  ;;  %vm351_vm0 = vcmask 130048   ;;  %vm485_vm1 = vcmask 523264   ;;  %p310_p13 = scmp.lt.s32.totalorder %s2311_s27, 1 }
  0x1b   : > { %v2096_v2 = vld [vmem:[%s3298_s1] sm:$0xff]  ;;  %v322_v3 = vpack.c.bf16 %v321_v1, %v320_v0  ;;  %v2100_v10 = vld [vmem:[%s3300_s3 + $0x18] sm:$0xff]  ;;  %v2099_v12 = vld [vmem:[%s3300_s3 + $0x10] sm:$0xff]  ;;  %vm861_vm2 = vcmask 1040384  }
  0x1c   : > { %383 = vmatpush.bf16.msra.mxu0 %v2096_v2  ;;  %2165 = vmatpush.bf16.msra.mxu3 %v2096_v2  ;;  %v2098_v13 = vld [vmem:[%s3300_s3 + $0x8] sm:$0xff]  ;;  %v2097_v14 = vld [vmem:[%s3300_s3] sm:$0xff]  ;;  %s3317_s27 = smov (!%p310_p13, %s2311_s27), 1 }
  0x1d   : > { %329 = vxpose.xlu0.c.b16.start.end [1/1] (short) %v322_v3, 128  ;;  %514 = vmatpush.bf16.msra.mxu1 %v2100_v10  ;;  %v2455_v17 = vld [vmem:[%s3299_s2] ss:$0 sm:$0xff]  ;;  %v1959_v52 = vld [vmem:[%s3302_s5 + $0x1c8] sm:$0xf]  ;;  %v2115_v56 = vld [vmem:[%s3302_s5 + $0x1c4] sm:$0xf] }
  0x1e   : > { %2166 = vmatpush.bf16.msra.mxu2 %v2100_v10  ;;  %v2132_v53 = vld [vmem:[%s3302_s5 + $0x1e4] sm:$0xf0]  ;;  %v1897_v57 = vld [vmem:[%s3302_s5 + $0x1e0] sm:$0xf0]  ;;  %v2131_v61 = vld [vmem:[%s3302_s5 + $0x1cc] sm:$0xf] }
  0x1f   : > { %v1960_v54 = vor.u32 %v2132_v53, %v1959_v52  ;;  %v1900_v58 = vor.u32 %v2115_v56, %v1897_v57  ;;  %v1951_v59 = vld [vmem:[%s3302_s5 + $0x188] sm:$0xf]  ;;  %v1961_v63 = vld [vmem:[%s3302_s5 + $0x1e8] sm:$0xf0]  ;;  %v1895_v0 = vld [vmem:[%s3302_s5 + $0x1c0] sm:$0xf] }
  0x20   : > { %v2130_v60 = vld [vmem:[%s3302_s5 + $0x1a4] sm:$0xf0]  ;;  %v2116_v1 = vld [vmem:[%s3302_s5 + $0x1dc] sm:$0xf0]  ;;  %v1964_v2 = vor.u32 %v2131_v61, %v1961_v63  ;;  %v2129_v10 = vld [vmem:[%s3302_s5 + $0x18c] sm:$0xf] }
  0x21   : > { %515 = vmatpush.bf16.msra.mxu1 %v2099_v12  ;;  %972 = vmatpush.bf16.msrb.mxu0 %v1960_v54  ;;  %v1952_v62 = vor.u32 %v2130_v60, %v1951_v59  ;;  %v1896_v3 = vor.u32 %v2116_v1, %v1895_v0  ;;  %v2124_v52 = vld [vmem:[%s3302_s5 + $0xe4] sm:$0xf0]  ;;  %v2123_v53 = vld [vmem:[%s3302_s5 + $0xcc] sm:$0xf]  ;;  %v2106_v59 = vld [vmem:[%s3302_s5 + $0x9c] sm:$0xf0] }
  0x22   : > { %2167 = vmatpush.bf16.msra.mxu2 %v2099_v12  ;;  %734 = vmatpush.bf16.msrb.mxu3 %v1900_v58  ;;  %v1929_v54 = vld [vmem:[%s3302_s5 + $0xe8] sm:$0xf0]  ;;  %v1855_v58 = vld [vmem:[%s3302_s5 + $0x80] sm:$0xf]  ;;  %v2105_v60 = vld [vmem:[%s3302_s5 + $0x84] sm:$0xf] }
  0x23   : > { %v1932_v56 = vor.u32 %v2123_v53, %v1929_v54  ;;  %v1857_v63 = vld [vmem:[%s3302_s5 + $0xa0] sm:$0xf0]  ;;  %v1919_v0 = vld [vmem:[%s3302_s5 + $0x88] sm:$0xf]  ;;  %v2145_v53 = vld [vmem:[%s3302_s5 + $0x194] sm:$0xf] }
  0x24   : > { %v2122_v1 = vld [vmem:[%s3302_s5 + $0xa4] sm:$0xf0]  ;;  %v2017_v54 = vld [vmem:[%s3302_s5 + $0x1b0] sm:$0xf0]  ;;  %s1800_s12 = sshll.u32 %s3317_s27, 3 }
  0x25   : > { %516 = vmatpush.bf16.msra.mxu1 %v2098_v13  ;;  %973 = vmatpush.bf16.msrb.mxu0 %v1952_v62  ;;  %v1856_v62 = vor.u32 %v2106_v59, %v1855_v58  ;;  %s3087_s27 = scalar_lea.vmem %s3304_s7, %s1800_s12 }
  0x26   : > { %2168 = vmatpush.bf16.msra.mxu2 %v2098_v13  ;;  %v1953_v13 = vld [vmem:[%s3302_s5 + $0x1a8] sm:$0xf0] }
  0x29   : > { %517 = vmatpush.bf16.msra.mxu1 %v2097_v14 }
  0x2a   : > { %2169 = vmatpush.bf16.msra.mxu2 %v2097_v14 }
  0x2d   : > { %1021 = vmatpush.bf16.msrb.mxu1 %v1964_v2 }
  0x2e   : > { %685 = vmatpush.bf16.msrb.mxu2 %v1896_v3  ;;  %v1860_v3 = vor.u32 %v2105_v60, %v1857_v63  ;;  %v2087_v60 = vld [vmem:[%s3302_s5 + $0x1d8] sm:$0xf] }
  0xc9   : > { %v337_v4 = vpop.trf.xlu0 }
  0xca   : > { %1805 = vmatmul.msk.bf16.vlgmr.msra.gmra.mxu0 %vm351_vm0, %v337_v4  ;;  %v2113_v4 = vld [vmem:[%s3302_s5 + $0x184] sm:$0xf] }
  0xd9   : > { %v338_v5 = vpop.trf.xlu0 }
  0xda   : > { %1806 = vmatmul.msk.bf16.gmra.mxu0 %vm351_vm0, %v338_v5  ;;  %v1889_v5 = vld [vmem:[%s3302_s5 + $0x1a0] sm:$0xf0] }
  0xe9   : > { %v339_v6 = vpop.trf.xlu0 }
  0xea   : > { %1807 = vmatmul.msk.bf16.gmra.mxu0 %vm351_vm0, %v339_v6 }
  0xf9   : > { %v340_v7 = vpop.trf.xlu0 }
  0xfa   : > { %1808 = vmatmul.msk.bf16.gmra.mxu0 %vm351_vm0, %v340_v7  ;;  %v1892_v7 = vor.u32 %v2113_v4, %v1889_v5  ;;  %v1920_v4 = vor.u32 %v2122_v1, %v1919_v0  ;;  %v2121_v5 = vld [vmem:[%s3302_s5 + $0x8c] sm:$0xf] }
  0xfc   : > { %735 = vmatpush.bf16.msrb.mxu3 %v1892_v7 }
 0x109   : > { %v341_v8 = vpop.trf.xlu0 }
 0x10a   : > { %1809 = vmatmul.msk.bf16.gmra.mxu0 %vm351_vm0, %v341_v8  ;;  %v1887_v8 = vld [vmem:[%s3302_s5 + $0x180] sm:$0xf] }
 0x119   : > { %v342_v9 = vpop.trf.xlu0 }
 0x11a   : > { %1810 = vmatmul.msk.bf16.vlgmr.msra.gmra.mxu3 %vm351_vm0, %v342_v9  ;;  %v2114_v9 = vld [vmem:[%s3302_s5 + $0x19c] sm:$0xf0] }
 0x11b   : > { %v1888_v12 = vor.u32 %v2114_v9, %v1887_v8 }
 0x11d   : > { %686 = vmatpush.bf16.msrb.mxu2 %v1888_v12 }
 0x129   : > { %v343_v11 = vpop.trf.xlu0 }
 0x12a   : > { %1811 = vmatmul.msk.bf16.gmra.mxu3 %vm351_vm0, %v343_v11 }
 0x139   : > { %v344_v15 = vpop.trf.xlu0 }
 0x13a   : > { %1812 = vmatmul.msk.bf16.gmra.mxu3 %vm351_vm0, %v344_v15  ;;  %v1956_v15 = vor.u32 %v2129_v10, %v1953_v13  ;;  %v1847_v10 = vld [vmem:[%s3302_s5 + $0x40] sm:$0xf]  ;;  %v2103_v13 = vld [vmem:[%s3302_s5 + $0x44] sm:$0xf] }
 0x13c   : > { %1022 = vmatpush.bf16.msrb.mxu1 %v1956_v15  ;;  %v1911_v15 = vld [vmem:[%s3302_s5 + $0x48] sm:$0xf] }
 0x147   : > { %v385_v16 = vpop.f32.mrf.mxu0 }
 0x148   : > { %v386_v18 = vadd.f32 %v2455_v17, %v385_v16 }
 0x14a   : > { %v425_v20 = vmax.f32 %v386_v18, 0.0 }
 0x14f   : > { %v387_v19 = vpop.f32.mrf.mxu0 }
 0x150   : > { %v388_v21 = vadd.f32 %v2455_v17, %v387_v19  ;;  %v2111_v19 = vld [vmem:[%s3302_s5 + $0x144] sm:$0xf] }
 0x152   : > { %v426_v22 = vmax.f32 %v388_v21, 0.0 }
 0x154   : > { %v441_v23 = vpack.c.bf16 %v426_v22, %v425_v20  ;;  %v1881_v20 = vld [vmem:[%s3302_s5 + $0x160] sm:$0xf0]  ;;  %v1943_v22 = vld [vmem:[%s3302_s5 + $0x148] sm:$0xf] }
 0x155   : > { %v1884_v21 = vor.u32 %v2111_v19, %v1881_v20  ;;  %v2120_v19 = vld [vmem:[%s3302_s5 + $0x64] sm:$0xf0]  ;;  %v2119_v20 = vld [vmem:[%s3302_s5 + $0x4c] sm:$0xf] }
 0x156   : > { %1829 = vmatmul.msk.bf16.vlgmr.msra.gmra.mxu1 %vm485_vm1, %v441_v23  ;;  %v2128_v23 = vld [vmem:[%s3302_s5 + $0x164] sm:$0xf0] }
 0x157   : > { %v390_v24 = vpop.f32.mrf.mxu0  ;;  %736 = vmatpush.bf16.msrb.mxu3 %v1884_v21  ;;  %v1913_v21 = vld [vmem:[%s3302_s5 + $0x68] sm:$0xf0] }
 0x158   : > { %v391_v25 = vadd.f32 %v2455_v17, %v390_v24  ;;  %v1879_v24 = vld [vmem:[%s3302_s5 + $0x140] sm:$0xf] }
 0x15a   : > { %v427_v27 = vmax.f32 %v391_v25, 0.0 }
 0x15f   : > { %v392_v26 = vpop.f32.mrf.mxu0 }
 0x160   : > { %v393_v28 = vadd.f32 %v2455_v17, %v392_v26  ;;  %v1944_v26 = vor.u32 %v2128_v23, %v1943_v22  ;;  %v1912_v22 = vor.u32 %v2120_v19, %v1911_v15  ;;  %v1916_v23 = vor.u32 %v2119_v20, %v1913_v21  ;;  %v2079_v15 = vld [vmem:[%s3302_s5 + $0x198] sm:$0xf] }
 0x162   : > { %v428_v29 = vmax.f32 %v393_v28, 0.0  ;;  %v2127_v28 = vld [vmem:[%s3302_s5 + $0x14c] sm:$0xf]  ;;  %974 = vmatpush.bf16.msrb.mxu0 %v1944_v26  ;;  %v2101_v26 = vld [vmem:[%s3302_s5 + $0x4] sm:$0xf] }
 0x164   : > { %v442_v30 = vpack.c.bf16 %v428_v29, %v427_v27  ;;  %v2112_v27 = vld [vmem:[%s3302_s5 + $0x15c] sm:$0xf0]  ;;  %v1945_v29 = vld [vmem:[%s3302_s5 + $0x168] sm:$0xf0] }
 0x166   : > { %1830 = vmatmul.msk.bf16.gmra.mxu1 %vm485_vm1, %v442_v30  ;;  %v1880_v30 = vor.u32 %v2112_v27, %v1879_v24  ;;  %v1839_v24 = vld [vmem:[%s3302_s5] sm:$0xf] }
 0x167   : > { %v395_v31 = vpop.f32.mrf.mxu0 }
 0x168   : > { %v396_v32 = vadd.f32 %v2455_v17, %v395_v31  ;;  %v1948_v31 = vor.u32 %v2127_v28, %v1945_v29  ;;  %687 = vmatpush.bf16.msrb.mxu2 %v1880_v30  ;;  %v1841_v29 = vld [vmem:[%s3302_s5 + $0x20] sm:$0xf0]  ;;  %v1903_v30 = vld [vmem:[%s3302_s5 + $0x8] sm:$0xf] }
 0x16a   : > { %v429_v34 = vmax.f32 %v396_v32, 0.0  ;;  %v1871_v32 = vld [vmem:[%s3302_s5 + $0x100] sm:$0xf]  ;;  %1023 = vmatpush.bf16.msrb.mxu1 %v1948_v31  ;;  %v2118_v31 = vld [vmem:[%s3302_s5 + $0x24] sm:$0xf0] }
 0x16f   : > { %v397_v33 = vpop.f32.mrf.mxu0 }
 0x170   : > { %v398_v35 = vadd.f32 %v2455_v17, %v397_v33  ;;  %v2110_v33 = vld [vmem:[%s3302_s5 + $0x11c] sm:$0xf0] }
 0x172   : > { %v430_v36 = vmax.f32 %v398_v35, 0.0 }
 0x174   : > { %v443_v37 = vpack.c.bf16 %v430_v36, %v429_v34  ;;  %v2109_v34 = vld [vmem:[%s3302_s5 + $0x104] sm:$0xf]  ;;  %v1872_v36 = vor.u32 %v2110_v33, %v1871_v32  ;;  %v1844_v32 = vor.u32 %v2101_v26, %v1841_v29  ;;  %v1904_v33 = vor.u32 %v2118_v31, %v1903_v30  ;;  %v2001_v26 = vld [vmem:[%s3302_s5 + $0x130] sm:$0xf0]  ;;  %v2144_v29 = vld [vmem:[%s3302_s5 + $0x16c] sm:$0xf0] }
 0x176   : > { %1831 = vmatmul.msk.bf16.gmra.mxu1 %vm485_vm1, %v443_v37  ;;  %v1873_v37 = vld [vmem:[%s3302_s5 + $0x120] sm:$0xf0]  ;;  %688 = vmatpush.bf16.msrb.mxu2 %v1872_v36 }
 0x177   : > { %v400_v38 = vpop.f32.mrf.mxu0 }
 0x178   : > { %v401_v39 = vadd.f32 %v2455_v17, %v400_v38  ;;  %v1935_v38 = vld [vmem:[%s3302_s5 + $0x108] sm:$0xf] }
 0x17a   : > { %v431_v41 = vmax.f32 %v401_v39, 0.0  ;;  %v2126_v39 = vld [vmem:[%s3302_s5 + $0x124] sm:$0xf0] }
 0x17f   : > { %v402_v40 = vpop.f32.mrf.mxu0 }
 0x180   : > { %v403_v42 = vadd.f32 %v2455_v17, %v402_v40  ;;  %v1876_v40 = vor.u32 %v2109_v34, %v1873_v37  ;;  %v2117_v34 = vld [vmem:[%s3302_s5 + $0xc] sm:$0xf] }
 0x182   : > { %v432_v43 = vmax.f32 %v403_v42, 0.0  ;;  %v2125_v42 = vld [vmem:[%s3302_s5 + $0x10c] sm:$0xf]  ;;  %737 = vmatpush.bf16.msrb.mxu3 %v1876_v40 }
 0x184   : > { %v444_v44 = vpack.c.bf16 %v432_v43, %v431_v41  ;;  %v1936_v41 = vor.u32 %v2126_v39, %v1935_v38  ;;  %v1937_v43 = vld [vmem:[%s3302_s5 + $0x128] sm:$0xf0] }
 0x186   : > { %1832 = vmatmul.msk.bf16.gmra.mxu1 %vm485_vm1, %v444_v44  ;;  %v1940_v44 = vor.u32 %v2125_v42, %v1937_v43  ;;  %975 = vmatpush.bf16.msrb.mxu0 %v1936_v41  ;;  %v2147_v43 = vld [vmem:[%s3302_s5 + $0x1d4] sm:$0xf] }
 0x187   : > { %v405_v45 = vpop.f32.mrf.mxu0 }
 0x188   : > { %v406_v46 = vadd.f32 %v2455_v17, %v405_v45  ;;  %v1863_v45 = vld [vmem:[%s3302_s5 + $0xc0] sm:$0xf]  ;;  %1024 = vmatpush.bf16.msrb.mxu1 %v1940_v44  ;;  %v2025_v44 = vld [vmem:[%s3302_s5 + $0x1f0] sm:$0xf0] }
 0x18a   : > { %v433_v48 = vmax.f32 %v406_v46, 0.0  ;;  %v2108_v46 = vld [vmem:[%s3302_s5 + $0xdc] sm:$0xf0] }
 0x18c   : > { %1025 = vmatpush.bf16.msrb.mxu1 %v1932_v56  ;;  %v2020_v56 = vor.u32 %v2145_v53, %v2017_v54  ;;  %v2073_v53 = vld [vmem:[%s3302_s5 + $0x178] sm:$0xf0]  ;;  %v2063_v54 = vld [vmem:[%s3302_s5 + $0x118] sm:$0xf] }
 0x18f   : > { %v407_v47 = vpop.f32.mrf.mxu0 }
 0x190   : > { %v408_v49 = vadd.f32 %v2455_v17, %v407_v47  ;;  %v1864_v47 = vor.u32 %v2108_v46, %v1863_v45  ;;  %v2028_v45 = vor.u32 %v2147_v43, %v2025_v44 }
 0x192   : > { %v434_v50 = vmax.f32 %v408_v49, 0.0  ;;  %v1865_v49 = vld [vmem:[%s3302_s5 + $0xe0] sm:$0xf0]  ;;  %689 = vmatpush.bf16.msrb.mxu2 %v1864_v47 }
 0x194   : > { %v445_v51 = vpack.c.bf16 %v434_v50, %v433_v48  ;;  %v2107_v48 = vld [vmem:[%s3302_s5 + $0xc4] sm:$0xf]  ;;  %v1927_v50 = vld [vmem:[%s3302_s5 + $0xc8] sm:$0xf] }
 0x196   : > { %1833 = vmatmul.msk.bf16.gmra.mxu1 %vm485_vm1, %v445_v51  ;;  %v1868_v51 = vor.u32 %v2107_v48, %v1865_v49  ;;  %690 = vmatpush.bf16.msrb.mxu2 %v1856_v62 }
 0x198   : > { %738 = vmatpush.bf16.msrb.mxu3 %v1868_v51 }
 0x19c   : > { %739 = vmatpush.bf16.msrb.mxu3 %v1860_v3 }
 0x19d   : > { %v410_v55 = vpop.f32.mrf.mxu3 }
 0x19e   : > { %v411_v6 = vadd.f32 %v2455_v17, %v410_v55  ;;  %v1928_v55 = vor.u32 %v2124_v52, %v1927_v50 }
 0x1a0   : > { %v435_v16 = vmax.f32 %v411_v6, 0.0  ;;  %976 = vmatpush.bf16.msrb.mxu0 %v1928_v55  ;;  %v1921_v6 = vld [vmem:[%s3302_s5 + $0xa8] sm:$0xf0]  ;;  %v2023_v55 = vld [vmem:[%s3302_s5 + $0x1d0] sm:$0xf] }
 0x1a1   : > { %v1924_v7 = vor.u32 %v2121_v5, %v1921_v6  ;;  %v2143_v5 = vld [vmem:[%s3302_s5 + $0x154] sm:$0xf] }
 0x1a2   : > { %v2009_v6 = vld [vmem:[%s3302_s5 + $0x170] sm:$0xf0] }
 0x1a3   : > { %1026 = vmatpush.bf16.msrb.mxu1 %v1924_v7  ;;  %v2015_v7 = vld [vmem:[%s3302_s5 + $0x190] sm:$0xf] }
 0x1a4   : > { %977 = vmatpush.bf16.msrb.mxu0 %v1920_v4 }
 0x1a5   : > { %v412_v11 = vpop.f32.mrf.mxu3 }
 0x1a6   : > { %v413_v14 = vadd.f32 %v2455_v17, %v412_v11  ;;  %v2104_v11 = vld [vmem:[%s3302_s5 + $0x5c] sm:$0xf0] }
 0x1a7   : > { %v1848_v12 = vor.u32 %v2104_v11, %v1847_v10  ;;  %1027 = vmatpush.bf16.msrb.mxu1 %v1916_v23 }
 0x1a8   : > { %v436_v18 = vmax.f32 %v413_v14, 0.0  ;;  %v1849_v14 = vld [vmem:[%s3302_s5 + $0x60] sm:$0xf0]  ;;  %978 = vmatpush.bf16.msrb.mxu0 %v1912_v22 }
 0x1a9   : > { %691 = vmatpush.bf16.msrb.mxu2 %v1848_v12  ;;  %v2163_v12 = vld [vmem:[%s3302_s5 + $0x1dc] sm:$0xf] }
 0x1aa   : > { %v446_v25 = vpack.c.bf16 %v436_v18, %v435_v16  ;;  %v1852_v18 = vor.u32 %v2103_v13, %v1849_v14  ;;  %v2089_v13 = vld [vmem:[%s3302_s5 + $0x1f8] sm:$0xf0] }
 0x1ab   : > { %v2736_v14 = vor.u32 %v2163_v12, %v2089_v13 }
 0x1ac   : > { %1834 = vmatmul.msk.bf16.vlgmr.msra.gmra.mxu2 %vm485_vm1, %v446_v25  ;;  %740 = vmatpush.bf16.msrb.mxu3 %v1852_v18  ;;  %v2102_v25 = vld [vmem:[%s3302_s5 + $0x1c] sm:$0xf0] }
 0x1ad   : > { %v415_v35 = vpop.f32.mrf.mxu3  ;;  %v1840_v28 = vor.u32 %v2102_v25, %v1839_v24  ;;  %979 = vmatpush.bf16.msrb.mxu0 %v1904_v33  ;;  %v2141_v25 = vld [vmem:[%s3302_s5 + $0x114] sm:$0xf]  ;;  %v2081_v33 = vld [vmem:[%s3302_s5 + $0x1b8] sm:$0xf0] }
 0x1ae   : > { %v416_v57 = vadd.f32 %v2455_v17, %v415_v35  ;;  %v1905_v35 = vld [vmem:[%s3302_s5 + $0x28] sm:$0xf0] }
 0x1af   : > { %v1908_v36 = vor.u32 %v2117_v34, %v1905_v35  ;;  %692 = vmatpush.bf16.msrb.mxu2 %v1840_v28  ;;  %v2004_v28 = vor.u32 %v2141_v25, %v2001_v26  ;;  %v2071_v34 = vld [vmem:[%s3302_s5 + $0x158] sm:$0xf] }
 0x1b0   : > { %v437_v8 = vmax.f32 %v416_v57, 0.0  ;;  %741 = vmatpush.bf16.msrb.mxu3 %v1844_v32  ;;  %v2148_v57 = vld [vmem:[%s3302_s5 + $0x1ec] sm:$0xf0]  ;;  %v2161_v32 = vld [vmem:[%s3302_s5 + $0x19c] sm:$0xf] }
 0x1b1   : > { %1028 = vmatpush.bf16.msrb.mxu1 %v1908_v36  ;;  %v2024_v58 = vor.u32 %v2148_v57, %v2023_v55  ;;  %v2774_v35 = vor.u32 %v2161_v32, %v2081_v33  ;;  %v2160_v36 = vld [vmem:[%s3302_s5 + $0x174] sm:$0xf0] }
 0x1b2   : > { %v2158_v55 = vld [vmem:[%s3302_s5 + $0x134] sm:$0xf0] }
 0x1b3   : > { %1254 = vmatpush.bf16.msra.mxu2 %v2024_v58  ;;  %v2064_v57 = vor.u32 %v2158_v55, %v2063_v54  ;;  %v2047_v25 = vld [vmem:[%s3302_s5 + $0x98] sm:$0xf] }
 0x1b4   : > { %1303 = vmatpush.bf16.msra.mxu3 %v2028_v45 }
 0x1b5   : > { %v417_v61 = vpop.f32.mrf.mxu3  ;;  %1585 = vmatpush.bf16.msra.mxu1 %v2736_v14 }
 0x1b6   : > { %v418_v2 = vadd.f32 %v2455_v17, %v417_v61  ;;  %v2164_v61 = vld [vmem:[%s3302_s5 + $0x1f4] sm:$0xf0] }
 0x1b7   : > { %v2088_v62 = vor.u32 %v2164_v61, %v2087_v60 }
 0x1b8   : > { %v438_v9 = vmax.f32 %v418_v2, 0.0  ;;  %1304 = vmatpush.bf16.msra.mxu3 %v2020_v56 }
 0x1b9   : > { %1536 = vmatpush.bf16.msra.mxu0 %v2088_v62  ;;  %1586 = vmatpush.bf16.msra.mxu1 %v2774_v35 }
 0x1ba   : > { %v447_v16 = vpack.c.bf16 %v438_v9, %v437_v8  ;;  %v2012_v8 = vor.u32 %v2143_v5, %v2009_v6  ;;  %v2146_v9 = vld [vmem:[%s3302_s5 + $0x1ac] sm:$0xf0]  ;;  %v2157_v6 = vld [vmem:[%s3302_s5 + $0x11c] sm:$0xf] }
 0x1bb   : > { %v2016_v10 = vor.u32 %v2146_v9, %v2015_v7  ;;  %v2140_v5 = vld [vmem:[%s3302_s5 + $0xec] sm:$0xf0]  ;;  %v2055_v9 = vld [vmem:[%s3302_s5 + $0xd8] sm:$0xf] }
 0x1bc   : > { %1835 = vmatmul.msk.bf16.gmra.mxu2 %vm485_vm1, %v447_v16  ;;  %1305 = vmatpush.bf16.msra.mxu3 %v2012_v8  ;;  %v2162_v16 = vld [vmem:[%s3302_s5 + $0x1b4] sm:$0xf0]  ;;  %v2065_v8 = vld [vmem:[%s3302_s5 + $0x138] sm:$0xf0] }
 0x1bd   : > { %v420_v27 = vpop.f32.mrf.mxu3  ;;  %1255 = vmatpush.bf16.msra.mxu2 %v2016_v10  ;;  %v2080_v18 = vor.u32 %v2162_v16, %v2079_v15  ;;  %v2156_v10 = vld [vmem:[%s3302_s5 + $0xf4] sm:$0xf0]  ;;  %v2135_v15 = vld [vmem:[%s3302_s5 + $0x54] sm:$0xf] }
 0x1be   : > { %v421_v37 = vadd.f32 %v2455_v17, %v420_v27  ;;  %v2007_v27 = vld [vmem:[%s3302_s5 + $0x150] sm:$0xf]  ;;  %v2056_v12 = vor.u32 %v2156_v10, %v2055_v9  ;;  %v1977_v16 = vld [vmem:[%s3302_s5 + $0x70] sm:$0xf0] }
 0x1bf   : > { %1537 = vmatpush.bf16.msra.mxu0 %v2080_v18  ;;  %v2008_v30 = vor.u32 %v2144_v29, %v2007_v27  ;;  %v1980_v18 = vor.u32 %v2135_v15, %v1977_v16  ;;  %v2154_v27 = vld [vmem:[%s3302_s5 + $0xb4] sm:$0xf0] }
 0x1c0   : > { %v439_v40 = vmax.f32 %v421_v37, 0.0  ;;  %1306 = vmatpush.bf16.msra.mxu3 %v2004_v28  ;;  %v2139_v37 = vld [vmem:[%s3302_s5 + $0xd4] sm:$0xf]  ;;  %v2048_v28 = vor.u32 %v2154_v27, %v2047_v25 }
 0x1c1   : > { %1256 = vmatpush.bf16.msra.mxu2 %v2008_v30 }
 0x1c5   : > { %v422_v38 = vpop.f32.mrf.mxu3 }
 0x1c6   : > { %v423_v39 = vadd.f32 %v2455_v17, %v422_v38  ;;  %v2682_v17 = vld [vmem:[%s3301_s4] ss:$0 sm:$0xff]  ;;  %v1993_v38 = vld [vmem:[%s3302_s5 + $0xf0] sm:$0xf0] }
 0x1c8   : > { %v440_v41 = vmax.f32 %v423_v39, 0.0  ;;  %v2072_v39 = vor.u32 %v2160_v36, %v2071_v34 }
 0x1ca   : > { %v448_v42 = vpack.c.bf16 %v440_v41, %v439_v40  ;;  %v1996_v40 = vor.u32 %v2139_v37, %v1993_v38  ;;  %1538 = vmatpush.bf16.msra.mxu0 %v2072_v39  ;;  %v2133_v37 = vld [vmem:[%s3302_s5 + $0x14] sm:$0xf] }
 0x1cb   : > { %v1969_v38 = vld [vmem:[%s3302_s5 + $0x30] sm:$0xf0] }
 0x1cc   : > { %1836 = vmatmul.msk.bf16.gmra.mxu2 %vm485_vm1, %v448_v42  ;;  %1307 = vmatpush.bf16.msra.mxu3 %v1996_v40  ;;  %v1972_v39 = vor.u32 %v2133_v37, %v1969_v38  ;;  %v2153_v40 = vld [vmem:[%s3302_s5 + $0x9c] sm:$0xf] }
 0x1ce   : > { %1539 = vmatpush.bf16.msra.mxu0 %v2064_v57  ;;  %v1967_v57 = vld [vmem:[%s3302_s5 + $0x10] sm:$0xf] }
 0x1d2   : > { %1540 = vmatpush.bf16.msra.mxu0 %v2056_v12 }
 0x1d3   : > { %v519_v46 = vpop.f32.mrf.mxu1 }
 0x1d4   : > { %v520_v47 = vadd.f32 %v2682_v17, %v519_v46 }
 0x1d6   : > { %v559_v50 = vmax.f32 %v520_v47, 0.0  ;;  %v1999_v47 = vld [vmem:[%s3302_s5 + $0x110] sm:$0xf]  ;;  %1541 = vmatpush.bf16.msra.mxu0 %v2048_v28 }
 0x1db   : > { %v521_v48 = vpop.f32.mrf.mxu1 }
 0x1dc   : > { %v522_v49 = vadd.f32 %v2682_v17, %v521_v48  ;;  %v2142_v48 = vld [vmem:[%s3302_s5 + $0x12c] sm:$0xf0] }
 0x1de   : > { %v560_v51 = vmax.f32 %v522_v49, 0.0  ;;  %v2159_v49 = vld [vmem:[%s3302_s5 + $0x15c] sm:$0xf] }
 0x1df   : > { %v2812_v56 = vor.u32 %v2159_v49, %v2073_v53 }
 0x1e0   : > { %v2686_v52 = vpack.c.bf16 %v560_v51, %v559_v50  ;;  %v2000_v51 = vor.u32 %v2142_v48, %v1999_v47  ;;  %v2039_v47 = vld [vmem:[%s3302_s5 + $0x58] sm:$0xf] }
 0x1e1   : > { %1587 = vmatpush.bf16.msra.mxu1 %v2812_v56  ;;  %v2152_v48 = vld [vmem:[%s3302_s5 + $0x74] sm:$0xf0] }
 0x1e2   : > { %693 = vmatmul.bf16.vlgmr.msrb.gmra.mxu2 %v2686_v52  ;;  %742 = vmatmul.bf16.vlgmr.msrb.gmra.mxu3 %v2686_v52 }
 0x1e3   : > { %980 = vmatmul.bf16.vlgmr.msrb.gmra.mxu0 %v2686_v52  ;;  %1029 = vmatmul.bf16.vlgmr.msrb.gmra.mxu1 %v2686_v52  ;;  %v524_v59 = vpop.f32.mrf.mxu1 }
 0x1e4   : > { %v525_v63 = vadd.f32 %v2682_v17, %v524_v59  ;;  %1257 = vmatpush.bf16.msra.mxu2 %v2000_v51  ;;  %v2151_v51 = vld [vmem:[%s3302_s5 + $0x5c] sm:$0xf] }
 0x1e6   : > { %v561_v2 = vmax.f32 %v525_v63, 0.0  ;;  %v2137_v63 = vld [vmem:[%s3302_s5 + $0x94] sm:$0xf] }
 0x1eb   : > { %v526_v0 = vpop.f32.mrf.mxu1 }
 0x1ec   : > { %v527_v1 = vadd.f32 %v2682_v17, %v526_v0  ;;  %v1985_v0 = vld [vmem:[%s3302_s5 + $0xb0] sm:$0xf0] }
 0x1ee   : > { %v562_v3 = vmax.f32 %v527_v1, 0.0 }
 0x1f0   : > { %v2712_v4 = vpack.c.bf16 %v562_v3, %v561_v2  ;;  %v1988_v2 = vor.u32 %v2137_v63, %v1985_v0  ;;  %v1991_v3 = vld [vmem:[%s3302_s5 + $0xd0] sm:$0xf]  ;;  %v2149_v63 = vld [vmem:[%s3302_s5 + $0x1c] sm:$0xf] }
 0x1f1   : > { %v1992_v7 = vor.u32 %v2140_v5, %v1991_v3 }
 0x1f2   : > { %698 = vmatmul.bf16.gmra.mxu2 %v2712_v4  ;;  %747 = vmatmul.bf16.gmra.mxu3 %v2712_v4 }
 0x1f3   : > { %985 = vmatmul.bf16.gmra.mxu0 %v2712_v4  ;;  %1034 = vmatmul.bf16.gmra.mxu1 %v2712_v4  ;;  %v529_v11 = vpop.f32.mrf.mxu1 }
 0x1f4   : > { %v530_v19 = vadd.f32 %v2682_v17, %v529_v11  ;;  %1308 = vmatpush.bf16.msra.mxu3 %v1988_v2  ;;  %v2847_v11 = vor.u32 %v2157_v6, %v2065_v8  ;;  %1258 = vmatpush.bf16.msra.mxu2 %v1992_v7  ;;  %v2033_v2 = vld [vmem:[%s3302_s5 + $0x38] sm:$0xf0] }
 0x1f5   : > { %v2036_v5 = vor.u32 %v2149_v63, %v2033_v2 }
 0x1f6   : > { %v563_v22 = vmax.f32 %v530_v19, 0.0  ;;  %1588 = vmatpush.bf16.msra.mxu1 %v2847_v11  ;;  %v1983_v19 = vld [vmem:[%s3302_s5 + $0x90] sm:$0xf] }
 0x1f8   : > { %1309 = vmatpush.bf16.msra.mxu3 %v1980_v18 }
 0x1fb   : > { %v531_v20 = vpop.f32.mrf.mxu1 }
 0x1fc   : > { %v532_v21 = vadd.f32 %v2682_v17, %v531_v20  ;;  %v2138_v20 = vld [vmem:[%s3302_s5 + $0xac] sm:$0xf0]  ;;  %1310 = vmatpush.bf16.msra.mxu3 %v1972_v39 }
 0x1fe   : > { %v564_v23 = vmax.f32 %v532_v21, 0.0  ;;  %v1984_v21 = vor.u32 %v2138_v20, %v1983_v19 }
 0x200   : > { %v2747_v24 = vpack.c.bf16 %v564_v23, %v563_v22  ;;  %v2155_v22 = vld [vmem:[%s3302_s5 + $0xdc] sm:$0xf]  ;;  %1259 = vmatpush.bf16.msra.mxu2 %v1984_v21  ;;  %2170 = vmatpush.bf16.msrb.mxu3 %v2736_v14 }
 0x201   : > { %v2057_v23 = vld [vmem:[%s3302_s5 + $0xf8] sm:$0xf0] }
 0x202   : > { %703 = vmatmul.bf16.gmra.mxu2 %v2747_v24  ;;  %752 = vmatmul.bf16.gmra.mxu3 %v2747_v24  ;;  %v2871_v26 = vor.u32 %v2155_v22, %v2057_v23  ;;  %v2041_v14 = vld [vmem:[%s3302_s5 + $0x78] sm:$0xf0]  ;;  %v599_v22 = vld [vmem:[%s3303_s6] sm:$0x3] }
 0x203   : > { %990 = vmatmul.bf16.gmra.mxu0 %v2747_v24  ;;  %1039 = vmatmul.bf16.gmra.mxu1 %v2747_v24  ;;  %v534_v31 = vpop.f32.mrf.mxu1  ;;  %v2044_v54 = vor.u32 %v2151_v51, %v2041_v14  ;;  %v2974_v28 = vperm.slane %v599_v22, 0 }
 0x204   : > { %v535_v41 = vadd.f32 %v2682_v17, %v534_v31  ;;  %1589 = vmatpush.bf16.msra.mxu1 %v2871_v26  ;;  %2171 = vmatpush.bf16.msrb.mxu3 %v2774_v35  ;;  %v2150_v35 = vld [vmem:[%s3302_s5 + $0x34] sm:$0xf0] }
 0x206   : > { %v565_v44 = vmax.f32 %v535_v41, 0.0  ;;  %v2049_v41 = vld [vmem:[%s3302_s5 + $0xb8] sm:$0xf0] }
 0x208   : > { %2172 = vmatpush.bf16.msrb.mxu3 %v2812_v56 }
 0x20b   : > { %v536_v42 = vpop.f32.mrf.mxu1 }
 0x20c   : > { %v537_v43 = vadd.f32 %v2682_v17, %v536_v42  ;;  %v2052_v42 = vor.u32 %v2153_v40, %v2049_v41  ;;  %2173 = vmatpush.bf16.msrb.mxu3 %v2847_v11 }
 0x20e   : > { %v566_v45 = vmax.f32 %v537_v43, 0.0  ;;  %v1975_v43 = vld [vmem:[%s3302_s5 + $0x50] sm:$0xf]  ;;  %1590 = vmatpush.bf16.msra.mxu1 %v2052_v42 }
 0x210   : > { %v2788_v46 = vpack.c.bf16 %v566_v45, %v565_v44  ;;  %v2136_v44 = vld [vmem:[%s3302_s5 + $0x6c] sm:$0xf0]  ;;  %2174 = vmatpush.bf16.msrb.mxu3 %v2871_v26 }
 0x211   : > { %v1976_v45 = vor.u32 %v2136_v44, %v1975_v43 }
 0x212   : > { %708 = vmatmul.bf16.gmra.mxu2 %v2788_v46  ;;  %757 = vmatmul.bf16.gmra.mxu3 %v2788_v46 }
 0x213   : > { %995 = vmatmul.bf16.gmra.mxu0 %v2788_v46  ;;  %1044 = vmatmul.bf16.gmra.mxu1 %v2788_v46  ;;  %v539_v50 = vpop.f32.mrf.mxu1 }
 0x214   : > { %v540_v58 = vadd.f32 %v2682_v17, %v539_v50  ;;  %1260 = vmatpush.bf16.msra.mxu2 %v1976_v45  ;;  %v2040_v50 = vor.u32 %v2152_v48, %v2039_v47  ;;  %1591 = vmatpush.bf16.msra.mxu1 %v2044_v54 }
 0x215   : > { %2175 = vmatpush.bf16.msrb.mxu3 %v2052_v42 }
 0x216   : > { %v567_v61 = vmax.f32 %v540_v58, 0.0  ;;  %1542 = vmatpush.bf16.msra.mxu0 %v2040_v50  ;;  %v2134_v58 = vld [vmem:[%s3302_s5 + $0x2c] sm:$0xf0] }
 0x218   : > { %1592 = vmatpush.bf16.msra.mxu1 %v2036_v5 }
 0x219   : > { %2176 = vmatpush.bf16.msrb.mxu3 %v2044_v54 }
 0x21b   : > { %v541_v59 = vpop.f32.mrf.mxu1 }
 0x21c   : > { %v542_v60 = vadd.f32 %v2682_v17, %v541_v59  ;;  %v2031_v59 = vld [vmem:[%s3302_s5 + $0x18] sm:$0xf] }
 0x21d   : > { %v2032_v0 = vor.u32 %v2150_v35, %v2031_v59  ;;  %2177 = vmatpush.bf16.msrb.mxu3 %v2036_v5 }
 0x21e   : > { %v568_v62 = vmax.f32 %v542_v60, 0.0 }
 0x21f   : > { %1543 = vmatpush.bf16.msra.mxu0 %v2032_v0 }
 0x220   : > { %v2823_v1 = vpack.c.bf16 %v568_v62, %v567_v61  ;;  %v1968_v62 = vor.u32 %v2134_v58, %v1967_v57 }
 0x222   : > { %713 = vmatmul.bf16.gmra.mxu2 %v2823_v1  ;;  %762 = vmatmul.bf16.gmra.mxu3 %v2823_v1 }
 0x223   : > { %1000 = vmatmul.bf16.gmra.mxu0 %v2823_v1  ;;  %1049 = vmatmul.bf16.gmra.mxu1 %v2823_v1 }
 0x224   : > { %1261 = vmatpush.bf16.msra.mxu2 %v1968_v62 }
 0x22f   : > { %v544_v13 = vpop.f32.mrf.mxu2 }
 0x230   : > { %v545_v29 = vadd.f32 %v2682_v17, %v544_v13 }
 0x232   : > { %v569_v32 = vmax.f32 %v545_v29, 0.0  ;;  %v2976_v29 = vperm.slane %v599_v22, 1 }
 0x237   : > { %v546_v30 = vpop.f32.mrf.mxu2 }
 0x238   : > { %v547_v31 = vadd.f32 %v2682_v17, %v546_v30 }
 0x23a   : > { %v570_v33 = vmax.f32 %v547_v31, 0.0 }
 0x23c   : > { %v2879_v34 = vpack.c.bf16 %v570_v33, %v569_v32 }
 0x23e   : > { %718 = vmatmul.bf16.gmra.mxu2 %v2879_v34  ;;  %767 = vmatmul.bf16.gmra.mxu3 %v2879_v34 }
 0x23f   : > { %1005 = vmatmul.bf16.gmra.mxu0 %v2879_v34  ;;  %1054 = vmatmul.bf16.gmra.mxu1 %v2879_v34  ;;  %v549_v36 = vpop.f32.mrf.mxu2 }
 0x240   : > { %v550_v49 = vadd.f32 %v2682_v17, %v549_v36 }
 0x242   : > { %v571_v60 = vmax.f32 %v550_v49, 0.0 }
 0x247   : > { %v551_v53 = vpop.f32.mrf.mxu2 }
 0x248   : > { %v552_v55 = vadd.f32 %v2682_v17, %v551_v53 }
 0x24a   : > { %v572_v61 = vmax.f32 %v552_v55, 0.0 }
 0x24c   : > { %v2938_v3 = vpack.c.bf16 %v572_v61, %v571_v60 }
 0x24e   : > { %723 = vmatmul.bf16.gmra.mxu2 %v2938_v3  ;;  %772 = vmatmul.bf16.gmra.mxu3 %v2938_v3 }
 0x24f   : > { %1010 = vmatmul.bf16.gmra.mxu0 %v2938_v3  ;;  %1059 = vmatmul.bf16.gmra.mxu1 %v2938_v3  ;;  %v554_v6 = vpop.f32.mrf.mxu2 }
 0x250   : > { %v555_v56 = vadd.f32 %v2682_v17, %v554_v6 }
 0x252   : > { %v573_v9 = vmax.f32 %v555_v56, 0.0 }
 0x257   : > { %v556_v7 = vpop.f32.mrf.mxu2 }
 0x258   : > { %v557_v8 = vadd.f32 %v2682_v17, %v556_v7  ;;  %v886_v17 = vld [vmem:[%s3303_s6 + $0x2] sm:$0x3] }
 0x259   : > { %v2961_v20 = vperm.slane %v886_v17, 0  ;;  %v2963_v21 = vperm.slane %v886_v17, 1 }
 0x25a   : > { %v574_v10 = vmax.f32 %v557_v8, 0.0 }
 0x25c   : > { %v2948_v12 = vpack.c.bf16 %v574_v10, %v573_v9 }
 0x25e   : > { %728 = vmatmul.bf16.gmra.mxu2 %v2948_v12  ;;  %777 = vmatmul.bf16.gmra.mxu3 %v2948_v12 }
 0x25f   : > { %1015 = vmatmul.bf16.gmra.mxu0 %v2948_v12  ;;  %1064 = vmatmul.bf16.gmra.mxu1 %v2948_v12 }
 0x260   : > { %v981_v11 = vpop.f32.mrf.mxu0  ;;  %v1030_v13 = vpop.f32.mrf.mxu1 }
 0x261   : > { %v982_v26 = vadd.f32 %v981_v11, %v2961_v20  ;;  %v1031_v27 = vadd.f32 %v1030_v13, %v2963_v21 }
 0x263   : > { %v1070_v36 = vmax.f32 %v982_v26, 0.0  ;;  %v1071_v37 = vmax.f32 %v1031_v27, 0.0 }
 0x265   : > { %v694_v15 = vpop.f32.mrf.mxu2  ;;  %v743_v16 = vpop.f32.mrf.mxu3 }
 0x266   : > { %v695_v40 = vadd.f32 %v694_v15, %v2974_v28  ;;  %v744_v41 = vadd.f32 %v743_v16, %v2976_v29 }
 0x268   : > { %v2957_v18 = vpop.f32.mrf.mxu0  ;;  %v2959_v19 = vpop.f32.mrf.mxu1  ;;  %v783_v48 = vmax.f32 %v695_v40, 0.0  ;;  %v784_v49 = vmax.f32 %v744_v41, 0.0 }
 0x26d   : > { %v696_v23 = vpop.f32.mrf.mxu2  ;;  %v745_v25 = vpop.f32.mrf.mxu3 }
 0x26e   : > { %1262 = vmatmul.bf16.vlgmr.msra.gmra.mxu2 %v2686_v52  ;;  %1311 = vmatmul.bf16.vlgmr.msra.gmra.mxu3 %v2686_v52  ;;  %v697_v57 = vadd.f32 %v696_v23, %v2974_v28  ;;  %v746_v58 = vadd.f32 %v745_v25, %v2976_v29 }
 0x26f   : > { %1544 = vmatmul.bf16.vlgmr.msra.gmra.mxu0 %v2686_v52  ;;  %1593 = vmatmul.bf16.vlgmr.msra.gmra.mxu1 %v2686_v52 }
 0x270   : > { %v986_v30 = vpop.f32.mrf.mxu0  ;;  %v1035_v31 = vpop.f32.mrf.mxu1  ;;  %v785_v35 = vmax.f32 %v697_v57, 0.0  ;;  %v786_v63 = vmax.f32 %v746_v58, 0.0 }
 0x271   : > { %v987_v32 = vadd.f32 %v986_v30, %v2961_v20  ;;  %v1036_v33 = vadd.f32 %v1035_v31, %v2963_v21 }
 0x273   : > { %v1074_v38 = vmax.f32 %v987_v32, 0.0  ;;  %v1075_v39 = vmax.f32 %v1036_v33, 0.0 }
 0x275   : > { %v1102_v42 = vmax.f32 %v1070_v36, %v1074_v38  ;;  %v1123_v52 = vmax.f32 %v1071_v37, %v1075_v39  ;;  %v699_v43 = vpop.f32.mrf.mxu2  ;;  %v748_v44 = vpop.f32.mrf.mxu3 }
 0x276   : > { %v700_v45 = vadd.f32 %v699_v43, %v2974_v28  ;;  %v749_v47 = vadd.f32 %v748_v44, %v2976_v29 }
 0x278   : > { %v787_v50 = vmax.f32 %v700_v45, 0.0  ;;  %v788_v51 = vmax.f32 %v749_v47, 0.0  ;;  %v2984_v14 = vpop.f32.mrf.mxu0  ;;  %v2986_v53 = vpop.f32.mrf.mxu1 }
 0x27a   : > { %v815_v54 = vmax.f32 %v783_v48, %v787_v50  ;;  %v836_v55 = vmax.f32 %v784_v49, %v788_v51 }
 0x27d   : > { %v701_v59 = vpop.f32.mrf.mxu2  ;;  %v750_v60 = vpop.f32.mrf.mxu3 }
 0x27e   : > { %v702_v61 = vadd.f32 %v701_v59, %v2974_v28  ;;  %v751_v62 = vadd.f32 %v750_v60, %v2976_v29  ;;  %1267 = vmatmul.bf16.gmra.mxu2 %v2712_v4  ;;  %1316 = vmatmul.bf16.gmra.mxu3 %v2712_v4 }
 0x27f   : > { %1549 = vmatmul.bf16.gmra.mxu0 %v2712_v4  ;;  %1598 = vmatmul.bf16.gmra.mxu1 %v2712_v4 }
 0x280   : > { %v789_v0 = vmax.f32 %v702_v61, 0.0  ;;  %v790_v2 = vmax.f32 %v751_v62, 0.0  ;;  %v991_v5 = vpop.f32.mrf.mxu0  ;;  %v1040_v6 = vpop.f32.mrf.mxu1 }
 0x281   : > { %v992_v56 = vadd.f32 %v991_v5, %v2961_v20  ;;  %v1041_v7 = vadd.f32 %v1040_v6, %v2963_v21 }
 0x282   : > { %v816_v8 = vmax.f32 %v785_v35, %v789_v0  ;;  %v837_v9 = vmax.f32 %v786_v63, %v790_v2 }
 0x283   : > { %v1078_v10 = vmax.f32 %v992_v56, 0.0  ;;  %v1079_v11 = vmax.f32 %v1041_v7, 0.0 }
 0x285   : > { %v1104_v13 = vmax.f32 %v1102_v42, %v1078_v10  ;;  %v1125_v15 = vmax.f32 %v1123_v52, %v1079_v11  ;;  %v704_v16 = vpop.f32.mrf.mxu2  ;;  %v753_v17 = vpop.f32.mrf.mxu3 }
 0x286   : > { %v705_v4 = vadd.f32 %v704_v16, %v2974_v28  ;;  %v754_v22 = vadd.f32 %v753_v17, %v2976_v29 }
 0x288   : > { %v791_v23 = vmax.f32 %v705_v4, 0.0  ;;  %v792_v25 = vmax.f32 %v754_v22, 0.0  ;;  %v3000_v26 = vpop.f32.mrf.mxu0  ;;  %v3002_v27 = vpop.f32.mrf.mxu1  ;;  %v1038_v4 = vadd.f32 %v2986_v53, %v2963_v21  ;;  %v1033_v22 = vadd.f32 %v2959_v19, %v2963_v21 }
 0x28a   : > { %v817_v30 = vmax.f32 %v815_v54, %v791_v23  ;;  %v838_v31 = vmax.f32 %v836_v55, %v792_v25  ;;  %v994_v23 = vadd.f32 %v3000_v26, %v2961_v20  ;;  %v1073_v19 = vmax.f32 %v1033_v22, 0.0 }
 0x28c   : > { %v1080_v26 = vmax.f32 %v994_v23, 0.0 }
 0x28d   : > { %v706_v32 = vpop.f32.mrf.mxu2  ;;  %v755_v33 = vpop.f32.mrf.mxu3 }
 0x28e   : > { %v707_v36 = vadd.f32 %v706_v32, %v2974_v28  ;;  %v756_v37 = vadd.f32 %v755_v33, %v2976_v29  ;;  %1272 = vmatmul.bf16.gmra.mxu2 %v2747_v24  ;;  %1321 = vmatmul.bf16.gmra.mxu3 %v2747_v24  ;;  %v1077_v32 = vmax.f32 %v1038_v4, 0.0 }
 0x28f   : > { %1554 = vmatmul.bf16.gmra.mxu0 %v2747_v24  ;;  %1603 = vmatmul.bf16.gmra.mxu1 %v2747_v24 }
 0x290   : > { %v793_v38 = vmax.f32 %v707_v36, 0.0  ;;  %v794_v39 = vmax.f32 %v756_v37, 0.0  ;;  %v996_v40 = vpop.f32.mrf.mxu0  ;;  %v1045_v41 = vpop.f32.mrf.mxu1 }
 0x291   : > { %v997_v42 = vadd.f32 %v996_v40, %v2961_v20  ;;  %v1046_v52 = vadd.f32 %v1045_v41, %v2963_v21  ;;  %v1124_v41 = vmax.f32 %v1073_v19, %v1077_v32 }
 0x292   : > { %v3012_v43 = vmax.f32 %v816_v8, %v793_v38  ;;  %v3014_v44 = vmax.f32 %v837_v9, %v794_v39 }
 0x293   : > { %v1082_v45 = vmax.f32 %v997_v42, 0.0  ;;  %v1083_v47 = vmax.f32 %v1046_v52, 0.0 }
 0x295   : > { %v3016_v48 = vmax.f32 %v1104_v13, %v1082_v45  ;;  %v3018_v49 = vmax.f32 %v1125_v15, %v1083_v47  ;;  %v709_v50 = vpop.f32.mrf.mxu2  ;;  %v758_v24 = vpop.f32.mrf.mxu3  ;;  %v989_v15 = vadd.f32 %v2984_v14, %v2961_v20  ;;  %v1043_v14 = vadd.f32 %v3002_v27, %v2963_v21 }
 0x296   : > { %v710_v51 = vadd.f32 %v709_v50, %v2974_v28  ;;  %v759_v54 = vadd.f32 %v758_v24, %v2976_v29 }
 0x297   : > { %v1081_v27 = vmax.f32 %v1043_v14, 0.0 }
 0x298   : > { %v795_v55 = vmax.f32 %v710_v51, 0.0  ;;  %v796_v57 = vmax.f32 %v759_v54, 0.0  ;;  %v998_v60 = vpop.f32.mrf.mxu0  ;;  %v1047_v61 = vpop.f32.mrf.mxu1 }
 0x299   : > { %v999_v53 = vadd.f32 %v998_v60, %v2961_v20  ;;  %v1048_v33 = vadd.f32 %v1047_v61, %v2963_v21  ;;  %v1126_v51 = vmax.f32 %v1124_v41, %v1081_v27  ;;  %v2323_v61 = vmov 0.0  }
 0x29a   : > { %v3022_v58 = vmax.f32 %v817_v30, %v795_v55  ;;  %v3024_v59 = vmax.f32 %v838_v31, %v796_v57  ;;  %v1076_v31 = vmax.f32 %v989_v15, 0.0  ;;  %319 = vst [vmem:[%s3087_s27] sm:$0xff] %v2323_v61 }
 0x29b   : > { %v1084_v42 = vmax.f32 %v999_v53, 0.0 }
 0x29d   : > { %v711_v62 = vpop.f32.mrf.mxu2  ;;  %v760_v35 = vpop.f32.mrf.mxu3 }
 0x29e   : > { %1277 = vmatmul.bf16.gmra.mxu2 %v2788_v46  ;;  %1326 = vmatmul.bf16.gmra.mxu3 %v2788_v46  ;;  %v712_v36 = vadd.f32 %v711_v62, %v2974_v28  ;;  %v761_v37 = vadd.f32 %v760_v35, %v2976_v29 }
 0x29f   : > { %1559 = vmatmul.bf16.gmra.mxu0 %v2788_v46  ;;  %1608 = vmatmul.bf16.gmra.mxu1 %v2788_v46 }
 0x2a0   : > { %v1001_v63 = vpop.f32.mrf.mxu0  ;;  %v1050_v0 = vpop.f32.mrf.mxu1  ;;  %v797_v54 = vmax.f32 %v712_v36, 0.0  ;;  %v798_v55 = vmax.f32 %v761_v37, 0.0 }
 0x2a1   : > { %v1002_v52 = vadd.f32 %v1001_v63, %v2961_v20  ;;  %v1051_v45 = vadd.f32 %v1050_v0, %v2963_v21 }
 0x2a2   : > { %v820_v23 = vmax.f32 %v3012_v43, %v797_v54  ;;  %v841_v14 = vmax.f32 %v3014_v44, %v798_v55 }
 0x2a3   : > { %v1086_v4 = vmax.f32 %v1002_v52, 0.0 }
 0x2a5   : > { %v714_v2 = vpop.f32.mrf.mxu2  ;;  %v763_v5 = vpop.f32.mrf.mxu3 }
 0x2a6   : > { %v715_v47 = vadd.f32 %v714_v2, %v2974_v28  ;;  %v764_v50 = vadd.f32 %v763_v5, %v2976_v29  ;;  %v1087_v5 = vmax.f32 %v1051_v45, 0.0 }
 0x2a8   : > { %v1003_v6 = vpop.f32.mrf.mxu0  ;;  %v1052_v56 = vpop.f32.mrf.mxu1  ;;  %v800_v22 = vmax.f32 %v764_v50, 0.0  ;;  %v1129_v19 = vmax.f32 %v3018_v49, %v1087_v5 }
 0x2a9   : > { %v1004_v62 = vadd.f32 %v1003_v6, %v2961_v20  ;;  %v1053_v35 = vadd.f32 %v1052_v56, %v2963_v21 }
 0x2ab   : > { %v1088_v56 = vmax.f32 %v1004_v62, 0.0  ;;  %v1089_v32 = vmax.f32 %v1053_v35, 0.0 }
 0x2ad   : > { %v716_v46 = vpop.f32.mrf.mxu2  ;;  %v765_v7 = vpop.f32.mrf.mxu3 }
 0x2ae   : > { %1282 = vmatmul.bf16.gmra.mxu2 %v2823_v1  ;;  %1331 = vmatmul.bf16.gmra.mxu3 %v2823_v1  ;;  %v717_v0 = vadd.f32 %v716_v46, %v2974_v28  ;;  %v766_v2 = vadd.f32 %v765_v7, %v2976_v29 }
 0x2af   : > { %1564 = vmatmul.bf16.gmra.mxu0 %v2823_v1  ;;  %1613 = vmatmul.bf16.gmra.mxu1 %v2823_v1 }
 0x2b0   : > { %v802_v43 = vmax.f32 %v766_v2, 0.0 }
 0x2b2   : > { %v843_v49 = vmax.f32 %v841_v14, %v802_v43 }
 0x2bc   : > { %v3034_v8 = vpop.f32.mrf.mxu0  ;;  %v3036_v9 = vpop.f32.mrf.mxu1 }
 0x2bd   : > { %v1056_v6 = vadd.f32 %v3036_v9, %v2963_v21  ;;  %v1108_v9 = vmax.f32 %v3016_v48, %v1086_v4 }
 0x2be   : > { %1287 = vmatmul.bf16.gmra.mxu2 %v2879_v34  ;;  %1336 = vmatmul.bf16.gmra.mxu3 %v2879_v34 }
 0x2bf   : > { %1569 = vmatmul.bf16.gmra.mxu0 %v2879_v34  ;;  %1618 = vmatmul.bf16.gmra.mxu1 %v2879_v34  ;;  %v984_v34 = vadd.f32 %v2957_v18, %v2961_v20 }
 0x2c1   : > { %v3042_v10 = vpop.f32.mrf.mxu2  ;;  %v3044_v1 = vpop.f32.mrf.mxu3  ;;  %v1072_v18 = vmax.f32 %v984_v34, 0.0  ;;  %v799_v34 = vmax.f32 %v715_v47, 0.0 }
 0x2c2   : > { %v720_v46 = vadd.f32 %v3042_v10, %v2974_v28  ;;  %v769_v7 = vadd.f32 %v3044_v1, %v2976_v29  ;;  %v842_v10 = vmax.f32 %v3024_v59, %v800_v22  ;;  %v1091_v1 = vmax.f32 %v1056_v6, 0.0 }
 0x2c3   : > { %v1103_v38 = vmax.f32 %v1072_v18, %v1076_v31  ;;  %v1007_v31 = vadd.f32 %v3034_v8, %v2961_v20  ;;  %v801_v18 = vmax.f32 %v717_v0, 0.0 }
 0x2c4   : > { %v3046_v11 = vpop.f32.mrf.mxu0  ;;  %v3048_v13 = vpop.f32.mrf.mxu1  ;;  %v804_v48 = vmax.f32 %v769_v7, 0.0  ;;  %v1131_v50 = vmax.f32 %v1129_v19, %v1091_v1 }
 0x2c5   : > { %v1105_v24 = vmax.f32 %v1103_v38, %v1080_v26  ;;  %v1009_v44 = vadd.f32 %v3046_v11, %v2961_v20  ;;  %v1058_v8 = vadd.f32 %v3048_v13, %v2963_v21  ;;  %v821_v26 = vmax.f32 %v3022_v58, %v799_v34 }
 0x2c6   : > { %v1090_v27 = vmax.f32 %v1007_v31, 0.0  ;;  %v844_v55 = vmax.f32 %v842_v10, %v804_v48 }
 0x2c7   : > { %v1107_v15 = vmax.f32 %v1105_v24, %v1084_v42  ;;  %v803_v42 = vmax.f32 %v720_v46, 0.0  ;;  %v1092_v52 = vmax.f32 %v1009_v44, 0.0  ;;  %v1093_v58 = vmax.f32 %v1058_v8, 0.0 }
 0x2c8   : > { %v1110_v47 = vmax.f32 %v1108_v9, %v1090_v27 }
 0x2c9   : > { %v3053_v16 = vpop.f32.mrf.mxu2  ;;  %v3055_v17 = vpop.f32.mrf.mxu3  ;;  %v1109_v41 = vmax.f32 %v1107_v15, %v1088_v56  ;;  %v823_v54 = vmax.f32 %v821_v26, %v803_v42 }
 0x2ca   : > { %v722_v59 = vadd.f32 %v3053_v16, %v2974_v28 }
 0x2cb   : > { %v1111_v15 = vmax.f32 %v1109_v41, %v1092_v52 }
 0x2cc   : > { %v3068_v25 = vpop.f32.mrf.mxu0  ;;  %v3070_v30 = vpop.f32.mrf.mxu1 }
 0x2cd   : > { %v1012_v36 = vadd.f32 %v3068_v25, %v2961_v20  ;;  %v1061_v37 = vadd.f32 %v3070_v30, %v2963_v21  ;;  %v771_v25 = vadd.f32 %v3055_v17, %v2976_v29 }
 0x2ce   : > { %1292 = vmatmul.bf16.gmra.mxu2 %v2938_v3  ;;  %1341 = vmatmul.bf16.gmra.mxu3 %v2938_v3 }
 0x2cf   : > { %1574 = vmatmul.bf16.gmra.mxu0 %v2938_v3  ;;  %1623 = vmatmul.bf16.gmra.mxu1 %v2938_v3  ;;  %v1085_v3 = vmax.f32 %v1048_v33, 0.0  ;;  %v1094_v24 = vmax.f32 %v1012_v36, 0.0  ;;  %v806_v0 = vmax.f32 %v771_v25, 0.0 }
 0x2d1   : > { %v3080_v39 = vpop.f32.mrf.mxu2  ;;  %v3082_v40 = vpop.f32.mrf.mxu3  ;;  %v1128_v63 = vmax.f32 %v1126_v51, %v1085_v3  ;;  %v822_v3 = vmax.f32 %v820_v23, %v801_v18  ;;  %v1095_v51 = vmax.f32 %v1061_v37, 0.0  ;;  %v1112_v5 = vmax.f32 %v1110_v47, %v1094_v24 }
 0x2d3   : > { %v1130_v13 = vmax.f32 %v1128_v63, %v1089_v32  ;;  %v805_v63 = vmax.f32 %v722_v59, 0.0  ;;  %v1133_v34 = vmax.f32 %v1131_v50, %v1095_v51 }
 0x2d4   : > { %v1013_v57 = vpop.f32.mrf.mxu0  ;;  %v1062_v60 = vpop.f32.mrf.mxu1 }
 0x2d5   : > { %v1014_v30 = vadd.f32 %v1013_v57, %v2961_v20  ;;  %v1063_v45 = vadd.f32 %v1062_v60, %v2963_v21  ;;  %v1132_v17 = vmax.f32 %v1130_v13, %v1093_v58  ;;  %v725_v57 = vadd.f32 %v3080_v39, %v2974_v28 }
 0x2d6   : > { %v774_v60 = vadd.f32 %v3082_v40, %v2976_v29  ;;  %v824_v9 = vmax.f32 %v822_v3, %v805_v63 }
 0x2d7   : > { %v1096_v2 = vmax.f32 %v1014_v30, 0.0  ;;  %v1097_v4 = vmax.f32 %v1063_v45, 0.0  ;;  %v807_v46 = vmax.f32 %v725_v57, 0.0 }
 0x2d8   : > { %v808_v40 = vmax.f32 %v774_v60, 0.0 }
 0x2d9   : > { %v726_v53 = vpop.f32.mrf.mxu2  ;;  %v775_v33 = vpop.f32.mrf.mxu3  ;;  %v1113_v43 = vmax.f32 %v1111_v15, %v1096_v2  ;;  %v1134_v44 = vmax.f32 %v1132_v17, %v1097_v4  ;;  %v825_v13 = vmax.f32 %v823_v54, %v807_v46  ;;  %v1450_v4 = vld [vmem:[%s3303_s6 + $0x6] sm:$0x3] }
 0x2da   : > { %v727_v22 = vadd.f32 %v726_v53, %v2974_v28  ;;  %v776_v23 = vadd.f32 %v775_v33, %v2976_v29  ;;  %v845_v33 = vmax.f32 %v843_v49, %v806_v0  ;;  %v846_v42 = vmax.f32 %v844_v55, %v808_v40 }
 0x2dc   : > { %v1016_v11 = vpop.f32.mrf.mxu0  ;;  %v1065_v38 = vpop.f32.mrf.mxu1  ;;  %v809_v19 = vmax.f32 %v727_v22, 0.0  ;;  %v810_v26 = vmax.f32 %v776_v23, 0.0 }
 0x2dd   : > { %v1017_v61 = vadd.f32 %v1016_v11, %v2961_v20  ;;  %v1066_v62 = vadd.f32 %v1065_v38, %v2963_v21 }
 0x2de   : > { %1297 = vmatmul.bf16.gmra.mxu2 %v2948_v12  ;;  %1346 = vmatmul.bf16.gmra.mxu3 %v2948_v12  ;;  %v826_v3 = vmax.f32 %v824_v9, %v809_v19  ;;  %v847_v49 = vmax.f32 %v845_v33, %v810_v26 }
 0x2df   : > { %1579 = vmatmul.bf16.gmra.mxu0 %v2948_v12  ;;  %v1098_v6 = vmax.f32 %v1017_v61, 0.0  ;;  %v1099_v56 = vmax.f32 %v1066_v62, 0.0 }
 0x2e1   : > { %v729_v16 = vpop.f32.mrf.mxu2  ;;  %v778_v35 = vpop.f32.mrf.mxu3  ;;  %v1114_v10 = vmax.f32 %v1112_v5, %v1098_v6  ;;  %v1135_v27 = vmax.f32 %v1133_v34, %v1099_v56  ;;  %v3147_v56 = vperm.slane %v1450_v4, 0 }
 0x2e2   : > { %v730_v7 = vadd.f32 %v729_v16, %v2974_v28  ;;  %v779_v18 = vadd.f32 %v778_v35, %v2976_v29 }
 0x2e4   : > { %v1018_v14 = vpop.f32.mrf.mxu0  ;;  %v1067_v31 = vpop.f32.mrf.mxu1  ;;  %v811_v37 = vmax.f32 %v730_v7, 0.0  ;;  %v812_v11 = vmax.f32 %v779_v18, 0.0  ;;  %v1144_v7 = vld [vmem:[%s3087_s27 + $0x2] sm:$0x3] }
 0x2e5   : > { %v1019_v32 = vadd.f32 %v1018_v14, %v2961_v20  ;;  %v1068_v39 = vadd.f32 %v1067_v31, %v2963_v21  ;;  %v865_v31 = vlaneseq }
 0x2e6   : > { %v827_v50 = vmax.f32 %v825_v13, %v811_v37  ;;  %v848_v24 = vmax.f32 %v846_v42, %v812_v11  ;;  %v857_v13 = vld [vmem:[%s3087_s27] sm:$0x3] }
 0x2e7   : > { %v1100_v8 = vmax.f32 %v1019_v32, 0.0  ;;  %v1101_v53 = vmax.f32 %v1068_v39, 0.0  ;;  %v3149_v32 = vperm.slane %v1450_v4, 1  ;;  %vm3155_vm3 = vcmp.lt.s32.totalorder %v865_v31, 256 }
 0x2e9   : > { %v1115_v1 = vmax.f32 %v1113_v43, %v1100_v8  ;;  %v1136_v20 = vmax.f32 %v1134_v44, %v1101_v53  ;;  %v731_v36 = vpop.f32.mrf.mxu2  ;;  %v780_v21 = vpop.f32.mrf.mxu3  ;;  %v1168_v43 = vld [vmem:[%s3303_s6 + $0x4] sm:$0x3] }
 0x2ea   : > { %v732_v38 = vadd.f32 %v731_v36, %v2974_v28  ;;  %v781_v41 = vadd.f32 %v780_v21, %v2976_v29  ;;  %v3164_v36 = vperm.slane %v1168_v43, 1 }
 0x2eb   : > { %v1116_v48 = vmax.f32 %v1114_v10, %v1115_v1  ;;  %v1137_v52 = vmax.f32 %v1135_v27, %v1136_v20  ;;  %v3162_v20 = vperm.slane %v1168_v43, 0 }
 0x2ec   : > { %v813_v58 = vmax.f32 %v732_v38, 0.0  ;;  %v814_v59 = vmax.f32 %v781_v41, 0.0  ;;  %v1545_v25 = vpop.f32.mrf.mxu0  ;;  %v1594_v30 = vpop.f32.mrf.mxu1 }
 0x2ed   : > { %v1117_v45 = vrot.slane %v1116_v48, 4  ;;  %v1138_v47 = vrot.slane %v1137_v52, 4  ;;  %v1546_v26 = vadd.f32 %v1545_v25, %v3147_v56  ;;  %v1595_v10 = vadd.f32 %v1594_v30, %v3149_v32 }
 0x2ee   : > { %v828_v51 = vmax.f32 %v826_v3, %v813_v58  ;;  %v849_v61 = vmax.f32 %v847_v49, %v814_v59  ;;  %1628 = vmatmul.bf16.vlgmr.msrb.gmra.mxu3 %v2948_v12 }
 0x2ef   : > { %v1118_v28 = vmax.f32 %v1116_v48, %v1117_v45  ;;  %v1139_v29 = vmax.f32 %v1137_v52, %v1138_v47  ;;  %v1634_v48 = vmax.f32 %v1546_v26, 0.0  ;;  %v1635_v52 = vmax.f32 %v1595_v10, 0.0 }
 0x2f0   : > { %v829_v54 = vmax.f32 %v827_v50, %v828_v51  ;;  %v850_v55 = vmax.f32 %v848_v24, %v849_v61 }
 0x2f1   : > { %v1119_v62 = vrot.slane %v1118_v28, 2  ;;  %v1140_v16 = vrot.slane %v1139_v29, 2  ;;  %v1263_v35 = vpop.f32.mrf.mxu2  ;;  %v1312_v15 = vpop.f32.mrf.mxu3 }
 0x2f2   : > { %v830_v17 = vrot.slane %v829_v54, 4  ;;  %v851_v57 = vrot.slane %v850_v55, 4  ;;  %v1264_v59 = vadd.f32 %v1263_v35, %v3162_v20  ;;  %v1313_v25 = vadd.f32 %v1312_v15, %v3164_v36 }
 0x2f3   : > { %v1120_v60 = vmax.f32 %v1118_v28, %v1119_v62  ;;  %v1141_v63 = vmax.f32 %v1139_v29, %v1140_v16 }
 0x2f4   : > { %v831_v0 = vmax.f32 %v829_v54, %v830_v17  ;;  %v852_v2 = vmax.f32 %v850_v55, %v851_v57  ;;  %v1547_v12 = vpop.f32.mrf.mxu0  ;;  %v1596_v5 = vpop.f32.mrf.mxu1  ;;  %v1352_v54 = vmax.f32 %v1264_v59, 0.0  ;;  %v1353_v55 = vmax.f32 %v1313_v25, 0.0 }
 0x2f5   : > { %v1121_v34 = vrot.slane %v1120_v60, 1  ;;  %v1142_v22 = vrot.slane %v1141_v63, 1  ;;  %v1548_v28 = vadd.f32 %v1547_v12, %v3147_v56  ;;  %v1597_v29 = vadd.f32 %v1596_v5, %v3149_v32 }
 0x2f6   : > { %v832_v23 = vrot.slane %v831_v0, 2  ;;  %v853_v14 = vrot.slane %v852_v2, 2 }
 0x2f7   : > { %v1143_v6 = vmax.f32 %v1141_v63, %v1142_v22  ;;  %v1122_v40 = vmax.f32 %v1120_v60, %v1121_v34 }
 0x2f8   : > { %v833_v39 = vmax.f32 %v831_v0, %v832_v23  ;;  %v854_v46 = vmax.f32 %v852_v2, %v853_v14  ;;  %v1636_v0 = vmax.f32 %v1548_v28, 0.0  ;;  %v1637_v2 = vmax.f32 %v1597_v29, 0.0 }
 0x2f9   : > { %v1147_v18 = vrot.slane %v1143_v6, 7  ;;  %v1265_v44 = vpop.f32.mrf.mxu2  ;;  %v1314_v8 = vpop.f32.mrf.mxu3 }
 0x2fa   : > { %v834_v53 = vrot.slane %v833_v39, 1  ;;  %v855_v9 = vrot.slane %v854_v46, 1  ;;  %v1266_v12 = vadd.f32 %v1265_v44, %v3162_v20  ;;  %v1315_v5 = vadd.f32 %v1314_v8, %v3164_v36 }
 0x2fb   : > { %v1148_v19 = vsel %vm861_vm2, %v1122_v40, %v1147_v18 }
 0x2fc   : > { %v1150_v27 = vmax.f32 %v1144_v7, %v1148_v19  ;;  %v856_v1 = vmax.f32 %v854_v46, %v855_v9  ;;  %v1550_v21 = vpop.f32.mrf.mxu0  ;;  %v1599_v37 = vpop.f32.mrf.mxu1  ;;  %v835_v41 = vmax.f32 %v833_v39, %v834_v53  ;;  %v1354_v46 = vmax.f32 %v1266_v12, 0.0 }
 0x2fd   : > { %v1551_v11 = vadd.f32 %v1550_v21, %v3147_v56  ;;  %v1600_v38 = vadd.f32 %v1599_v37, %v3149_v32  ;;  %v1355_v40 = vmax.f32 %v1315_v5, 0.0 }
 0x2fe   : > { %1151 = vst.msk [vmem:[%s3087_s27 + $0x2] sm:$0x3] %vm3155_vm3, %v1150_v27  ;;  %v860_v42 = vrot.slane %v856_v1, 7 }
 0x2ff   : > { %v1638_v3 = vmax.f32 %v1551_v11, 0.0  ;;  %v1639_v49 = vmax.f32 %v1600_v38, 0.0 }
 0x300   : > { %v862_v58 = vsel %vm861_vm2, %v835_v41, %v860_v42 }
 0x301   : > { %v864_v30 = vmax.f32 %v857_v13, %v862_v58  ;;  %v1666_v45 = vmax.f32 %v1634_v48, %v1638_v3  ;;  %v1687_v47 = vmax.f32 %v1635_v52, %v1639_v49  ;;  %v1268_v50 = vpop.f32.mrf.mxu2  ;;  %v1317_v24 = vpop.f32.mrf.mxu3 }
 0x302   : > { %v1269_v51 = vadd.f32 %v1268_v50, %v3162_v20  ;;  %v1318_v61 = vadd.f32 %v1317_v24, %v3164_v36 }
 0x303   : > { %869 = vst.msk [vmem:[%s3087_s27] sm:$0x3] %vm3155_vm3, %v864_v30 }
 0x304   : > { %v1356_v62 = vmax.f32 %v1269_v51, 0.0  ;;  %v1357_v16 = vmax.f32 %v1318_v61, 0.0  ;;  %v1552_v35 = vpop.f32.mrf.mxu0  ;;  %v1601_v15 = vpop.f32.mrf.mxu1 }
 0x305   : > { %v1553_v17 = vadd.f32 %v1552_v35, %v3147_v56  ;;  %v1602_v57 = vadd.f32 %v1601_v15, %v3149_v32 }
 0x306   : > { %v1384_v60 = vmax.f32 %v1352_v54, %v1356_v62  ;;  %v1405_v63 = vmax.f32 %v1353_v55, %v1357_v16 }
 0x307   : > { %v1640_v4 = vmax.f32 %v1553_v17, 0.0  ;;  %v1641_v34 = vmax.f32 %v1602_v57, 0.0 }
 0x309   : > { %v1667_v22 = vmax.f32 %v1636_v0, %v1640_v4  ;;  %v3186_v23 = vmax.f32 %v1637_v2, %v1641_v34  ;;  %v1270_v14 = vpop.f32.mrf.mxu2  ;;  %v1319_v31 = vpop.f32.mrf.mxu3 }
 0x30a   : > { %v1271_v6 = vadd.f32 %v1270_v14, %v3162_v20  ;;  %v1320_v39 = vadd.f32 %v1319_v31, %v3164_v36 }
 0x30c   : > { %v1358_v7 = vmax.f32 %v1271_v6, 0.0  ;;  %v1359_v18 = vmax.f32 %v1320_v39, 0.0  ;;  %v1555_v43 = vpop.f32.mrf.mxu0  ;;  %v1604_v53 = vpop.f32.mrf.mxu1 }
 0x30d   : > { %v1556_v9 = vadd.f32 %v1555_v43, %v3147_v56  ;;  %v1605_v44 = vadd.f32 %v1604_v53, %v3149_v32 }
 0x30e   : > { %v1385_v8 = vmax.f32 %v1354_v46, %v1358_v7  ;;  %v1406_v19 = vmax.f32 %v1355_v40, %v1359_v18 }
 0x30f   : > { %v1642_v26 = vmax.f32 %v1556_v9, 0.0  ;;  %v1643_v10 = vmax.f32 %v1605_v44, 0.0 }
 0x311   : > { %v1668_v27 = vmax.f32 %v1666_v45, %v1642_v26  ;;  %v3192_v1 = vmax.f32 %v1687_v47, %v1643_v10  ;;  %v1273_v21 = vpop.f32.mrf.mxu2  ;;  %v1322_v37 = vpop.f32.mrf.mxu3 }
 0x312   : > { %v1274_v11 = vadd.f32 %v1273_v21, %v3162_v20  ;;  %v1323_v38 = vadd.f32 %v1322_v37, %v3164_v36 }
 0x314   : > { %v1360_v41 = vmax.f32 %v1274_v11, 0.0  ;;  %v1361_v13 = vmax.f32 %v1323_v38, 0.0  ;;  %v1557_v42 = vpop.f32.mrf.mxu0  ;;  %v3204_v54 = vpop.f32.mrf.mxu1 }
 0x315   : > { %v1558_v48 = vadd.f32 %v1557_v42, %v3147_v56 }
 0x316   : > { %v1386_v52 = vmax.f32 %v1384_v60, %v1360_v41  ;;  %v1407_v3 = vmax.f32 %v1405_v63, %v1361_v13 }
 0x317   : > { %v1644_v49 = vmax.f32 %v1558_v48, 0.0 }
 0x319   : > { %v3197_v58 = vmax.f32 %v1667_v22, %v1644_v49  ;;  %v1275_v59 = vpop.f32.mrf.mxu2  ;;  %v1324_v25 = vpop.f32.mrf.mxu3 }
 0x31a   : > { %v1276_v30 = vadd.f32 %v1275_v59, %v3162_v20  ;;  %v1325_v45 = vadd.f32 %v1324_v25, %v3164_v36 }
 0x31c   : > { %v1362_v47 = vmax.f32 %v1276_v30, 0.0  ;;  %v1363_v50 = vmax.f32 %v1325_v45, 0.0  ;;  %v1560_v24 = vpop.f32.mrf.mxu0  ;;  %v3208_v34 = vpop.f32.mrf.mxu1 }
 0x31d   : > { %v1561_v51 = vadd.f32 %v1560_v24, %v3147_v56 }
 0x31e   : > { %v1387_v61 = vmax.f32 %v1385_v8, %v1362_v47  ;;  %v3202_v28 = vmax.f32 %v1406_v19, %v1363_v50 }
 0x31f   : > { %v1646_v29 = vmax.f32 %v1561_v51, 0.0 }
 0x321   : > { %v1670_v55 = vmax.f32 %v1668_v27, %v1646_v29  ;;  %v1278_v62 = vpop.f32.mrf.mxu2  ;;  %v1327_v16 = vpop.f32.mrf.mxu3 }
 0x322   : > { %v1279_v35 = vadd.f32 %v1278_v62, %v3162_v20  ;;  %v1328_v15 = vadd.f32 %v1327_v16, %v3164_v36 }
 0x324   : > { %v1364_v17 = vmax.f32 %v1279_v35, 0.0  ;;  %v1365_v57 = vmax.f32 %v1328_v15, 0.0  ;;  %v1562_v60 = vpop.f32.mrf.mxu0  ;;  %v3210_v14 = vpop.f32.mrf.mxu1 }
 0x325   : > { %v1563_v21 = vadd.f32 %v1562_v60, %v3147_v56 }
 0x326   : > { %v1388_v63 = vmax.f32 %v1386_v52, %v1364_v17  ;;  %v1409_v0 = vmax.f32 %v1407_v3, %v1365_v57 }
 0x327   : > { %v1648_v42 = vmax.f32 %v1563_v21, 0.0 }
 0x329   : > { %v1280_v2 = vpop.f32.mrf.mxu2  ;;  %v1329_v4 = vpop.f32.mrf.mxu3  ;;  %v1671_v29 = vmax.f32 %v3197_v58, %v1648_v42 }
 0x32a   : > { %v1281_v37 = vadd.f32 %v1280_v2, %v3162_v20  ;;  %v1330_v11 = vadd.f32 %v1329_v4, %v3164_v36 }
 0x32c   : > { %v1565_v12 = vpop.f32.mrf.mxu0  ;;  %v3212_v40 = vpop.f32.mrf.mxu1  ;;  %v1366_v48 = vmax.f32 %v1281_v37, 0.0  ;;  %v1367_v30 = vmax.f32 %v1330_v11, 0.0 }
 0x32d   : > { %v1566_v38 = vadd.f32 %v1565_v12, %v3147_v56 }
 0x32e   : > { %v1389_v62 = vmax.f32 %v1387_v61, %v1366_v48  ;;  %v1410_v2 = vmax.f32 %v3202_v28, %v1367_v30 }
 0x32f   : > { %v1650_v45 = vmax.f32 %v1566_v38, 0.0 }
 0x331   : > { %v1283_v5 = vpop.f32.mrf.mxu2  ;;  %v1332_v22 = vpop.f32.mrf.mxu3  ;;  %v1672_v4 = vmax.f32 %v1670_v55, %v1650_v45 }
 0x332   : > { %v1284_v41 = vadd.f32 %v1283_v5, %v3162_v20  ;;  %v1333_v13 = vadd.f32 %v1332_v22, %v3164_v36 }
 0x334   : > { %v1567_v31 = vpop.f32.mrf.mxu0  ;;  %v3214_v53 = vpop.f32.mrf.mxu1  ;;  %v1368_v47 = vmax.f32 %v1284_v41, 0.0  ;;  %v1369_v50 = vmax.f32 %v1333_v13, 0.0 }
 0x335   : > { %v1568_v52 = vadd.f32 %v1567_v31, %v3147_v56 }
 0x336   : > { %v1390_v22 = vmax.f32 %v1388_v63, %v1368_v47  ;;  %v1411_v31 = vmax.f32 %v1409_v0, %v1369_v50 }
 0x337   : > { %v1652_v16 = vmax.f32 %v1568_v52, 0.0 }
 0x339   : > { %v1285_v6 = vpop.f32.mrf.mxu2  ;;  %v1334_v39 = vpop.f32.mrf.mxu3 }
 0x33a   : > { %v1286_v59 = vadd.f32 %v1285_v6, %v3162_v20  ;;  %v1335_v17 = vadd.f32 %v1334_v39, %v3164_v36  ;;  %v1673_v6 = vmax.f32 %v1671_v29, %v1652_v16 }
 0x33c   : > { %v1570_v46 = vpop.f32.mrf.mxu0  ;;  %v3216_v10 = vpop.f32.mrf.mxu1  ;;  %v1370_v15 = vmax.f32 %v1286_v59, 0.0  ;;  %v1371_v55 = vmax.f32 %v1335_v17, 0.0 }
 0x33d   : > { %v1571_v25 = vadd.f32 %v1570_v46, %v3147_v56 }
 0x33e   : > { %v1391_v28 = vmax.f32 %v1389_v62, %v1370_v15  ;;  %v1412_v59 = vmax.f32 %v1410_v2, %v1371_v55 }
 0x33f   : > { %v1654_v57 = vmax.f32 %v1571_v25, 0.0 }
 0x341   : > { %v1288_v7 = vpop.f32.mrf.mxu2  ;;  %v1337_v18 = vpop.f32.mrf.mxu3  ;;  %v1674_v37 = vmax.f32 %v1672_v4, %v1654_v57 }
 0x342   : > { %v1289_v12 = vadd.f32 %v1288_v7, %v3162_v20  ;;  %v1338_v58 = vadd.f32 %v1337_v18, %v3164_v36 }
 0x344   : > { %v1572_v43 = vpop.f32.mrf.mxu0  ;;  %v3229_v35 = vpop.f32.mrf.mxu1  ;;  %v1372_v11 = vmax.f32 %v1289_v12, 0.0 }
 0x345   : > { %v1573_v24 = vadd.f32 %v1572_v43, %v3147_v56 }
 0x347   : > { %v1656_v61 = vmax.f32 %v1573_v24, 0.0 }
 0x349   : > { %v1290_v9 = vpop.f32.mrf.mxu2  ;;  %v1339_v44 = vpop.f32.mrf.mxu3  ;;  %v1675_v38 = vmax.f32 %v1673_v6, %v1656_v61 }
 0x34a   : > { %v1291_v46 = vadd.f32 %v1290_v9, %v3162_v20  ;;  %v1340_v39 = vadd.f32 %v1339_v44, %v3164_v36 }
 0x34c   : > { %v1575_v8 = vpop.f32.mrf.mxu0  ;;  %v1374_v13 = vmax.f32 %v1291_v46, 0.0  ;;  %v1375_v42 = vmax.f32 %v1340_v39, 0.0 }
 0x34d   : > { %v1576_v60 = vadd.f32 %v1575_v8, %v3147_v56 }
 0x34e   : > { %v1393_v62 = vmax.f32 %v1391_v28, %v1374_v13  ;;  %v1414_v16 = vmax.f32 %v1412_v59, %v1375_v42 }
 0x34f   : > { %v1658_v7 = vmax.f32 %v1576_v60, 0.0 }
 0x351   : > { %v1293_v19 = vpop.f32.mrf.mxu2  ;;  %v1342_v26 = vpop.f32.mrf.mxu3  ;;  %v1676_v25 = vmax.f32 %v1674_v37, %v1658_v7  ;;  %v1617_v37 = vadd.f32 %v3214_v53, %v3149_v32 }
 0x352   : > { %v1294_v63 = vadd.f32 %v1293_v19, %v3162_v20  ;;  %v1343_v0 = vadd.f32 %v1342_v26, %v3164_v36  ;;  %v1624_v26 = vpop.f32.mrf.mxu1 }
 0x353   : > { %v1625_v53 = vadd.f32 %v1624_v26, %v3149_v32 }
 0x354   : > { %v1577_v27 = vpop.f32.mrf.mxu0  ;;  %v1376_v45 = vmax.f32 %v1294_v63, 0.0  ;;  %v1377_v47 = vmax.f32 %v1343_v0, 0.0 }
 0x355   : > { %v1578_v5 = vadd.f32 %v1577_v27, %v3147_v56  ;;  %v1373_v27 = vmax.f32 %v1338_v58, 0.0 }
 0x357   : > { %v1660_v18 = vmax.f32 %v1578_v5, 0.0  ;;  %v1607_v5 = vadd.f32 %v3204_v54, %v3149_v32  ;;  %v1615_v54 = vadd.f32 %v3212_v40, %v3149_v32 }
 0x359   : > { %v1295_v3 = vpop.f32.mrf.mxu2  ;;  %v1344_v49 = vpop.f32.mrf.mxu3  ;;  %v1677_v50 = vmax.f32 %v1675_v38, %v1660_v18  ;;  %v1645_v55 = vmax.f32 %v1607_v5, 0.0  ;;  %v1651_v40 = vmax.f32 %v1615_v54, 0.0  ;;  %v1708_v54 = vld [vmem:[%s3087_s27 + $0x6] sm:$0x3] }
 0x35a   : > { %v1296_v9 = vadd.f32 %v1295_v3, %v3162_v20  ;;  %v1345_v44 = vadd.f32 %v1344_v49, %v3164_v36  ;;  %v1392_v3 = vmax.f32 %v1390_v22, %v1372_v11  ;;  %v1626_v18 = vpop.f32.mrf.mxu1 }
 0x35b   : > { %v1627_v13 = vadd.f32 %v1626_v18, %v3149_v32 }
 0x35c   : > { %v1580_v51 = vpop.f32.mrf.mxu0  ;;  %v1378_v49 = vmax.f32 %v1296_v9, 0.0  ;;  %v1379_v29 = vmax.f32 %v1345_v44, 0.0  ;;  %v1394_v58 = vmax.f32 %v1392_v3, %v1376_v45  ;;  %v1690_v44 = vmax.f32 %v3186_v23, %v1645_v55 }
 0x35d   : > { %v1581_v43 = vadd.f32 %v1580_v51, %v3147_v56  ;;  %v1413_v51 = vmax.f32 %v1411_v31, %v1373_v27  ;;  %v1659_v23 = vmax.f32 %v1625_v53, 0.0 }
 0x35e   : > { %v1395_v61 = vmax.f32 %v1393_v62, %v1378_v49  ;;  %v1416_v6 = vmax.f32 %v1414_v16, %v1379_v29 }
 0x35f   : > { %v1662_v48 = vmax.f32 %v1581_v43, 0.0  ;;  %v1415_v22 = vmax.f32 %v1413_v51, %v1377_v47  ;;  %v1610_v43 = vadd.f32 %v3208_v34, %v3149_v32  ;;  %v1620_v34 = vadd.f32 %v3216_v10, %v3149_v32 }
 0x361   : > { %v1298_v8 = vpop.f32.mrf.mxu2  ;;  %v1347_v21 = vpop.f32.mrf.mxu3  ;;  %v1678_v15 = vmax.f32 %v1676_v25, %v1662_v48  ;;  %v1647_v63 = vmax.f32 %v1610_v43, 0.0  ;;  %v1655_v59 = vmax.f32 %v1620_v34, 0.0 }
 0x362   : > { %v1299_v30 = vadd.f32 %v1298_v8, %v3162_v20  ;;  %v1348_v19 = vadd.f32 %v1347_v21, %v3164_v36  ;;  %v1612_v8 = vadd.f32 %v3210_v14, %v3149_v32  ;;  %v1622_v14 = vadd.f32 %v3229_v35, %v3149_v32 }
 0x364   : > { %v1582_v41 = vpop.f32.mrf.mxu0  ;;  %v1380_v60 = vmax.f32 %v1299_v30, 0.0  ;;  %v1381_v2 = vmax.f32 %v1348_v19, 0.0  ;;  %v1649_v0 = vmax.f32 %v1612_v8, 0.0  ;;  %v1657_v25 = vmax.f32 %v1622_v14, 0.0 }
 0x365   : > { %v1583_v52 = vadd.f32 %v1582_v41, %v3147_v56  ;;  %v1653_v41 = vmax.f32 %v1617_v37, 0.0 }
 0x366   : > { %v1396_v21 = vmax.f32 %v1394_v58, %v1380_v60  ;;  %v1692_v10 = vmax.f32 %v1690_v44, %v1649_v0 }
 0x367   : > { %v1664_v24 = vmax.f32 %v1583_v52, 0.0  ;;  %v1691_v52 = vmax.f32 %v3192_v1, %v1647_v63 }
 0x368   : > { %v1694_v47 = vmax.f32 %v1692_v10, %v1653_v41 }
 0x369   : > { %v1679_v17 = vmax.f32 %v1677_v50, %v1664_v24  ;;  %v1300_v56 = vpop.f32.mrf.mxu2  ;;  %v1349_v57 = vpop.f32.mrf.mxu3  ;;  %v1693_v45 = vmax.f32 %v1691_v52, %v1651_v40  ;;  %v1661_v50 = vmax.f32 %v1627_v13, 0.0 }
 0x36a   : > { %v1301_v4 = vadd.f32 %v1300_v56, %v3162_v20  ;;  %v1350_v12 = vadd.f32 %v1349_v57, %v3164_v36  ;;  %v1417_v20 = vmax.f32 %v1415_v22, %v1381_v2  ;;  %v1696_v51 = vmax.f32 %v1694_v47, %v1657_v25 }
 0x36b   : > { %v1680_v31 = vmax.f32 %v1678_v15, %v1679_v17  ;;  %v1695_v3 = vmax.f32 %v1693_v45, %v1655_v59 }
 0x36c   : > { %v1382_v46 = vmax.f32 %v1301_v4, 0.0  ;;  %v1383_v39 = vmax.f32 %v1350_v12, 0.0  ;;  %v1698_v56 = vmax.f32 %v1696_v51, %v1661_v50  ;;  %v1426_v12 = vld [vmem:[%s3087_s27 + $0x4] sm:$0x3] }
 0x36d   : > { %v1681_v49 = vrot.slane %v1680_v31, 4  ;;  %v1697_v17 = vmax.f32 %v1695_v3, %v1659_v23 }
 0x36e   : > { %v1397_v28 = vmax.f32 %v1395_v61, %v1382_v46  ;;  %v1418_v36 = vmax.f32 %v1416_v6, %v1383_v39 }
 0x36f   : > { %v1682_v2 = vmax.f32 %v1680_v31, %v1681_v49 }
 0x370   : > { %v1398_v7 = vmax.f32 %v1396_v21, %v1397_v28  ;;  %v1419_v11 = vmax.f32 %v1417_v20, %v1418_v36 }
 0x371   : > { %v1629_v27 = vpop.f32.mrf.mxu3  ;;  %v1683_v39 = vrot.slane %v1682_v2, 2 }
 0x372   : > { %v1399_v38 = vrot.slane %v1398_v7, 4  ;;  %v1420_v9 = vrot.slane %v1419_v11, 4  ;;  %v1630_v19 = vadd.f32 %v1629_v27, %v3149_v32 }
 0x373   : > { %v1684_v8 = vmax.f32 %v1682_v2, %v1683_v39 }
 0x374   : > { %v1400_v42 = vmax.f32 %v1398_v7, %v1399_v38  ;;  %v1421_v48 = vmax.f32 %v1419_v11, %v1420_v9  ;;  %v1663_v16 = vmax.f32 %v1630_v19, 0.0 }
 0x375   : > { %v1685_v20 = vrot.slane %v1684_v8, 1 }
 0x376   : > { %v1401_v35 = vrot.slane %v1400_v42, 2  ;;  %v1422_v30 = vrot.slane %v1421_v48, 2  ;;  %v1699_v58 = vmax.f32 %v1697_v17, %v1663_v16 }
 0x377   : > { %v1686_v55 = vmax.f32 %v1684_v8, %v1685_v20 }
 0x378   : > { %v1402_v24 = vmax.f32 %v1400_v42, %v1401_v35  ;;  %v1423_v26 = vmax.f32 %v1421_v48, %v1422_v30 }
 0x379   : > { %v1631_v29 = vpop.f32.mrf.mxu3 }
 0x37a   : > { %v1403_v62 = vrot.slane %v1402_v24, 1  ;;  %v1424_v1 = vrot.slane %v1423_v26, 1  ;;  %v1632_v15 = vadd.f32 %v1631_v29, %v3149_v32 }
 0x37c   : > { %v1425_v57 = vmax.f32 %v1423_v26, %v1424_v1  ;;  %v1665_v60 = vmax.f32 %v1632_v15, 0.0  ;;  %v1404_v4 = vmax.f32 %v1402_v24, %v1403_v62 }
 0x37e   : > { %v1429_v5 = vrot.slane %v1425_v57, 7  ;;  %v1700_v22 = vmax.f32 %v1698_v56, %v1665_v60 }
 0x380   : > { %v1430_v61 = vsel %vm861_vm2, %v1404_v4, %v1429_v5  ;;  %v1701_v6 = vmax.f32 %v1699_v58, %v1700_v22 }
 0x381   : > { %v1432_v46 = vmax.f32 %v1426_v12, %v1430_v61 }
 0x382   : > { %v1702_v43 = vrot.slane %v1701_v6, 4 }
 0x383   : > { %1433 = vst.msk [vmem:[%s3087_s27 + $0x4] sm:$0x3] %vm3155_vm3, %v1432_v46 }
 0x384   : > { %v1703_v32 = vmax.f32 %v1701_v6, %v1702_v43 }
 0x386   : > { %v1704_v21 = vrot.slane %v1703_v32, 2 }
 0x388   : > { %v1705_v31 = vmax.f32 %v1703_v32, %v1704_v21 }
 0x38a   : > { %v1706_v28 = vrot.slane %v1705_v31, 1 }
 0x38c   : > { %v1707_v36 = vmax.f32 %v1705_v31, %v1706_v28 }
 0x38e   : > { %v1711_v37 = vrot.slane %v1707_v36, 7 }
 0x390   : > { %v1712_v7 = vsel %vm861_vm2, %v1686_v55, %v1711_v37 }
 0x391   : > { %v1714_v11 = vmax.f32 %v1708_v54, %v1712_v7 }
 0x393   : > { %1715 = vst.msk [vmem:[%s3087_s27 + $0x6] sm:$0x3] %vm3155_vm3, %v1714_v11 }
 0x394 PF: > { %s20_s29 = sadd.s32 1, %s2319_s29   ;;  %s3309_s24 = smov %s2303_s25 }
 0x395   : > { %p17_p0 = scmp.ge.s32.totalorder %s20_s29, 4   ;;  %s3310_s25 = smov %s2307_s26 }
 0x396   : > { %s3311_s26 = smov %s2413_s13  ;;  %s3312_s27 = smov %s2315_s28 }
 0x397   : > { %s3313_s28 = smov %s3315_s8  ;;  %19 = sbr.rel (!%p17_p0) target bundleno = 4 (0x4), region = 92 }
 0x39c   :  { %1735 = vsyncpa [#allocation3], 1 }
 0x39d   :  { %1737 = vsyncpa [#allocation3 + $0x1], 1 }

// kernel: stnkd_forward.3
= control target key start
LH: loop header
LB: loop body
LE: loop exit
PB: predicated region body
PF: predicated region fallthrough
CT: control target
= control target key end

     0   :  { %vm2778_vm0 = vcmask 1041408   ;;  %s6814_s1 = inlined_call_operand.vmem [shape: bf16[1024,512], index: 1, kind: input, shape index: {}]   ;;  %s6815_s0 = inlined_call_operand.vmem [shape: f32[2,1024], index: 0, kind: input, shape index: {}]   ;;  %s6816_s2 = inlined_call_operand.vmem [shape: f32[1,512], index: 2, kind: input, shape index: {}]   ;;  %s6817_s3 = inlined_call_operand.vmem [shape: bf16[512,256], index: 3, kind: input, shape index: {}]   ;;  %s6818_s4 = inlined_call_operand.vmem [shape: f32[1,256], index: 4, kind: input, shape index: {}]   ;;  %s6819_s5 = inlined_call_operand.vmem [shape: bf16[256,256], index: 5, kind: input, shape index: {}]   ;;  %s6820_s6 = inlined_call_operand.vmem [shape: f32[1,256], index: 6, kind: input, shape index: {}]   ;;  %s6821_s7 = inlined_call_operand.vmem [shape: f32[2,256], index: 7, kind: output, shape index: {}]  }
   0x1   :  { %v2900_v0 = vld [vmem:[%s6814_s1 + $0xe0] sm:$0xf]  ;;  %v4224_v1 = vld [vmem:[%s6814_s1 + $0xec] sm:$0xf0] }
   0x2   :  { %v3028_v2 = vld [vmem:[%s6814_s1 + $0x1e0] sm:$0xf]  ;;  %v2901_v3 = vor.u32 %v4224_v1, %v2900_v0  ;;  %v4256_v4 = vld [vmem:[%s6814_s1 + $0x1ec] sm:$0xf0] }
   0x3   :  { %v3156_v5 = vld [vmem:[%s6814_s1 + $0x2e0] sm:$0xf]  ;;  %v4288_v6 = vld [vmem:[%s6814_s1 + $0x2ec] sm:$0xf0]  ;;  %v3029_v7 = vor.u32 %v4256_v4, %v3028_v2 }
   0x4   :  { %v3157_v8 = vor.u32 %v4288_v6, %v3156_v5  ;;  %v3284_v9 = vld [vmem:[%s6814_s1 + $0x3e0] sm:$0xf]  ;;  %v4320_v10 = vld [vmem:[%s6814_s1 + $0x3ec] sm:$0xf0]  ;;  %1603 = vmatpush.bf16.msra.mxu0 %v2901_v3 }
   0x5   :  { %v2884_v11 = vld [vmem:[%s6814_s1 + $0xc0] sm:$0xf]  ;;  %v3285_v12 = vor.u32 %v4320_v10, %v3284_v9  ;;  %v4220_v13 = vld [vmem:[%s6814_s1 + $0xcc] sm:$0xf0]  ;;  %1616 = vmatpush.bf16.msra.mxu1 %v3029_v7 }
   0x6   :  { %v3012_v14 = vld [vmem:[%s6814_s1 + $0x1c0] sm:$0xf]  ;;  %v4252_v15 = vld [vmem:[%s6814_s1 + $0x1cc] sm:$0xf0]  ;;  %1629 = vmatpush.bf16.msra.mxu2 %v3157_v8  ;;  %v2885_v16 = vor.u32 %v4220_v13, %v2884_v11 }
   0x7   :  { %v3013_v17 = vor.u32 %v4252_v15, %v3012_v14  ;;  %v3140_v18 = vld [vmem:[%s6814_s1 + $0x2c0] sm:$0xf]  ;;  %v4284_v19 = vld [vmem:[%s6814_s1 + $0x2cc] sm:$0xf0]  ;;  %1642 = vmatpush.bf16.msra.mxu3 %v3285_v12 }
   0x8   :  { %v3268_v20 = vld [vmem:[%s6814_s1 + $0x3c0] sm:$0xf]  ;;  %v3141_v21 = vor.u32 %v4284_v19, %v3140_v18  ;;  %v4316_v22 = vld [vmem:[%s6814_s1 + $0x3cc] sm:$0xf0]  ;;  %1604 = vmatpush.bf16.msra.mxu0 %v2885_v16 }
   0x9   :  { %v2868_v23 = vld [vmem:[%s6814_s1 + $0xa0] sm:$0xf]  ;;  %v4216_v24 = vld [vmem:[%s6814_s1 + $0xac] sm:$0xf0]  ;;  %v3269_v25 = vor.u32 %v4316_v22, %v3268_v20  ;;  %1617 = vmatpush.bf16.msra.mxu1 %v3013_v17 }
   0xa   :  { %v2996_v26 = vld [vmem:[%s6814_s1 + $0x1a0] sm:$0xf]  ;;  %v4248_v27 = vld [vmem:[%s6814_s1 + $0x1ac] sm:$0xf0]  ;;  %v2869_v29 = vor.u32 %v4216_v24, %v2868_v23  ;;  %1630 = vmatpush.bf16.msra.mxu2 %v3141_v21 }
   0xb   :  { %v3124_v28 = vld [vmem:[%s6814_s1 + $0x2a0] sm:$0xf]  ;;  %v4280_v30 = vld [vmem:[%s6814_s1 + $0x2ac] sm:$0xf0]  ;;  %v2997_v33 = vor.u32 %v4248_v27, %v2996_v26  ;;  %1643 = vmatpush.bf16.msra.mxu3 %v3269_v25 }
   0xc   :  { %v3252_v31 = vld [vmem:[%s6814_s1 + $0x3a0] sm:$0xf]  ;;  %v4312_v32 = vld [vmem:[%s6814_s1 + $0x3ac] sm:$0xf0]  ;;  %v3125_v34 = vor.u32 %v4280_v30, %v3124_v28  ;;  %1605 = vmatpush.bf16.msra.mxu0 %v2869_v29 }
   0xd   :  { %v2852_v35 = vld [vmem:[%s6814_s1 + $0x80] sm:$0xf]  ;;  %v4212_v36 = vld [vmem:[%s6814_s1 + $0x8c] sm:$0xf0]  ;;  %v3253_v38 = vor.u32 %v4312_v32, %v3252_v31  ;;  %1618 = vmatpush.bf16.msra.mxu1 %v2997_v33 }
   0xe   :  { %v2980_v37 = vld [vmem:[%s6814_s1 + $0x180] sm:$0xf]  ;;  %v4244_v39 = vld [vmem:[%s6814_s1 + $0x18c] sm:$0xf0]  ;;  %v2853_v44 = vor.u32 %v4212_v36, %v2852_v35  ;;  %1631 = vmatpush.bf16.msra.mxu2 %v3125_v34 }
   0xf   :  { %v3108_v40 = vld [vmem:[%s6814_s1 + $0x280] sm:$0xf]  ;;  %v4276_v41 = vld [vmem:[%s6814_s1 + $0x28c] sm:$0xf0]  ;;  %v2981_v45 = vor.u32 %v4244_v39, %v2980_v37  ;;  %1644 = vmatpush.bf16.msra.mxu3 %v3253_v38 }
  0x10   :  { %v3236_v42 = vld [vmem:[%s6814_s1 + $0x380] sm:$0xf]  ;;  %v4308_v43 = vld [vmem:[%s6814_s1 + $0x38c] sm:$0xf0]  ;;  %v3109_v46 = vor.u32 %v4276_v41, %v3108_v40  ;;  %1606 = vmatpush.bf16.msra.mxu0 %v2853_v44 }
  0x11   :  { %v2836_v47 = vld [vmem:[%s6814_s1 + $0x60] sm:$0xf]  ;;  %v4208_v48 = vld [vmem:[%s6814_s1 + $0x6c] sm:$0xf0]  ;;  %v3237_v50 = vor.u32 %v4308_v43, %v3236_v42  ;;  %1619 = vmatpush.bf16.msra.mxu1 %v2981_v45 }
  0x12   :  { %v2964_v49 = vld [vmem:[%s6814_s1 + $0x160] sm:$0xf]  ;;  %v4240_v51 = vld [vmem:[%s6814_s1 + $0x16c] sm:$0xf0]  ;;  %v2837_v56 = vor.u32 %v4208_v48, %v2836_v47  ;;  %1632 = vmatpush.bf16.msra.mxu2 %v3109_v46 }
  0x13   :  { %v3092_v52 = vld [vmem:[%s6814_s1 + $0x260] sm:$0xf]  ;;  %v4272_v53 = vld [vmem:[%s6814_s1 + $0x26c] sm:$0xf0]  ;;  %v2965_v57 = vor.u32 %v4240_v51, %v2964_v49  ;;  %1645 = vmatpush.bf16.msra.mxu3 %v3237_v50 }
  0x14   :  { %v3220_v54 = vld [vmem:[%s6814_s1 + $0x360] sm:$0xf]  ;;  %v4304_v55 = vld [vmem:[%s6814_s1 + $0x36c] sm:$0xf0]  ;;  %v3093_v58 = vor.u32 %v4272_v53, %v3092_v52  ;;  %1607 = vmatpush.bf16.msra.mxu0 %v2837_v56 }
  0x15   :  { %v2820_v59 = vld [vmem:[%s6814_s1 + $0x40] sm:$0xf]  ;;  %v4204_v60 = vld [vmem:[%s6814_s1 + $0x4c] sm:$0xf0]  ;;  %v3221_v62 = vor.u32 %v4304_v55, %v3220_v54  ;;  %1620 = vmatpush.bf16.msra.mxu1 %v2965_v57 }
  0x16   :  { %v2948_v61 = vld [vmem:[%s6814_s1 + $0x140] sm:$0xf]  ;;  %v4236_v63 = vld [vmem:[%s6814_s1 + $0x14c] sm:$0xf0]  ;;  %v2821_v4 = vor.u32 %v4204_v60, %v2820_v59  ;;  %1633 = vmatpush.bf16.msra.mxu2 %v3093_v58 }
  0x17   :  { %v3076_v0 = vld [vmem:[%s6814_s1 + $0x240] sm:$0xf]  ;;  %v4268_v1 = vld [vmem:[%s6814_s1 + $0x24c] sm:$0xf0]  ;;  %v2949_v5 = vor.u32 %v4236_v63, %v2948_v61  ;;  %1646 = vmatpush.bf16.msra.mxu3 %v3221_v62 }
  0x18   :  { %v3204_v2 = vld [vmem:[%s6814_s1 + $0x340] sm:$0xf]  ;;  %v4300_v3 = vld [vmem:[%s6814_s1 + $0x34c] sm:$0xf0]  ;;  %v3077_v6 = vor.u32 %v4268_v1, %v3076_v0  ;;  %1608 = vmatpush.bf16.msra.mxu0 %v2821_v4 }
  0x19   :  { %v2804_v7 = vld [vmem:[%s6814_s1 + $0x20] sm:$0xf]  ;;  %v4200_v8 = vld [vmem:[%s6814_s1 + $0x2c] sm:$0xf0]  ;;  %v3205_v10 = vor.u32 %v4300_v3, %v3204_v2  ;;  %1621 = vmatpush.bf16.msra.mxu1 %v2949_v5 }
  0x1a   :  { %v2932_v9 = vld [vmem:[%s6814_s1 + $0x120] sm:$0xf]  ;;  %v4232_v11 = vld [vmem:[%s6814_s1 + $0x12c] sm:$0xf0]  ;;  %v2805_v16 = vor.u32 %v4200_v8, %v2804_v7  ;;  %1634 = vmatpush.bf16.msra.mxu2 %v3077_v6 }
  0x1b   :  { %v3060_v12 = vld [vmem:[%s6814_s1 + $0x220] sm:$0xf]  ;;  %v4264_v13 = vld [vmem:[%s6814_s1 + $0x22c] sm:$0xf0]  ;;  %v2933_v19 = vor.u32 %v4232_v11, %v2932_v9  ;;  %1647 = vmatpush.bf16.msra.mxu3 %v3205_v10 }
  0x1c   :  { %v3188_v14 = vld [vmem:[%s6814_s1 + $0x320] sm:$0xf]  ;;  %v4296_v15 = vld [vmem:[%s6814_s1 + $0x32c] sm:$0xf0]  ;;  %v3061_v20 = vor.u32 %v4264_v13, %v3060_v12  ;;  %1609 = vmatpush.bf16.msra.mxu0 %v2805_v16 }
  0x1d   :  { %v2788_v17 = vld [vmem:[%s6814_s1] sm:$0xf]  ;;  %v4196_v18 = vld [vmem:[%s6814_s1 + $0xc] sm:$0xf0]  ;;  %v3189_v24 = vor.u32 %v4296_v15, %v3188_v14  ;;  %1622 = vmatpush.bf16.msra.mxu1 %v2933_v19 }
  0x1e   :  { %v2916_v21 = vld [vmem:[%s6814_s1 + $0x100] sm:$0xf]  ;;  %v4228_v22 = vld [vmem:[%s6814_s1 + $0x10c] sm:$0xf0]  ;;  %v2789_v31 = vor.u32 %v4196_v18, %v2788_v17  ;;  %1635 = vmatpush.bf16.msra.mxu2 %v3061_v20 }
  0x1f   :  { %v3044_v23 = vld [vmem:[%s6814_s1 + $0x200] sm:$0xf]  ;;  %v4260_v25 = vld [vmem:[%s6814_s1 + $0x20c] sm:$0xf0]  ;;  %v2917_v35 = vor.u32 %v4228_v22, %v2916_v21  ;;  %1648 = vmatpush.bf16.msra.mxu3 %v3189_v24 }
  0x20   :  { %v3172_v26 = vld [vmem:[%s6814_s1 + $0x300] sm:$0xf]  ;;  %v4292_v27 = vld [vmem:[%s6814_s1 + $0x30c] sm:$0xf0]  ;;  %v3045_v36 = vor.u32 %v4260_v25, %v3044_v23  ;;  %1610 = vmatpush.bf16.msra.mxu0 %v2789_v31 }
  0x21   :  { %v3412_v28 = vld [vmem:[%s6814_s1 + $0x4e0] sm:$0xf]  ;;  %v4352_v29 = vld [vmem:[%s6814_s1 + $0x4ec] sm:$0xf0]  ;;  %v3173_v39 = vor.u32 %v4292_v27, %v3172_v26  ;;  %1623 = vmatpush.bf16.msra.mxu1 %v2917_v35 }
  0x22   :  { %v3540_v30 = vld [vmem:[%s6814_s1 + $0x5e0] sm:$0xf]  ;;  %v4384_v32 = vld [vmem:[%s6814_s1 + $0x5ec] sm:$0xf0]  ;;  %v3413_v40 = vor.u32 %v4352_v29, %v3412_v28  ;;  %1636 = vmatpush.bf16.msra.mxu2 %v3045_v36 }
  0x23   :  { %v3668_v33 = vld [vmem:[%s6814_s1 + $0x6e0] sm:$0xf]  ;;  %v4416_v34 = vld [vmem:[%s6814_s1 + $0x6ec] sm:$0xf0]  ;;  %v3541_v41 = vor.u32 %v4384_v32, %v3540_v30  ;;  %1649 = vmatpush.bf16.msra.mxu3 %v3173_v39 }
  0x24   :  { %v3796_v37 = vld [vmem:[%s6814_s1 + $0x7e0] sm:$0xf]  ;;  %v4448_v38 = vld [vmem:[%s6814_s1 + $0x7ec] sm:$0xf0]  ;;  %v3669_v42 = vor.u32 %v4416_v34, %v3668_v33  ;;  %1655 = vmatpush.bf16.msrb.mxu0 %v3413_v40 }
  0x25   :  { %v3396_v43 = vld [vmem:[%s6814_s1 + $0x4c0] sm:$0xf]  ;;  %v4348_v44 = vld [vmem:[%s6814_s1 + $0x4cc] sm:$0xf0]  ;;  %v3797_v46 = vor.u32 %v4448_v38, %v3796_v37  ;;  %1668 = vmatpush.bf16.msrb.mxu1 %v3541_v41 }
  0x26   :  { %v3524_v45 = vld [vmem:[%s6814_s1 + $0x5c0] sm:$0xf]  ;;  %v4380_v47 = vld [vmem:[%s6814_s1 + $0x5cc] sm:$0xf0]  ;;  %v3397_v52 = vor.u32 %v4348_v44, %v3396_v43  ;;  %1681 = vmatpush.bf16.msrb.mxu2 %v3669_v42 }
  0x27   :  { %v3652_v48 = vld [vmem:[%s6814_s1 + $0x6c0] sm:$0xf]  ;;  %v4412_v49 = vld [vmem:[%s6814_s1 + $0x6cc] sm:$0xf0]  ;;  %v3525_v53 = vor.u32 %v4380_v47, %v3524_v45  ;;  %1694 = vmatpush.bf16.msrb.mxu3 %v3797_v46 }
  0x28   :  { %v3780_v50 = vld [vmem:[%s6814_s1 + $0x7c0] sm:$0xf]  ;;  %v4444_v51 = vld [vmem:[%s6814_s1 + $0x7cc] sm:$0xf0]  ;;  %v3653_v54 = vor.u32 %v4412_v49, %v3652_v48  ;;  %1656 = vmatpush.bf16.msrb.mxu0 %v3397_v52  ;;  %v27_v52 = vld [vmem:[%s6815_s0 + $0x8] sm:$0xff] }
  0x29   :  { %v3380_v55 = vld [vmem:[%s6814_s1 + $0x4a0] sm:$0xf]  ;;  %v4344_v56 = vld [vmem:[%s6814_s1 + $0x4ac] sm:$0xf0]  ;;  %v3781_v58 = vor.u32 %v4444_v51, %v3780_v50  ;;  %1669 = vmatpush.bf16.msrb.mxu1 %v3525_v53  ;;  %32 = vst [vmem:[#allocation1 + $0x20] ss:$4 sm:$0xff] %v27_v52 }
  0x2a   :  { %v3508_v57 = vld [vmem:[%s6814_s1 + $0x5a0] sm:$0xf]  ;;  %v4376_v59 = vld [vmem:[%s6814_s1 + $0x5ac] sm:$0xf0]  ;;  %v3381_v0 = vor.u32 %v4344_v56, %v3380_v55  ;;  %1682 = vmatpush.bf16.msrb.mxu2 %v3653_v54  ;;  %v4310_v52 = vld [vmem:[%s6814_s1 + $0x3a4] sm:$0xf] }
  0x2b   :  { %v3636_v60 = vld [vmem:[%s6814_s1 + $0x6a0] sm:$0xf]  ;;  %v4408_v61 = vld [vmem:[%s6814_s1 + $0x6ac] sm:$0xf0]  ;;  %v3509_v3 = vor.u32 %v4376_v59, %v3508_v57  ;;  %1695 = vmatpush.bf16.msrb.mxu3 %v3781_v58 }
  0x2c   :  { %v3764_v62 = vld [vmem:[%s6814_s1 + $0x7a0] sm:$0xf]  ;;  %v4440_v63 = vld [vmem:[%s6814_s1 + $0x7ac] sm:$0xf0]  ;;  %v3637_v4 = vor.u32 %v4408_v61, %v3636_v60  ;;  %1657 = vmatpush.bf16.msrb.mxu0 %v3381_v0 }
  0x2d   :  { %v3364_v1 = vld [vmem:[%s6814_s1 + $0x480] sm:$0xf]  ;;  %v4340_v5 = vld [vmem:[%s6814_s1 + $0x48c] sm:$0xf0]  ;;  %v3765_v7 = vor.u32 %v4440_v63, %v3764_v62  ;;  %1670 = vmatpush.bf16.msrb.mxu1 %v3509_v3 }
  0x2e   :  { %v26_v2 = vld [vmem:[%s6815_s0] sm:$0xff]  ;;  %v4372_v8 = vld [vmem:[%s6814_s1 + $0x58c] sm:$0xf0]  ;;  %v3365_v13 = vor.u32 %v4340_v5, %v3364_v1  ;;  %1683 = vmatpush.bf16.msrb.mxu2 %v3637_v4 }
  0x2f   :  { %v3492_v6 = vld [vmem:[%s6814_s1 + $0x580] sm:$0xf]  ;;  %30 = vst [vmem:[#allocation1] ss:$4 sm:$0xff] %v26_v2  ;;  %v4404_v10 = vld [vmem:[%s6814_s1 + $0x68c] sm:$0xf0]  ;;  %1696 = vmatpush.bf16.msrb.mxu3 %v3765_v7 }
  0x30   :  { %v3620_v9 = vld [vmem:[%s6814_s1 + $0x680] sm:$0xf]  ;;  %v4436_v12 = vld [vmem:[%s6814_s1 + $0x78c] sm:$0xf0]  ;;  %v3493_v15 = vor.u32 %v4372_v8, %v3492_v6  ;;  %1658 = vmatpush.bf16.msrb.mxu0 %v3365_v13  ;;  %v4222_v6 = vld [vmem:[%s6814_s1 + $0xe4] sm:$0xf] }
  0x31   :  { %v3748_v11 = vld [vmem:[%s6814_s1 + $0x780] sm:$0xf]  ;;  %v3621_v16 = vor.u32 %v4404_v10, %v3620_v9  ;;  %v4336_v17 = vld [vmem:[%s6814_s1 + $0x46c] sm:$0xf0]  ;;  %v2902_v7 = vld [vmem:[%s6814_s1 + $0xf0] sm:$0xf0] }
  0x32   :  { %v3348_v14 = vld [vmem:[%s6814_s1 + $0x460] sm:$0xf]  ;;  %v4368_v19 = vld [vmem:[%s6814_s1 + $0x56c] sm:$0xf0]  ;;  %v3749_v20 = vor.u32 %v4436_v12, %v3748_v11  ;;  %1671 = vmatpush.bf16.msrb.mxu1 %v3493_v15  ;;  %v4254_v8 = vld [vmem:[%s6814_s1 + $0x1e4] sm:$0xf] }
  0x33   :  { %v3476_v18 = vld [vmem:[%s6814_s1 + $0x560] sm:$0xf]  ;;  %v4400_v22 = vld [vmem:[%s6814_s1 + $0x66c] sm:$0xf0]  ;;  %v3349_v27 = vor.u32 %v4336_v17, %v3348_v14  ;;  %1684 = vmatpush.bf16.msrb.mxu2 %v3621_v16  ;;  %v3030_v9 = vld [vmem:[%s6814_s1 + $0x1f0] sm:$0xf0] }
  0x34   :  { %v3604_v21 = vld [vmem:[%s6814_s1 + $0x660] sm:$0xf]  ;;  %v4432_v24 = vld [vmem:[%s6814_s1 + $0x76c] sm:$0xf0]  ;;  %v3477_v28 = vor.u32 %v4368_v19, %v3476_v18  ;;  %1697 = vmatpush.bf16.msrb.mxu3 %v3749_v20  ;;  %v4286_v10 = vld [vmem:[%s6814_s1 + $0x2e4] sm:$0xf] }
  0x35   :  { %v3732_v23 = vld [vmem:[%s6814_s1 + $0x760] sm:$0xf]  ;;  %v4332_v26 = vld [vmem:[%s6814_s1 + $0x44c] sm:$0xf0]  ;;  %v3605_v32 = vor.u32 %v4400_v22, %v3604_v21  ;;  %1659 = vmatpush.bf16.msrb.mxu0 %v3349_v27  ;;  %v3158_v12 = vld [vmem:[%s6814_s1 + $0x2f0] sm:$0xf0]  ;;  %v2905_v21 = vor.u32 %v4222_v6, %v2902_v7 }
  0x36   :  { %v3332_v25 = vld [vmem:[%s6814_s1 + $0x440] sm:$0xf]  ;;  %v35_v30 = vld.sshfl [vmem:[#allocation1 + $0x10] sm:$0xff pattern:$0x73625140]  ;;  %v3733_v37 = vor.u32 %v4432_v24, %v3732_v23  ;;  %1672 = vmatpush.bf16.msrb.mxu1 %v3477_v28  ;;  %v3033_v24 = vor.u32 %v4254_v8, %v3030_v9 }
  0x37   :  { %v3460_v29 = vld [vmem:[%s6814_s1 + $0x540] sm:$0xf]  ;;  %v4911_v33 = vpack.c.bf16 %v35_v30, %v35_v30  ;;  %v36_v35 = vld.sshfl [vmem:[#allocation1 + $0x18] sm:$0xff pattern:$0x73625140]  ;;  %v3333_v45 = vor.u32 %v4332_v26, %v3332_v25  ;;  %1685 = vmatpush.bf16.msrb.mxu2 %v3605_v32  ;;  %v3161_v25 = vor.u32 %v4286_v10, %v3158_v12 }
  0x38   :  { %v33_v31 = vld.sshfl [vmem:[#allocation1] sm:$0xff pattern:$0x73625140]  ;;  %v34_v36 = vld.sshfl [vmem:[#allocation1 + $0x8] sm:$0xff pattern:$0x73625140]  ;;  %v4924_v41 = vpack.c.bf16 %v36_v35, %v36_v35  ;;  %1698 = vmatpush.bf16.msrb.mxu3 %v3733_v37 }
  0x39   :  { %v4913_v34 = vpack.c.bf16 %v33_v31, %v33_v31  ;;  %v4364_v38 = vld [vmem:[%s6814_s1 + $0x54c] sm:$0xf0]  ;;  %v3588_v39 = vld [vmem:[%s6814_s1 + $0x640] sm:$0xf]  ;;  %v4926_v42 = vpack.c.bf16 %v34_v36, %v34_v36  ;;  %1637 = vmatmul.bf16.vlgmr.msra.gmra.mxu2 %v4911_v33  ;;  %1660 = vmatpush.bf16.msrb.mxu0 %v3333_v45  ;;  %v4318_v13 = vld [vmem:[%s6814_s1 + $0x3e4] sm:$0xf] }
  0x3a   :  { %v4396_v40 = vld [vmem:[%s6814_s1 + $0x64c] sm:$0xf0]  ;;  %v3716_v43 = vld [vmem:[%s6814_s1 + $0x740] sm:$0xf]  ;;  %1650 = vmatmul.bf16.vlgmr.msra.gmra.mxu3 %v4924_v41  ;;  %v3461_v48 = vor.u32 %v4364_v38, %v3460_v29  ;;  %v3286_v14 = vld [vmem:[%s6814_s1 + $0x3f0] sm:$0xf0] }
  0x3b   :  { %v4428_v44 = vld [vmem:[%s6814_s1 + $0x74c] sm:$0xf0]  ;;  %1611 = vmatmul.bf16.vlgmr.msra.gmra.mxu0 %v4913_v34  ;;  %v3316_v46 = vld [vmem:[%s6814_s1 + $0x420] sm:$0xf]  ;;  %v3589_v49 = vor.u32 %v4396_v40, %v3588_v39  ;;  %1624 = vmatmul.bf16.vlgmr.msra.gmra.mxu1 %v4926_v42  ;;  %v4218_v17 = vld [vmem:[%s6814_s1 + $0xc4] sm:$0xf]  ;;  %v3289_v28 = vor.u32 %v4318_v13, %v3286_v14 }
  0x3c   :  { %v4328_v47 = vld [vmem:[%s6814_s1 + $0x42c] sm:$0xf0]  ;;  %v3444_v50 = vld [vmem:[%s6814_s1 + $0x520] sm:$0xf]  ;;  %v3717_v53 = vor.u32 %v4428_v44, %v3716_v43  ;;  %1673 = vmatpush.bf16.msrb.mxu1 %v3461_v48  ;;  %v2886_v18 = vld [vmem:[%s6814_s1 + $0xd0] sm:$0xf0] }
  0x3d   :  { %v4360_v51 = vld [vmem:[%s6814_s1 + $0x52c] sm:$0xf0]  ;;  %v3572_v54 = vld [vmem:[%s6814_s1 + $0x620] sm:$0xf]  ;;  %v3317_v59 = vor.u32 %v4328_v47, %v3316_v46  ;;  %1686 = vmatpush.bf16.msrb.mxu2 %v3589_v49  ;;  %v4250_v26 = vld [vmem:[%s6814_s1 + $0x1c4] sm:$0xf]  ;;  %v2889_v39 = vor.u32 %v4218_v17, %v2886_v18 }
  0x3e   :  { %v4392_v55 = vld [vmem:[%s6814_s1 + $0x62c] sm:$0xf0]  ;;  %v3700_v56 = vld [vmem:[%s6814_s1 + $0x720] sm:$0xf]  ;;  %v3445_v63 = vor.u32 %v4360_v51, %v3444_v50  ;;  %1699 = vmatpush.bf16.msrb.mxu3 %v3717_v53  ;;  %v3014_v29 = vld [vmem:[%s6814_s1 + $0x1d0] sm:$0xf0] }
  0x3f   :  { %v4424_v57 = vld [vmem:[%s6814_s1 + $0x72c] sm:$0xf0]  ;;  %v3300_v58 = vld [vmem:[%s6814_s1 + $0x400] sm:$0xf]  ;;  %v3573_v0 = vor.u32 %v4392_v55, %v3572_v54  ;;  %1661 = vmatpush.bf16.msrb.mxu0 %v3317_v59  ;;  %v4282_v30 = vld [vmem:[%s6814_s1 + $0x2c4] sm:$0xf]  ;;  %v3017_v43 = vor.u32 %v4250_v26, %v3014_v29 }
  0x40   :  { %v4324_v60 = vld [vmem:[%s6814_s1 + $0x40c] sm:$0xf0]  ;;  %v3428_v61 = vld [vmem:[%s6814_s1 + $0x500] sm:$0xf]  ;;  %v3701_v4 = vor.u32 %v4424_v57, %v3700_v56  ;;  %1674 = vmatpush.bf16.msrb.mxu1 %v3445_v63  ;;  %v3142_v31 = vld [vmem:[%s6814_s1 + $0x2d0] sm:$0xf0] }
  0x41   :  { %v4356_v62 = vld [vmem:[%s6814_s1 + $0x50c] sm:$0xf0]  ;;  %v3556_v1 = vld [vmem:[%s6814_s1 + $0x600] sm:$0xf]  ;;  %v3301_v11 = vor.u32 %v4324_v60, %v3300_v58  ;;  %1687 = vmatpush.bf16.msrb.mxu2 %v3573_v0  ;;  %v4314_v35 = vld [vmem:[%s6814_s1 + $0x3c4] sm:$0xf]  ;;  %v3145_v44 = vor.u32 %v4282_v30, %v3142_v31 }
  0x42   :  { %v4388_v2 = vld [vmem:[%s6814_s1 + $0x60c] sm:$0xf0]  ;;  %v3684_v3 = vld [vmem:[%s6814_s1 + $0x700] sm:$0xf]  ;;  %v3429_v15 = vor.u32 %v4356_v62, %v3428_v61  ;;  %1700 = vmatpush.bf16.msrb.mxu3 %v3701_v4  ;;  %v3270_v36 = vld [vmem:[%s6814_s1 + $0x3d0] sm:$0xf0] }
  0x43   :  { %v4420_v5 = vld [vmem:[%s6814_s1 + $0x70c] sm:$0xf0]  ;;  %v3557_v16 = vor.u32 %v4388_v2, %v3556_v1  ;;  %v37_v22 = vld.sshfl [vmem:[#allocation1 + $0x20] sm:$0xff pattern:$0x73625140]  ;;  %1662 = vmatpush.bf16.msrb.mxu0 %v3301_v11  ;;  %v3273_v48 = vor.u32 %v4314_v35, %v3270_v36 }
  0x44   :  { %v39_v19 = vld.sshfl [vmem:[#allocation1 + $0x30] sm:$0xff pattern:$0x73625140]  ;;  %v3685_v20 = vor.u32 %v4420_v5, %v3684_v3  ;;  %v40_v23 = vld.sshfl [vmem:[#allocation1 + $0x38] sm:$0xff pattern:$0x73625140]  ;;  %1675 = vmatpush.bf16.msrb.mxu1 %v3429_v15  ;;  %v5039_v37 = vpack.c.bf16 %v37_v22, %v37_v22 }
  0x45   :  { %v38_v27 = vld.sshfl [vmem:[#allocation1 + $0x28] sm:$0xff pattern:$0x73625140]  ;;  %v5031_v32 = vpack.c.bf16 %v39_v19, %v39_v19  ;;  %1688 = vmatpush.bf16.msrb.mxu2 %v3557_v16  ;;  %v5041_v38 = vpack.c.bf16 %v40_v23, %v40_v23  ;;  %v4214_v45 = vld [vmem:[%s6814_s1 + $0xa4] sm:$0xf] }
  0x46   :  { %1701 = vmatpush.bf16.msrb.mxu3 %v3685_v20  ;;  %v5043_v40 = vpack.c.bf16 %v38_v27, %v38_v27  ;;  %v2870_v46 = vld [vmem:[%s6814_s1 + $0xb0] sm:$0xf0]  ;;  %v4246_v47 = vld [vmem:[%s6814_s1 + $0x1a4] sm:$0xf] }
  0x47   :  { %1707 = vmatpush.bf16.msra.mxu0 %v2905_v21  ;;  %v2998_v49 = vld [vmem:[%s6814_s1 + $0x1b0] sm:$0xf0]  ;;  %v4278_v50 = vld [vmem:[%s6814_s1 + $0x2a4] sm:$0xf]  ;;  %v2873_v54 = vor.u32 %v4214_v45, %v2870_v46 }
  0x48   :  { %1720 = vmatpush.bf16.msra.mxu1 %v3033_v24  ;;  %v3126_v51 = vld [vmem:[%s6814_s1 + $0x2b0] sm:$0xf0]  ;;  %v3001_v55 = vor.u32 %v4246_v47, %v2998_v49  ;;  %v4210_v57 = vld [vmem:[%s6814_s1 + $0x84] sm:$0xf] }
  0x49   :  { %1733 = vmatpush.bf16.msra.mxu2 %v3161_v25  ;;  %v3254_v53 = vld [vmem:[%s6814_s1 + $0x3b0] sm:$0xf0]  ;;  %v3129_v56 = vor.u32 %v4278_v50, %v3126_v51  ;;  %v4242_v59 = vld [vmem:[%s6814_s1 + $0x184] sm:$0xf] }
  0x4a   :  { %1746 = vmatpush.bf16.msra.mxu3 %v3289_v28  ;;  %1689 = vmatmul.bf16.vlgmr.msrb.gmra.mxu2 %v5031_v32  ;;  %v2854_v58 = vld [vmem:[%s6814_s1 + $0x90] sm:$0xf0]  ;;  %v3257_v60 = vor.u32 %v4310_v52, %v3254_v53  ;;  %v4274_v62 = vld [vmem:[%s6814_s1 + $0x284] sm:$0xf] }
  0x4b   :  { %1663 = vmatmul.bf16.vlgmr.msrb.gmra.mxu0 %v5039_v37  ;;  %1702 = vmatmul.bf16.vlgmr.msrb.gmra.mxu3 %v5041_v38  ;;  %v2982_v61 = vld [vmem:[%s6814_s1 + $0x190] sm:$0xf0]  ;;  %v4306_v0 = vld [vmem:[%s6814_s1 + $0x384] sm:$0xf]  ;;  %v2857_v2 = vor.u32 %v4210_v57, %v2854_v58 }
  0x4c   :  { %1708 = vmatpush.bf16.msra.mxu0 %v2889_v39  ;;  %1676 = vmatmul.bf16.vlgmr.msrb.gmra.mxu1 %v5043_v40  ;;  %v3110_v63 = vld [vmem:[%s6814_s1 + $0x290] sm:$0xf0]  ;;  %v2985_v3 = vor.u32 %v4242_v59, %v2982_v61  ;;  %v4206_v5 = vld [vmem:[%s6814_s1 + $0x64] sm:$0xf] }
  0x4d   :  { %1721 = vmatpush.bf16.msra.mxu1 %v3017_v43  ;;  %1734 = vmatpush.bf16.msra.mxu2 %v3145_v44  ;;  %v3238_v1 = vld [vmem:[%s6814_s1 + $0x390] sm:$0xf0]  ;;  %v3113_v4 = vor.u32 %v4274_v62, %v3110_v63  ;;  %v4238_v7 = vld [vmem:[%s6814_s1 + $0x164] sm:$0xf] }
  0x4e   :  { %1747 = vmatpush.bf16.msra.mxu3 %v3273_v48  ;;  %v2838_v6 = vld [vmem:[%s6814_s1 + $0x70] sm:$0xf0]  ;;  %v3241_v8 = vor.u32 %v4306_v0, %v3238_v1  ;;  %v4270_v10 = vld [vmem:[%s6814_s1 + $0x264] sm:$0xf] }
  0x4f   :  { %v2966_v9 = vld [vmem:[%s6814_s1 + $0x170] sm:$0xf0]  ;;  %v4302_v12 = vld [vmem:[%s6814_s1 + $0x364] sm:$0xf]  ;;  %v2841_v14 = vor.u32 %v4206_v5, %v2838_v6 }
  0x50   :  { %1709 = vmatpush.bf16.msra.mxu0 %v2873_v54  ;;  %v3094_v11 = vld [vmem:[%s6814_s1 + $0x270] sm:$0xf0]  ;;  %v2969_v15 = vor.u32 %v4238_v7, %v2966_v9  ;;  %v4202_v17 = vld [vmem:[%s6814_s1 + $0x44] sm:$0xf] }
  0x51   :  { %1722 = vmatpush.bf16.msra.mxu1 %v3001_v55  ;;  %1735 = vmatpush.bf16.msra.mxu2 %v3129_v56  ;;  %v3222_v13 = vld [vmem:[%s6814_s1 + $0x370] sm:$0xf0]  ;;  %v3097_v16 = vor.u32 %v4270_v10, %v3094_v11  ;;  %v4234_v19 = vld [vmem:[%s6814_s1 + $0x144] sm:$0xf] }
  0x52   :  { %1748 = vmatpush.bf16.msra.mxu3 %v3257_v60  ;;  %v2822_v18 = vld [vmem:[%s6814_s1 + $0x50] sm:$0xf0]  ;;  %v3225_v20 = vor.u32 %v4302_v12, %v3222_v13  ;;  %v4266_v22 = vld [vmem:[%s6814_s1 + $0x244] sm:$0xf] }
  0x53   :  { %v2950_v21 = vld [vmem:[%s6814_s1 + $0x150] sm:$0xf0]  ;;  %v4298_v24 = vld [vmem:[%s6814_s1 + $0x344] sm:$0xf]  ;;  %v2825_v26 = vor.u32 %v4202_v17, %v2822_v18 }
  0x54   :  { %1710 = vmatpush.bf16.msra.mxu0 %v2857_v2  ;;  %v3078_v23 = vld [vmem:[%s6814_s1 + $0x250] sm:$0xf0]  ;;  %v2953_v27 = vor.u32 %v4234_v19, %v2950_v21  ;;  %v4198_v29 = vld [vmem:[%s6814_s1 + $0x24] sm:$0xf] }
  0x55   :  { %1723 = vmatpush.bf16.msra.mxu1 %v2985_v3  ;;  %1736 = vmatpush.bf16.msra.mxu2 %v3113_v4  ;;  %v3206_v25 = vld [vmem:[%s6814_s1 + $0x350] sm:$0xf0]  ;;  %v3081_v28 = vor.u32 %v4266_v22, %v3078_v23  ;;  %v4230_v31 = vld [vmem:[%s6814_s1 + $0x124] sm:$0xf] }
  0x56   :  { %1749 = vmatpush.bf16.msra.mxu3 %v3241_v8  ;;  %v2806_v30 = vld [vmem:[%s6814_s1 + $0x30] sm:$0xf0]  ;;  %v3209_v35 = vor.u32 %v4298_v24, %v3206_v25  ;;  %v4262_v39 = vld [vmem:[%s6814_s1 + $0x224] sm:$0xf] }
  0x57   :  { %v2934_v36 = vld [vmem:[%s6814_s1 + $0x130] sm:$0xf0]  ;;  %v4294_v44 = vld [vmem:[%s6814_s1 + $0x324] sm:$0xf]  ;;  %v2809_v46 = vor.u32 %v4198_v29, %v2806_v30 }
  0x58   :  { %1711 = vmatpush.bf16.msra.mxu0 %v2841_v14  ;;  %v3062_v43 = vld [vmem:[%s6814_s1 + $0x230] sm:$0xf0]  ;;  %v4194_v47 = vld [vmem:[%s6814_s1 + $0x4] sm:$0xf]  ;;  %v2937_v49 = vor.u32 %v4230_v31, %v2934_v36 }
  0x59   :  { %1724 = vmatpush.bf16.msra.mxu1 %v2969_v15  ;;  %1737 = vmatpush.bf16.msra.mxu2 %v3097_v16  ;;  %v3190_v45 = vld [vmem:[%s6814_s1 + $0x330] sm:$0xf0]  ;;  %v3065_v50 = vor.u32 %v4262_v39, %v3062_v43  ;;  %v4226_v51 = vld [vmem:[%s6814_s1 + $0x104] sm:$0xf] }
  0x5a   :  { %1750 = vmatpush.bf16.msra.mxu3 %v3225_v20  ;;  %v2790_v48 = vld [vmem:[%s6814_s1 + $0x10] sm:$0xf0]  ;;  %v4258_v53 = vld [vmem:[%s6814_s1 + $0x204] sm:$0xf]  ;;  %v3193_v54 = vor.u32 %v4294_v44, %v3190_v45 }
  0x5b   :  { %v2918_v52 = vld [vmem:[%s6814_s1 + $0x110] sm:$0xf0]  ;;  %v4290_v56 = vld [vmem:[%s6814_s1 + $0x304] sm:$0xf]  ;;  %v2793_v61 = vor.u32 %v4194_v47, %v2790_v48 }
  0x5c   :  { %1712 = vmatpush.bf16.msra.mxu0 %v2825_v26  ;;  %v3046_v55 = vld [vmem:[%s6814_s1 + $0x210] sm:$0xf0]  ;;  %v4350_v58 = vld [vmem:[%s6814_s1 + $0x4e4] sm:$0xf]  ;;  %v2921_v1 = vor.u32 %v4226_v51, %v2918_v52 }
  0x5d   :  { %1725 = vmatpush.bf16.msra.mxu1 %v2953_v27  ;;  %1738 = vmatpush.bf16.msra.mxu2 %v3081_v28  ;;  %v3174_v57 = vld [vmem:[%s6814_s1 + $0x310] sm:$0xf0]  ;;  %v4382_v60 = vld [vmem:[%s6814_s1 + $0x5e4] sm:$0xf]  ;;  %v3049_v2 = vor.u32 %v4258_v53, %v3046_v55 }
  0x5e   :  { %1751 = vmatpush.bf16.msra.mxu3 %v3209_v35  ;;  %v3414_v59 = vld [vmem:[%s6814_s1 + $0x4f0] sm:$0xf0]  ;;  %v4414_v63 = vld [vmem:[%s6814_s1 + $0x6e4] sm:$0xf]  ;;  %v3177_v5 = vor.u32 %v4290_v56, %v3174_v57 }
  0x5f   :  { %v3542_v62 = vld [vmem:[%s6814_s1 + $0x5f0] sm:$0xf0]  ;;  %v4446_v3 = vld [vmem:[%s6814_s1 + $0x7e4] sm:$0xf]  ;;  %v3417_v6 = vor.u32 %v4350_v58, %v3414_v59 }
  0x60   :  { %1713 = vmatpush.bf16.msra.mxu0 %v2809_v46  ;;  %v3670_v0 = vld [vmem:[%s6814_s1 + $0x6f0] sm:$0xf0]  ;;  %v3545_v7 = vor.u32 %v4382_v60, %v3542_v62  ;;  %v4346_v9 = vld [vmem:[%s6814_s1 + $0x4c4] sm:$0xf] }
  0x61   :  { %1726 = vmatpush.bf16.msra.mxu1 %v2937_v49  ;;  %1739 = vmatpush.bf16.msra.mxu2 %v3065_v50  ;;  %v3798_v4 = vld [vmem:[%s6814_s1 + $0x7f0] sm:$0xf0]  ;;  %v3673_v8 = vor.u32 %v4414_v63, %v3670_v0  ;;  %v4378_v11 = vld [vmem:[%s6814_s1 + $0x5c4] sm:$0xf] }
  0x62   :  { %1752 = vmatpush.bf16.msra.mxu3 %v3193_v54  ;;  %v3398_v10 = vld [vmem:[%s6814_s1 + $0x4d0] sm:$0xf0]  ;;  %v3801_v12 = vor.u32 %v4446_v3, %v3798_v4  ;;  %v4410_v14 = vld [vmem:[%s6814_s1 + $0x6c4] sm:$0xf] }
  0x63   :  { %v3526_v13 = vld [vmem:[%s6814_s1 + $0x5d0] sm:$0xf0]  ;;  %v4442_v16 = vld [vmem:[%s6814_s1 + $0x7c4] sm:$0xf]  ;;  %v3401_v18 = vor.u32 %v4346_v9, %v3398_v10 }
  0x64   :  { %1714 = vmatpush.bf16.msra.mxu0 %v2793_v61  ;;  %v3654_v15 = vld [vmem:[%s6814_s1 + $0x6d0] sm:$0xf0]  ;;  %v3529_v19 = vor.u32 %v4378_v11, %v3526_v13  ;;  %v4342_v21 = vld [vmem:[%s6814_s1 + $0x4a4] sm:$0xf] }
  0x65   :  { %1727 = vmatpush.bf16.msra.mxu1 %v2921_v1  ;;  %1740 = vmatpush.bf16.msra.mxu2 %v3049_v2  ;;  %v3782_v17 = vld [vmem:[%s6814_s1 + $0x7d0] sm:$0xf0]  ;;  %v3657_v20 = vor.u32 %v4410_v14, %v3654_v15  ;;  %v4374_v23 = vld [vmem:[%s6814_s1 + $0x5a4] sm:$0xf] }
  0x66   :  { %1753 = vmatpush.bf16.msra.mxu3 %v3177_v5  ;;  %v3382_v22 = vld [vmem:[%s6814_s1 + $0x4b0] sm:$0xf0]  ;;  %v3785_v24 = vor.u32 %v4442_v16, %v3782_v17  ;;  %v4406_v26 = vld [vmem:[%s6814_s1 + $0x6a4] sm:$0xf] }
  0x67   :  { %v3510_v25 = vld [vmem:[%s6814_s1 + $0x5b0] sm:$0xf0]  ;;  %v4438_v28 = vld [vmem:[%s6814_s1 + $0x7a4] sm:$0xf]  ;;  %1715 = vmatmul.bf16.vlgmr.msra.gmra.mxu0 %v4913_v34  ;;  %v3385_v30 = vor.u32 %v4342_v21, %v3382_v22 }
  0x68   :  { %1759 = vmatpush.bf16.msrb.mxu0 %v3417_v6  ;;  %v3638_v27 = vld [vmem:[%s6814_s1 + $0x6b0] sm:$0xf0]  ;;  %1741 = vmatmul.bf16.vlgmr.msra.gmra.mxu2 %v4911_v33  ;;  %v3513_v31 = vor.u32 %v4374_v23, %v3510_v25  ;;  %v4338_v36 = vld [vmem:[%s6814_s1 + $0x484] sm:$0xf] }
  0x69   :  { %1772 = vmatpush.bf16.msrb.mxu1 %v3545_v7  ;;  %1785 = vmatpush.bf16.msrb.mxu2 %v3673_v8  ;;  %v3766_v29 = vld [vmem:[%s6814_s1 + $0x7b0] sm:$0xf0]  ;;  %v3641_v35 = vor.u32 %v4406_v26, %v3638_v27  ;;  %v4370_v43 = vld [vmem:[%s6814_s1 + $0x584] sm:$0xf] }
  0x6a   :  { %1798 = vmatpush.bf16.msrb.mxu3 %v3801_v12  ;;  %1728 = vmatmul.bf16.vlgmr.msra.gmra.mxu1 %v4926_v42  ;;  %v3366_v39 = vld [vmem:[%s6814_s1 + $0x490] sm:$0xf0]  ;;  %v3769_v44 = vor.u32 %v4438_v28, %v3766_v29  ;;  %v4402_v46 = vld [vmem:[%s6814_s1 + $0x684] sm:$0xf] }
  0x6b   :  { %1754 = vmatmul.bf16.vlgmr.msra.gmra.mxu3 %v4924_v41  ;;  %v3494_v45 = vld [vmem:[%s6814_s1 + $0x590] sm:$0xf0]  ;;  %v4434_v48 = vld [vmem:[%s6814_s1 + $0x784] sm:$0xf]  ;;  %v3369_v50 = vor.u32 %v4338_v36, %v3366_v39  ;;  %v2908_v39 = vld [vmem:[%s6814_s1 + $0xe8] sm:$0xf] }
  0x6c   :  { %1760 = vmatpush.bf16.msrb.mxu0 %v3401_v18  ;;  %v3622_v47 = vld [vmem:[%s6814_s1 + $0x690] sm:$0xf0]  ;;  %v3497_v51 = vor.u32 %v4370_v43, %v3494_v45  ;;  %v4334_v53 = vld [vmem:[%s6814_s1 + $0x464] sm:$0xf]  ;;  %v4225_v43 = vld [vmem:[%s6814_s1 + $0xf4] sm:$0xf0] }
  0x6d   :  { %1773 = vmatpush.bf16.msrb.mxu1 %v3529_v19  ;;  %1786 = vmatpush.bf16.msrb.mxu2 %v3657_v20  ;;  %v3750_v49 = vld [vmem:[%s6814_s1 + $0x790] sm:$0xf0]  ;;  %v3625_v52 = vor.u32 %v4402_v46, %v3622_v47  ;;  %v4366_v55 = vld [vmem:[%s6814_s1 + $0x564] sm:$0xf]  ;;  %v4257_v46 = vld [vmem:[%s6814_s1 + $0x1f4] sm:$0xf0] }
  0x6e   :  { %1799 = vmatpush.bf16.msrb.mxu3 %v3785_v24  ;;  %v3350_v54 = vld [vmem:[%s6814_s1 + $0x470] sm:$0xf0]  ;;  %v3753_v56 = vor.u32 %v4434_v48, %v3750_v49  ;;  %v4398_v58 = vld [vmem:[%s6814_s1 + $0x664] sm:$0xf]  ;;  %v3164_v47 = vld [vmem:[%s6814_s1 + $0x2e8] sm:$0xf] }
  0x6f   :  { %v3478_v57 = vld [vmem:[%s6814_s1 + $0x570] sm:$0xf0]  ;;  %v4430_v60 = vld [vmem:[%s6814_s1 + $0x764] sm:$0xf]  ;;  %v3353_v62 = vor.u32 %v4334_v53, %v3350_v54  ;;  %v4289_v48 = vld [vmem:[%s6814_s1 + $0x2f4] sm:$0xf0]  ;;  %v2909_v54 = vor.u32 %v4225_v43, %v2908_v39 }
  0x70   :  { %1761 = vmatpush.bf16.msrb.mxu0 %v3385_v30  ;;  %v3606_v59 = vld [vmem:[%s6814_s1 + $0x670] sm:$0xf0]  ;;  %v3481_v63 = vor.u32 %v4366_v55, %v3478_v57  ;;  %v4330_v1 = vld [vmem:[%s6814_s1 + $0x444] sm:$0xf]  ;;  %v2892_v57 = vld [vmem:[%s6814_s1 + $0xc8] sm:$0xf] }
  0x71   :  { %1774 = vmatpush.bf16.msrb.mxu1 %v3513_v31  ;;  %1787 = vmatpush.bf16.msrb.mxu2 %v3641_v35  ;;  %v3734_v61 = vld [vmem:[%s6814_s1 + $0x770] sm:$0xf0]  ;;  %v3609_v0 = vor.u32 %v4398_v58, %v3606_v59  ;;  %v4362_v3 = vld [vmem:[%s6814_s1 + $0x544] sm:$0xf]  ;;  %v4221_v58 = vld [vmem:[%s6814_s1 + $0xd4] sm:$0xf0] }
  0x72   :  { %1800 = vmatpush.bf16.msrb.mxu3 %v3769_v44  ;;  %v3334_v2 = vld [vmem:[%s6814_s1 + $0x450] sm:$0xf0]  ;;  %v3737_v4 = vor.u32 %v4430_v60, %v3734_v61  ;;  %v4394_v6 = vld [vmem:[%s6814_s1 + $0x644] sm:$0xf]  ;;  %v3036_v44 = vld [vmem:[%s6814_s1 + $0x1e8] sm:$0xf] }
  0x73   :  { %v3462_v5 = vld [vmem:[%s6814_s1 + $0x550] sm:$0xf0]  ;;  %v4426_v8 = vld [vmem:[%s6814_s1 + $0x744] sm:$0xf]  ;;  %v3337_v10 = vor.u32 %v4330_v1, %v3334_v2  ;;  %v3037_v55 = vor.u32 %v4257_v46, %v3036_v44  ;;  %v3020_v59 = vld [vmem:[%s6814_s1 + $0x1c8] sm:$0xf]  ;;  %v2893_v2 = vor.u32 %v4221_v58, %v2892_v57 }
  0x74   :  { %1762 = vmatpush.bf16.msrb.mxu0 %v3369_v50  ;;  %v3590_v7 = vld [vmem:[%s6814_s1 + $0x650] sm:$0xf0]  ;;  %v3465_v11 = vor.u32 %v4362_v3, %v3462_v5  ;;  %v4326_v13 = vld [vmem:[%s6814_s1 + $0x424] sm:$0xf]  ;;  %v4253_v61 = vld [vmem:[%s6814_s1 + $0x1d4] sm:$0xf0] }
  0x75   :  { %1775 = vmatpush.bf16.msrb.mxu1 %v3497_v51  ;;  %1788 = vmatpush.bf16.msrb.mxu2 %v3625_v52  ;;  %v3718_v9 = vld [vmem:[%s6814_s1 + $0x750] sm:$0xf0]  ;;  %v3593_v12 = vor.u32 %v4394_v6, %v3590_v7  ;;  %v4358_v15 = vld [vmem:[%s6814_s1 + $0x524] sm:$0xf]  ;;  %v3292_v51 = vld [vmem:[%s6814_s1 + $0x3e8] sm:$0xf]  ;;  %v3021_v3 = vor.u32 %v4253_v61, %v3020_v59 }
  0x76   :  { %1801 = vmatpush.bf16.msrb.mxu3 %v3753_v56  ;;  %v3318_v14 = vld [vmem:[%s6814_s1 + $0x430] sm:$0xf0]  ;;  %v3721_v16 = vor.u32 %v4426_v8, %v3718_v9  ;;  %v4390_v18 = vld [vmem:[%s6814_s1 + $0x624] sm:$0xf]  ;;  %v4321_v52 = vld [vmem:[%s6814_s1 + $0x3f4] sm:$0xf0]  ;;  %v3165_v56 = vor.u32 %v4289_v48, %v3164_v47 }
  0x77   :  { %v3446_v17 = vld [vmem:[%s6814_s1 + $0x530] sm:$0xf0]  ;;  %v4422_v20 = vld [vmem:[%s6814_s1 + $0x724] sm:$0xf]  ;;  %v3321_v22 = vor.u32 %v4326_v13, %v3318_v14  ;;  %v3293_v60 = vor.u32 %v4321_v52, %v3292_v51  ;;  %v4317_v1 = vld [vmem:[%s6814_s1 + $0x3d4] sm:$0xf0] }
  0x78   :  { %1763 = vmatpush.bf16.msrb.mxu0 %v3353_v62  ;;  %v3574_v19 = vld [vmem:[%s6814_s1 + $0x630] sm:$0xf0]  ;;  %v4322_v23 = vld [vmem:[%s6814_s1 + $0x404] sm:$0xf]  ;;  %v3449_v25 = vor.u32 %v4358_v15, %v3446_v17  ;;  %v3148_v62 = vld [vmem:[%s6814_s1 + $0x2c8] sm:$0xf] }
  0x79   :  { %1776 = vmatpush.bf16.msrb.mxu1 %v3481_v63  ;;  %1789 = vmatpush.bf16.msrb.mxu2 %v3609_v0  ;;  %v3702_v21 = vld [vmem:[%s6814_s1 + $0x730] sm:$0xf0]  ;;  %v3577_v26 = vor.u32 %v4390_v18, %v3574_v19  ;;  %v4354_v27 = vld [vmem:[%s6814_s1 + $0x504] sm:$0xf]  ;;  %v4285_v63 = vld [vmem:[%s6814_s1 + $0x2d4] sm:$0xf0] }
  0x7a   :  { %1802 = vmatpush.bf16.msrb.mxu3 %v3737_v4  ;;  %v3302_v24 = vld [vmem:[%s6814_s1 + $0x410] sm:$0xf0]  ;;  %v4386_v29 = vld [vmem:[%s6814_s1 + $0x604] sm:$0xf]  ;;  %v3705_v30 = vor.u32 %v4422_v20, %v3702_v21  ;;  %v3276_v0 = vld [vmem:[%s6814_s1 + $0x3c8] sm:$0xf]  ;;  %v3149_v4 = vor.u32 %v4285_v63, %v3148_v62 }
  0x7b   :  { %v3430_v28 = vld [vmem:[%s6814_s1 + $0x510] sm:$0xf0]  ;;  %v4418_v35 = vld [vmem:[%s6814_s1 + $0x704] sm:$0xf]  ;;  %v3305_v45 = vor.u32 %v4322_v23, %v3302_v24  ;;  %v2876_v5 = vld [vmem:[%s6814_s1 + $0xa8] sm:$0xf]  ;;  %v3277_v8 = vor.u32 %v4317_v1, %v3276_v0 }
  0x7c   :  { %1764 = vmatpush.bf16.msrb.mxu0 %v3337_v10  ;;  %v3558_v31 = vld [vmem:[%s6814_s1 + $0x610] sm:$0xf0]  ;;  %v3433_v49 = vor.u32 %v4354_v27, %v3430_v28  ;;  %v4217_v6 = vld [vmem:[%s6814_s1 + $0xb4] sm:$0xf0]  ;;  %v3004_v7 = vld [vmem:[%s6814_s1 + $0x1a8] sm:$0xf] }
  0x7d   :  { %1777 = vmatpush.bf16.msrb.mxu1 %v3465_v11  ;;  %1790 = vmatpush.bf16.msrb.mxu2 %v3593_v12  ;;  %v3686_v36 = vld [vmem:[%s6814_s1 + $0x710] sm:$0xf0]  ;;  %v3561_v50 = vor.u32 %v4386_v29, %v3558_v31  ;;  %v4249_v9 = vld [vmem:[%s6814_s1 + $0x1b4] sm:$0xf0]  ;;  %v3132_v10 = vld [vmem:[%s6814_s1 + $0x2a8] sm:$0xf]  ;;  %v2877_v14 = vor.u32 %v4217_v6, %v2876_v5 }
  0x7e   :  { %1803 = vmatpush.bf16.msrb.mxu3 %v3721_v16  ;;  %v3689_v53 = vor.u32 %v4418_v35, %v3686_v36  ;;  %v4281_v11 = vld [vmem:[%s6814_s1 + $0x2b4] sm:$0xf0]  ;;  %v3260_v12 = vld [vmem:[%s6814_s1 + $0x3a8] sm:$0xf]  ;;  %v3005_v15 = vor.u32 %v4249_v9, %v3004_v7 }
  0x7f   :  { %v4313_v13 = vld [vmem:[%s6814_s1 + $0x3b4] sm:$0xf0]  ;;  %v3133_v16 = vor.u32 %v4281_v11, %v3132_v10  ;;  %v2860_v17 = vld [vmem:[%s6814_s1 + $0x88] sm:$0xf] }
  0x80   :  { %1765 = vmatpush.bf16.msrb.mxu0 %v3321_v22  ;;  %v4213_v18 = vld [vmem:[%s6814_s1 + $0x94] sm:$0xf0]  ;;  %v2988_v19 = vld [vmem:[%s6814_s1 + $0x188] sm:$0xf]  ;;  %v3261_v20 = vor.u32 %v4313_v13, %v3260_v12 }
  0x81   :  { %1778 = vmatpush.bf16.msrb.mxu1 %v3449_v25  ;;  %1791 = vmatpush.bf16.msrb.mxu2 %v3577_v26  ;;  %v4245_v21 = vld [vmem:[%s6814_s1 + $0x194] sm:$0xf0]  ;;  %v3116_v22 = vld [vmem:[%s6814_s1 + $0x288] sm:$0xf]  ;;  %v2861_v26 = vor.u32 %v4213_v18, %v2860_v17 }
  0x82   :  { %1804 = vmatpush.bf16.msrb.mxu3 %v3705_v30  ;;  %v4277_v23 = vld [vmem:[%s6814_s1 + $0x294] sm:$0xf0]  ;;  %v3244_v24 = vld [vmem:[%s6814_s1 + $0x388] sm:$0xf]  ;;  %v2989_v27 = vor.u32 %v4245_v21, %v2988_v19 }
  0x83   :  { %v4309_v25 = vld [vmem:[%s6814_s1 + $0x394] sm:$0xf0]  ;;  %v3117_v28 = vor.u32 %v4277_v23, %v3116_v22  ;;  %v2844_v29 = vld [vmem:[%s6814_s1 + $0x68] sm:$0xf] }
  0x84   :  { %1766 = vmatpush.bf16.msrb.mxu0 %v3305_v45  ;;  %v4209_v30 = vld [vmem:[%s6814_s1 + $0x74] sm:$0xf0]  ;;  %v2972_v31 = vld [vmem:[%s6814_s1 + $0x168] sm:$0xf]  ;;  %v3245_v35 = vor.u32 %v4309_v25, %v3244_v24 }
  0x85   :  { %1779 = vmatpush.bf16.msrb.mxu1 %v3433_v49  ;;  %1792 = vmatpush.bf16.msrb.mxu2 %v3561_v50  ;;  %v4241_v36 = vld [vmem:[%s6814_s1 + $0x174] sm:$0xf0]  ;;  %v3100_v39 = vld [vmem:[%s6814_s1 + $0x268] sm:$0xf]  ;;  %v2845_v46 = vor.u32 %v4209_v30, %v2844_v29 }
  0x86   :  { %1805 = vmatpush.bf16.msrb.mxu3 %v3689_v53  ;;  %v4273_v43 = vld [vmem:[%s6814_s1 + $0x274] sm:$0xf0]  ;;  %v3228_v44 = vld [vmem:[%s6814_s1 + $0x368] sm:$0xf]  ;;  %v2973_v47 = vor.u32 %v4241_v36, %v2972_v31 }
  0x87   :  { %1767 = vmatmul.bf16.vlgmr.msrb.gmra.mxu0 %v5039_v37  ;;  %v4305_v45 = vld [vmem:[%s6814_s1 + $0x374] sm:$0xf0]  ;;  %v3101_v48 = vor.u32 %v4273_v43, %v3100_v39  ;;  %v2828_v49 = vld [vmem:[%s6814_s1 + $0x48] sm:$0xf] }
  0x88   :  { %1811 = vmatpush.bf16.msra.mxu0 %v2909_v54  ;;  %1793 = vmatmul.bf16.vlgmr.msrb.gmra.mxu2 %v5031_v32  ;;  %v4205_v50 = vld [vmem:[%s6814_s1 + $0x54] sm:$0xf0]  ;;  %v2956_v51 = vld [vmem:[%s6814_s1 + $0x148] sm:$0xf]  ;;  %v3229_v52 = vor.u32 %v4305_v45, %v3228_v44 }
  0x89   :  { %1824 = vmatpush.bf16.msra.mxu1 %v3037_v55  ;;  %1837 = vmatpush.bf16.msra.mxu2 %v3165_v56  ;;  %v4237_v53 = vld [vmem:[%s6814_s1 + $0x154] sm:$0xf0]  ;;  %v3084_v54 = vld [vmem:[%s6814_s1 + $0x248] sm:$0xf]  ;;  %v2829_v58 = vor.u32 %v4205_v50, %v2828_v49 }
  0x8a   :  { %1850 = vmatpush.bf16.msra.mxu3 %v3293_v60  ;;  %1780 = vmatmul.bf16.vlgmr.msrb.gmra.mxu1 %v5043_v40  ;;  %v4269_v55 = vld [vmem:[%s6814_s1 + $0x254] sm:$0xf0]  ;;  %v3212_v56 = vld [vmem:[%s6814_s1 + $0x348] sm:$0xf]  ;;  %v2957_v59 = vor.u32 %v4237_v53, %v2956_v51 }
  0x8b   :  { %1806 = vmatmul.bf16.vlgmr.msrb.gmra.mxu3 %v5041_v38  ;;  %v4301_v57 = vld [vmem:[%s6814_s1 + $0x354] sm:$0xf0]  ;;  %v3085_v60 = vor.u32 %v4269_v55, %v3084_v54  ;;  %v2812_v61 = vld [vmem:[%s6814_s1 + $0x28] sm:$0xf] }
  0x8c   :  { %1812 = vmatpush.bf16.msra.mxu0 %v2893_v2  ;;  %v4201_v62 = vld [vmem:[%s6814_s1 + $0x34] sm:$0xf0]  ;;  %v2940_v63 = vld [vmem:[%s6814_s1 + $0x128] sm:$0xf]  ;;  %v3213_v0 = vor.u32 %v4301_v57, %v3212_v56 }
  0x8d   :  { %1825 = vmatpush.bf16.msra.mxu1 %v3021_v3  ;;  %1838 = vmatpush.bf16.msra.mxu2 %v3149_v4  ;;  %v4233_v1 = vld [vmem:[%s6814_s1 + $0x134] sm:$0xf0]  ;;  %v3068_v2 = vld [vmem:[%s6814_s1 + $0x228] sm:$0xf]  ;;  %v2813_v6 = vor.u32 %v4201_v62, %v2812_v61 }
  0x8e   :  { %1851 = vmatpush.bf16.msra.mxu3 %v3277_v8  ;;  %v4265_v3 = vld [vmem:[%s6814_s1 + $0x234] sm:$0xf0]  ;;  %v3196_v4 = vld [vmem:[%s6814_s1 + $0x328] sm:$0xf]  ;;  %v2941_v9 = vor.u32 %v4233_v1, %v2940_v63 }
  0x8f   :  { %v4297_v5 = vld [vmem:[%s6814_s1 + $0x334] sm:$0xf0]  ;;  %v2796_v7 = vld [vmem:[%s6814_s1 + $0x8] sm:$0xf]  ;;  %v3069_v10 = vor.u32 %v4265_v3, %v3068_v2 }
  0x90   :  { %1813 = vmatpush.bf16.msra.mxu0 %v2877_v14  ;;  %v4197_v8 = vld [vmem:[%s6814_s1 + $0x14] sm:$0xf0]  ;;  %v2924_v11 = vld [vmem:[%s6814_s1 + $0x108] sm:$0xf]  ;;  %v3197_v14 = vor.u32 %v4297_v5, %v3196_v4 }
  0x91   :  { %1826 = vmatpush.bf16.msra.mxu1 %v3005_v15  ;;  %1839 = vmatpush.bf16.msra.mxu2 %v3133_v16  ;;  %v4229_v12 = vld [vmem:[%s6814_s1 + $0x114] sm:$0xf0]  ;;  %v3052_v13 = vld [vmem:[%s6814_s1 + $0x208] sm:$0xf]  ;;  %v2797_v21 = vor.u32 %v4197_v8, %v2796_v7 }
  0x92   :  { %1852 = vmatpush.bf16.msra.mxu3 %v3261_v20  ;;  %v4261_v15 = vld [vmem:[%s6814_s1 + $0x214] sm:$0xf0]  ;;  %v3180_v16 = vld [vmem:[%s6814_s1 + $0x308] sm:$0xf]  ;;  %v2925_v25 = vor.u32 %v4229_v12, %v2924_v11 }
  0x93   :  { %v4293_v17 = vld [vmem:[%s6814_s1 + $0x314] sm:$0xf0]  ;;  %v3420_v18 = vld [vmem:[%s6814_s1 + $0x4e8] sm:$0xf] }
  0x94   :  { %1814 = vmatpush.bf16.msra.mxu0 %v2861_v26  ;;  %v4353_v19 = vld [vmem:[%s6814_s1 + $0x4f4] sm:$0xf0]  ;;  %v3548_v20 = vld [vmem:[%s6814_s1 + $0x5e8] sm:$0xf]  ;;  %v3053_v26 = vor.u32 %v4261_v15, %v3052_v13  ;;  %v3181_v29 = vor.u32 %v4293_v17, %v3180_v16 }
  0x95   :  { %1827 = vmatpush.bf16.msra.mxu1 %v2989_v27  ;;  %1840 = vmatpush.bf16.msra.mxu2 %v3117_v28  ;;  %v4385_v22 = vld [vmem:[%s6814_s1 + $0x5f4] sm:$0xf0]  ;;  %v3676_v23 = vld [vmem:[%s6814_s1 + $0x6e8] sm:$0xf]  ;;  %v3421_v30 = vor.u32 %v4353_v19, %v3420_v18 }
  0x96   :  { %1853 = vmatpush.bf16.msra.mxu3 %v3245_v35  ;;  %v4417_v24 = vld [vmem:[%s6814_s1 + $0x6f4] sm:$0xf0]  ;;  %v3804_v27 = vld [vmem:[%s6814_s1 + $0x7e8] sm:$0xf]  ;;  %v3549_v31 = vor.u32 %v4385_v22, %v3548_v20 }
  0x97   :  { %v4449_v28 = vld [vmem:[%s6814_s1 + $0x7f4] sm:$0xf0]  ;;  %v3677_v35 = vor.u32 %v4417_v24, %v3676_v23  ;;  %v3404_v36 = vld [vmem:[%s6814_s1 + $0x4c8] sm:$0xf] }
  0x98   :  { %1815 = vmatpush.bf16.msra.mxu0 %v2845_v46  ;;  %v4349_v39 = vld [vmem:[%s6814_s1 + $0x4d4] sm:$0xf0]  ;;  %v3532_v43 = vld [vmem:[%s6814_s1 + $0x5c8] sm:$0xf]  ;;  %v3805_v44 = vor.u32 %v4449_v28, %v3804_v27 }
  0x99   :  { %1828 = vmatpush.bf16.msra.mxu1 %v2973_v47  ;;  %1841 = vmatpush.bf16.msra.mxu2 %v3101_v48  ;;  %v4381_v45 = vld [vmem:[%s6814_s1 + $0x5d4] sm:$0xf0]  ;;  %v3660_v46 = vld [vmem:[%s6814_s1 + $0x6c8] sm:$0xf]  ;;  %v3405_v50 = vor.u32 %v4349_v39, %v3404_v36 }
  0x9a   :  { %1854 = vmatpush.bf16.msra.mxu3 %v3229_v52  ;;  %v4413_v47 = vld [vmem:[%s6814_s1 + $0x6d4] sm:$0xf0]  ;;  %v3788_v48 = vld [vmem:[%s6814_s1 + $0x7c8] sm:$0xf]  ;;  %v3533_v51 = vor.u32 %v4381_v45, %v3532_v43 }
  0x9b   :  { %v4445_v49 = vld [vmem:[%s6814_s1 + $0x7d4] sm:$0xf0]  ;;  %v3661_v52 = vor.u32 %v4413_v47, %v3660_v46  ;;  %v3388_v53 = vld [vmem:[%s6814_s1 + $0x4a8] sm:$0xf] }
  0x9c   :  { %1816 = vmatpush.bf16.msra.mxu0 %v2829_v58  ;;  %v4345_v54 = vld [vmem:[%s6814_s1 + $0x4b4] sm:$0xf0]  ;;  %v3516_v55 = vld [vmem:[%s6814_s1 + $0x5a8] sm:$0xf]  ;;  %v3789_v56 = vor.u32 %v4445_v49, %v3788_v48 }
  0x9d   :  { %1829 = vmatpush.bf16.msra.mxu1 %v2957_v59  ;;  %1842 = vmatpush.bf16.msra.mxu2 %v3085_v60  ;;  %v4377_v57 = vld [vmem:[%s6814_s1 + $0x5b4] sm:$0xf0]  ;;  %v3644_v58 = vld [vmem:[%s6814_s1 + $0x6a8] sm:$0xf]  ;;  %v3389_v62 = vor.u32 %v4345_v54, %v3388_v53 }
  0x9e   :  { %1855 = vmatpush.bf16.msra.mxu3 %v3213_v0  ;;  %v4409_v59 = vld [vmem:[%s6814_s1 + $0x6b4] sm:$0xf0]  ;;  %v3772_v60 = vld [vmem:[%s6814_s1 + $0x7a8] sm:$0xf]  ;;  %v3517_v63 = vor.u32 %v4377_v57, %v3516_v55 }
  0x9f   :  { %v4441_v61 = vld [vmem:[%s6814_s1 + $0x7b4] sm:$0xf0]  ;;  %v3645_v0 = vor.u32 %v4409_v59, %v3644_v58  ;;  %v3372_v1 = vld [vmem:[%s6814_s1 + $0x488] sm:$0xf] }
  0xa0   :  { %1817 = vmatpush.bf16.msra.mxu0 %v2813_v6  ;;  %v4341_v2 = vld [vmem:[%s6814_s1 + $0x494] sm:$0xf0]  ;;  %v3500_v3 = vld [vmem:[%s6814_s1 + $0x588] sm:$0xf]  ;;  %v3773_v4 = vor.u32 %v4441_v61, %v3772_v60 }
  0xa1   :  { %1830 = vmatpush.bf16.msra.mxu1 %v2941_v9  ;;  %1843 = vmatpush.bf16.msra.mxu2 %v3069_v10  ;;  %v4373_v5 = vld [vmem:[%s6814_s1 + $0x594] sm:$0xf0]  ;;  %v3628_v6 = vld [vmem:[%s6814_s1 + $0x688] sm:$0xf]  ;;  %v3373_v10 = vor.u32 %v4341_v2, %v3372_v1 }
  0xa2   :  { %1856 = vmatpush.bf16.msra.mxu3 %v3197_v14  ;;  %v4405_v7 = vld [vmem:[%s6814_s1 + $0x694] sm:$0xf0]  ;;  %v3756_v8 = vld [vmem:[%s6814_s1 + $0x788] sm:$0xf]  ;;  %v3501_v11 = vor.u32 %v4373_v5, %v3500_v3 }
  0xa3   :  { %v4437_v9 = vld [vmem:[%s6814_s1 + $0x794] sm:$0xf0]  ;;  %v3629_v12 = vor.u32 %v4405_v7, %v3628_v6  ;;  %v3356_v13 = vld [vmem:[%s6814_s1 + $0x468] sm:$0xf]  ;;  %v4223_v6 = vld [vmem:[%s6814_s1 + $0xec] sm:$0xf] }
  0xa4   :  { %1818 = vmatpush.bf16.msra.mxu0 %v2797_v21  ;;  %v4337_v14 = vld [vmem:[%s6814_s1 + $0x474] sm:$0xf0]  ;;  %v3484_v15 = vld [vmem:[%s6814_s1 + $0x568] sm:$0xf]  ;;  %v3757_v16 = vor.u32 %v4437_v9, %v3756_v8  ;;  %v2910_v7 = vld [vmem:[%s6814_s1 + $0xf8] sm:$0xf0] }
  0xa5   :  { %1831 = vmatpush.bf16.msra.mxu1 %v2925_v25  ;;  %1844 = vmatpush.bf16.msra.mxu2 %v3053_v26  ;;  %v4369_v17 = vld [vmem:[%s6814_s1 + $0x574] sm:$0xf0]  ;;  %v3612_v18 = vld [vmem:[%s6814_s1 + $0x668] sm:$0xf]  ;;  %v3357_v22 = vor.u32 %v4337_v14, %v3356_v13  ;;  %v4255_v8 = vld [vmem:[%s6814_s1 + $0x1ec] sm:$0xf] }
  0xa6   :  { %1857 = vmatpush.bf16.msra.mxu3 %v3181_v29  ;;  %v4401_v19 = vld [vmem:[%s6814_s1 + $0x674] sm:$0xf0]  ;;  %v3740_v20 = vld [vmem:[%s6814_s1 + $0x768] sm:$0xf]  ;;  %v3485_v24 = vor.u32 %v4369_v17, %v3484_v15  ;;  %v3166_v13 = vld [vmem:[%s6814_s1 + $0x2f8] sm:$0xf0] }
  0xa7   :  { %1819 = vmatmul.bf16.vlgmr.msra.gmra.mxu0 %v4913_v34  ;;  %v4433_v21 = vld [vmem:[%s6814_s1 + $0x774] sm:$0xf0]  ;;  %v3340_v23 = vld [vmem:[%s6814_s1 + $0x448] sm:$0xf]  ;;  %v3613_v25 = vor.u32 %v4401_v19, %v3612_v18  ;;  %v4319_v17 = vld [vmem:[%s6814_s1 + $0x3ec] sm:$0xf] }
  0xa8   :  { %1863 = vmatpush.bf16.msrb.mxu0 %v3421_v30  ;;  %1845 = vmatmul.bf16.vlgmr.msra.gmra.mxu2 %v4911_v33  ;;  %v4333_v26 = vld [vmem:[%s6814_s1 + $0x454] sm:$0xf0]  ;;  %v3468_v27 = vld [vmem:[%s6814_s1 + $0x548] sm:$0xf]  ;;  %v3741_v29 = vor.u32 %v4433_v21, %v3740_v20  ;;  %v3294_v18 = vld [vmem:[%s6814_s1 + $0x3f8] sm:$0xf0]  ;;  %v2913_v20 = vor.u32 %v4223_v6, %v2910_v7 }
  0xa9   :  { %1876 = vmatpush.bf16.msrb.mxu1 %v3549_v31  ;;  %1889 = vmatpush.bf16.msrb.mxu2 %v3677_v35  ;;  %v4365_v28 = vld [vmem:[%s6814_s1 + $0x554] sm:$0xf0]  ;;  %v3596_v30 = vld [vmem:[%s6814_s1 + $0x648] sm:$0xf]  ;;  %v5730_v35 = vld [vmem:[%s6816_s2] sm:$0xf]  ;;  %v3341_v43 = vor.u32 %v4333_v26, %v3340_v23 }
  0xaa   :  { %1902 = vmatpush.bf16.msrb.mxu3 %v3805_v44  ;;  %1832 = vmatmul.bf16.vlgmr.msra.gmra.mxu1 %v4926_v42  ;;  %v4397_v31 = vld [vmem:[%s6814_s1 + $0x654] sm:$0xf0]  ;;  %v3724_v36 = vld [vmem:[%s6814_s1 + $0x748] sm:$0xf]  ;;  %v3469_v45 = vor.u32 %v4365_v28, %v3468_v27  ;;  %v315_v49 = vperm.slane %v5730_v35, 0 }
  0xab   :  { %1858 = vmatmul.bf16.vlgmr.msra.gmra.mxu3 %v4924_v41  ;;  %v4429_v39 = vld [vmem:[%s6814_s1 + $0x754] sm:$0xf0]  ;;  %v3324_v44 = vld [vmem:[%s6814_s1 + $0x428] sm:$0xf]  ;;  %v3597_v46 = vor.u32 %v4397_v31, %v3596_v30  ;;  %v4251_v26 = vld [vmem:[%s6814_s1 + $0x1cc] sm:$0xf] }
  0xac   :  { %1864 = vmatpush.bf16.msrb.mxu0 %v3405_v50  ;;  %v4329_v47 = vld [vmem:[%s6814_s1 + $0x434] sm:$0xf0]  ;;  %v3452_v48 = vld [vmem:[%s6814_s1 + $0x528] sm:$0xf]  ;;  %v3725_v50 = vor.u32 %v4429_v39, %v3724_v36  ;;  %v3022_v30 = vld [vmem:[%s6814_s1 + $0x1d8] sm:$0xf0] }
  0xad   :  { %1877 = vmatpush.bf16.msrb.mxu1 %v3533_v51  ;;  %1890 = vmatpush.bf16.msrb.mxu2 %v3661_v52  ;;  %v4361_v51 = vld [vmem:[%s6814_s1 + $0x534] sm:$0xf0]  ;;  %v3580_v52 = vld [vmem:[%s6814_s1 + $0x628] sm:$0xf]  ;;  %v4283_v31 = vld [vmem:[%s6814_s1 + $0x2cc] sm:$0xf] }
  0xae   :  { %1903 = vmatpush.bf16.msrb.mxu3 %v3789_v56  ;;  %v4393_v53 = vld [vmem:[%s6814_s1 + $0x634] sm:$0xf0]  ;;  %v3708_v54 = vld [vmem:[%s6814_s1 + $0x728] sm:$0xf]  ;;  %v3325_v56 = vor.u32 %v4329_v47, %v3324_v44  ;;  %v3453_v60 = vor.u32 %v4361_v51, %v3452_v48  ;;  %v3150_v36 = vld [vmem:[%s6814_s1 + $0x2d8] sm:$0xf0]  ;;  %v3025_v47 = vor.u32 %v4251_v26, %v3022_v30 }
  0xaf   :  { %v4425_v55 = vld [vmem:[%s6814_s1 + $0x734] sm:$0xf0]  ;;  %v3308_v57 = vld [vmem:[%s6814_s1 + $0x408] sm:$0xf]  ;;  %v3581_v61 = vor.u32 %v4393_v53, %v3580_v52  ;;  %v3278_v44 = vld [vmem:[%s6814_s1 + $0x3d8] sm:$0xf0]  ;;  %v3153_v48 = vor.u32 %v4283_v31, %v3150_v36 }
  0xb0   :  { %1865 = vmatpush.bf16.msrb.mxu0 %v3389_v62  ;;  %v4325_v58 = vld [vmem:[%s6814_s1 + $0x414] sm:$0xf0]  ;;  %v3436_v62 = vld [vmem:[%s6814_s1 + $0x508] sm:$0xf]  ;;  %v3709_v2 = vor.u32 %v4425_v55, %v3708_v54  ;;  %v4247_v51 = vld [vmem:[%s6814_s1 + $0x1ac] sm:$0xf] }
  0xb1   :  { %1878 = vmatpush.bf16.msrb.mxu1 %v3517_v63  ;;  %1891 = vmatpush.bf16.msrb.mxu2 %v3645_v0  ;;  %v4357_v63 = vld [vmem:[%s6814_s1 + $0x514] sm:$0xf0]  ;;  %v3564_v0 = vld [vmem:[%s6814_s1 + $0x608] sm:$0xf]  ;;  %v3006_v54 = vld [vmem:[%s6814_s1 + $0x1b8] sm:$0xf0] }
  0xb2   :  { %1904 = vmatpush.bf16.msrb.mxu3 %v3773_v4  ;;  %v4389_v3 = vld [vmem:[%s6814_s1 + $0x614] sm:$0xf0]  ;;  %v3692_v4 = vld [vmem:[%s6814_s1 + $0x708] sm:$0xf]  ;;  %v3437_v15 = vor.u32 %v4357_v63, %v3436_v62  ;;  %v4279_v55 = vld [vmem:[%s6814_s1 + $0x2ac] sm:$0xf] }
  0xb3   :  { %v4421_v5 = vld [vmem:[%s6814_s1 + $0x714] sm:$0xf0]  ;;  %v4211_v63 = vld [vmem:[%s6814_s1 + $0x8c] sm:$0xf]  ;;  %v3118_v6 = vld [vmem:[%s6814_s1 + $0x298] sm:$0xf0] }
  0xb4   :  { %1866 = vmatpush.bf16.msrb.mxu0 %v3373_v10  ;;  %v3309_v10 = vor.u32 %v4325_v58, %v3308_v57  ;;  %v3693_v19 = vor.u32 %v4421_v5, %v3692_v4  ;;  %v4311_v57 = vld [vmem:[%s6814_s1 + $0x3ac] sm:$0xf]  ;;  %v3262_v58 = vld [vmem:[%s6814_s1 + $0x3b8] sm:$0xf0] }
  0xb5   :  { %1879 = vmatpush.bf16.msrb.mxu1 %v3501_v11  ;;  %1892 = vmatpush.bf16.msrb.mxu2 %v3629_v12  ;;  %v3038_v11 = vld [vmem:[%s6814_s1 + $0x1f8] sm:$0xf0]  ;;  %v4287_v12 = vld [vmem:[%s6814_s1 + $0x2ec] sm:$0xf] }
  0xb6   :  { %1905 = vmatpush.bf16.msrb.mxu3 %v3757_v16  ;;  %v3565_v16 = vor.u32 %v4389_v3, %v3564_v0  ;;  %v3169_v23 = vor.u32 %v4287_v12, %v3166_v13  ;;  %v2862_v0 = vld [vmem:[%s6814_s1 + $0x98] sm:$0xf0]  ;;  %v3265_v3 = vor.u32 %v4311_v57, %v3262_v58  ;;  %v4275_v5 = vld [vmem:[%s6814_s1 + $0x28c] sm:$0xf] }
  0xb7   :  { %v2990_v4 = vld [vmem:[%s6814_s1 + $0x198] sm:$0xf0]  ;;  %v4307_v7 = vld [vmem:[%s6814_s1 + $0x38c] sm:$0xf]  ;;  %v3121_v12 = vor.u32 %v4275_v5, %v3118_v6 }
  0xb8   :  { %1867 = vmatpush.bf16.msrb.mxu0 %v3357_v22  ;;  %v1612_v59 = vpop.f32.mrf.mxu0  ;;  %v1625_v9 = vpop.f32.mrf.mxu1  ;;  %v3041_v22 = vor.u32 %v4255_v8, %v3038_v11  ;;  %v3246_v8 = vld [vmem:[%s6814_s1 + $0x398] sm:$0xf0]  ;;  %v4207_v13 = vld [vmem:[%s6814_s1 + $0x6c] sm:$0xf] }
  0xb9   :  { %1880 = vmatpush.bf16.msrb.mxu1 %v3485_v24  ;;  %1893 = vmatpush.bf16.msrb.mxu2 %v3613_v25  ;;  %v1613_v1 = vadd.f32 %v1612_v59, %v315_v49  ;;  %v4219_v24 = vld [vmem:[%s6814_s1 + $0xcc] sm:$0xf]  ;;  %v2894_v25 = vld [vmem:[%s6814_s1 + $0xd8] sm:$0xf0] }
  0xba   :  { %1906 = vmatpush.bf16.msrb.mxu3 %v3741_v29  ;;  %v3297_v29 = vor.u32 %v4319_v17, %v3294_v18  ;;  %v4215_v49 = vld [vmem:[%s6814_s1 + $0xac] sm:$0xf]  ;;  %v3249_v18 = vor.u32 %v4307_v7, %v3246_v8  ;;  %v2926_v6 = vld [vmem:[%s6814_s1 + $0x118] sm:$0xf0] }
  0xbb   :  { %v1626_v14 = vadd.f32 %v1625_v9, %v1613_v1  ;;  %v4243_v1 = vld [vmem:[%s6814_s1 + $0x18c] sm:$0xf]  ;;  %v2865_v9 = vor.u32 %v4211_v63, %v2862_v0  ;;  %v3198_v63 = vld [vmem:[%s6814_s1 + $0x338] sm:$0xf0] }
  0xbc   :  { %1868 = vmatpush.bf16.msrb.mxu0 %v3341_v43  ;;  %v1638_v21 = vpop.f32.mrf.mxu2  ;;  %v4315_v43 = vld [vmem:[%s6814_s1 + $0x3cc] sm:$0xf]  ;;  %v2993_v11 = vor.u32 %v4243_v1, %v2990_v4 }
  0xbd   :  { %1881 = vmatpush.bf16.msrb.mxu1 %v3469_v45  ;;  %1894 = vmatpush.bf16.msrb.mxu2 %v3597_v46  ;;  %v1639_v27 = vadd.f32 %v1638_v21, %v1626_v14  ;;  %v1651_v28 = vpop.f32.mrf.mxu3  ;;  %v2897_v46 = vor.u32 %v4219_v24, %v2894_v25  ;;  %v3281_v53 = vor.u32 %v4315_v43, %v3278_v44  ;;  %v2846_v14 = vld [vmem:[%s6814_s1 + $0x78] sm:$0xf0]  ;;  %v4235_v30 = vld [vmem:[%s6814_s1 + $0x14c] sm:$0xf] }
  0xbe   :  { %1907 = vmatpush.bf16.msrb.mxu3 %v3725_v50  ;;  %v2878_v50 = vld [vmem:[%s6814_s1 + $0xb8] sm:$0xf0]  ;;  %v2849_v25 = vor.u32 %v4207_v13, %v2846_v14  ;;  %v4267_v43 = vld [vmem:[%s6814_s1 + $0x24c] sm:$0xf] }
  0xbf   :  { %v1652_v45 = vadd.f32 %v1651_v28, %v1639_v27  ;;  %v2881_v59 = vor.u32 %v4215_v49, %v2878_v50  ;;  %v3102_v21 = vld [vmem:[%s6814_s1 + $0x278] sm:$0xf0]  ;;  %v4203_v28 = vld [vmem:[%s6814_s1 + $0x4c] sm:$0xf] }
  0xc0   :  { %1869 = vmatpush.bf16.msrb.mxu0 %v3325_v56  ;;  %v1614_v39 = vpop.f32.mrf.mxu0  ;;  %v1627_v52 = vpop.f32.mrf.mxu1  ;;  %v3134_v56 = vld [vmem:[%s6814_s1 + $0x2b8] sm:$0xf0]  ;;  %v4195_v1 = vld [vmem:[%s6814_s1 + $0xc] sm:$0xf] }
  0xc1   :  { %1882 = vmatpush.bf16.msrb.mxu1 %v3453_v60  ;;  %1895 = vmatpush.bf16.msrb.mxu2 %v3581_v61  ;;  %v3009_v61 = vor.u32 %v4247_v51, %v3006_v54  ;;  %v3137_v62 = vor.u32 %v4279_v55, %v3134_v56  ;;  %v2958_v39 = vld [vmem:[%s6814_s1 + $0x158] sm:$0xf0]  ;;  %v4199_v54 = vld [vmem:[%s6814_s1 + $0x2c] sm:$0xf] }
  0xc2   :  { %1908 = vmatpush.bf16.msrb.mxu3 %v3709_v2  ;;  %v3086_v44 = vld [vmem:[%s6814_s1 + $0x258] sm:$0xf0]  ;;  %v2961_v52 = vor.u32 %v4235_v30, %v2958_v39  ;;  %v4231_v56 = vld [vmem:[%s6814_s1 + $0x12c] sm:$0xf] }
  0xc3   :  { %v2814_v55 = vld [vmem:[%s6814_s1 + $0x38] sm:$0xf0]  ;;  %v4227_v5 = vld [vmem:[%s6814_s1 + $0x10c] sm:$0xf] }
  0xc4   :  { %1870 = vmatpush.bf16.msrb.mxu0 %v3309_v10  ;;  %v1640_v60 = vpop.f32.mrf.mxu2  ;;  %v2817_v0 = vor.u32 %v4199_v54, %v2814_v55  ;;  %v4259_v7 = vld [vmem:[%s6814_s1 + $0x20c] sm:$0xf]  ;;  %v3406_v30 = vld [vmem:[%s6814_s1 + $0x4d8] sm:$0xf0] }
  0xc5   :  { %1883 = vmatpush.bf16.msrb.mxu1 %v3437_v15  ;;  %1896 = vmatpush.bf16.msrb.mxu2 %v3565_v16  ;;  %v1653_v2 = vpop.f32.mrf.mxu3  ;;  %v4239_v15 = vld [vmem:[%s6814_s1 + $0x16c] sm:$0xf]  ;;  %v3534_v39 = vld [vmem:[%s6814_s1 + $0x5d8] sm:$0xf0] }
  0xc6   :  { %1909 = vmatpush.bf16.msrb.mxu3 %v3693_v19  ;;  %v2974_v19 = vld [vmem:[%s6814_s1 + $0x178] sm:$0xf0]  ;;  %v4263_v60 = vld [vmem:[%s6814_s1 + $0x22c] sm:$0xf] }
  0xc7   :  { %1871 = vmatmul.bf16.vlgmr.msrb.gmra.mxu0 %v5039_v37  ;;  %v2977_v26 = vor.u32 %v4239_v15, %v2974_v19  ;;  %v2798_v2 = vld [vmem:[%s6814_s1 + $0x18] sm:$0xf0]  ;;  %v4351_v14 = vld [vmem:[%s6814_s1 + $0x4ec] sm:$0xf] }
  0xc8   :  { %1915 = vmatpush.bf16.msra.mxu0 %v2913_v20  ;;  %1897 = vmatmul.bf16.vlgmr.msrb.gmra.mxu2 %v5031_v32  ;;  %v1664_v10 = vpop.f32.mrf.mxu0  ;;  %v4271_v20 = vld [vmem:[%s6814_s1 + $0x26c] sm:$0xf]  ;;  %v3422_v15 = vld [vmem:[%s6814_s1 + $0x4f8] sm:$0xf0] }
  0xc9   :  { %1928 = vmatpush.bf16.msra.mxu1 %v3041_v22  ;;  %1941 = vmatpush.bf16.msra.mxu2 %v3169_v23  ;;  %v1665_v16 = vadd.f32 %v1664_v10, %v1652_v45  ;;  %v1677_v17 = vpop.f32.mrf.mxu1  ;;  %v4303_v22 = vld [vmem:[%s6814_s1 + $0x36c] sm:$0xf]  ;;  %v3230_v23 = vld [vmem:[%s6814_s1 + $0x378] sm:$0xf0]  ;;  %v3105_v27 = vor.u32 %v4271_v20, %v3102_v21  ;;  %v2929_v21 = vor.u32 %v4227_v5, %v2926_v6 }
  0xca   :  { %1954 = vmatpush.bf16.msra.mxu3 %v3297_v29  ;;  %1884 = vmatmul.bf16.vlgmr.msrb.gmra.mxu1 %v5043_v40  ;;  %v2830_v29 = vld [vmem:[%s6814_s1 + $0x58] sm:$0xf0]  ;;  %v3233_v36 = vor.u32 %v4303_v22, %v3230_v23  ;;  %v4415_v19 = vld [vmem:[%s6814_s1 + $0x6ec] sm:$0xf] }
  0xcb   :  { %1910 = vmatmul.bf16.vlgmr.msrb.gmra.mxu3 %v5041_v38  ;;  %v1678_v24 = vadd.f32 %v1677_v17, %v1665_v16  ;;  %v2833_v49 = vor.u32 %v4203_v28, %v2830_v29  ;;  %v3054_v10 = vld [vmem:[%s6814_s1 + $0x218] sm:$0xf0]  ;;  %v4383_v16 = vld [vmem:[%s6814_s1 + $0x5ec] sm:$0xf]  ;;  %v2801_v17 = vor.u32 %v4195_v1, %v2798_v2 }
  0xcc   :  { %1916 = vmatpush.bf16.msra.mxu0 %v2897_v46  ;;  %v3678_v20 = vld [vmem:[%s6814_s1 + $0x6f8] sm:$0xf0]  ;;  %v3057_v22 = vor.u32 %v4259_v7, %v3054_v10  ;;  %v4447_v23 = vld [vmem:[%s6814_s1 + $0x7ec] sm:$0xf] }
  0xcd   :  { %1929 = vmatpush.bf16.msra.mxu1 %v3025_v47  ;;  %1942 = vmatpush.bf16.msra.mxu2 %v3153_v48  ;;  %v1690_v31 = vpop.f32.mrf.mxu2  ;;  %v4299_v47 = vld [vmem:[%s6814_s1 + $0x34c] sm:$0xf]  ;;  %v3214_v48 = vld [vmem:[%s6814_s1 + $0x358] sm:$0xf0]  ;;  %v3681_v28 = vor.u32 %v4415_v19, %v3678_v20 }
  0xce   :  { %1955 = vmatpush.bf16.msra.mxu3 %v3281_v53  ;;  %v1691_v45 = vadd.f32 %v1690_v31, %v1678_v24  ;;  %v1703_v46 = vpop.f32.mrf.mxu3  ;;  %v3089_v53 = vor.u32 %v4267_v43, %v3086_v44  ;;  %v3217_v58 = vor.u32 %v4299_v47, %v3214_v48  ;;  %v3806_v24 = vld [vmem:[%s6814_s1 + $0x7f8] sm:$0xf0]  ;;  %v4347_v29 = vld [vmem:[%s6814_s1 + $0x4cc] sm:$0xf] }
  0xcf   :  { %v4379_v31 = vld [vmem:[%s6814_s1 + $0x5cc] sm:$0xf]  ;;  %v3662_v44 = vld [vmem:[%s6814_s1 + $0x6d8] sm:$0xf0]  ;;  %v3409_v47 = vor.u32 %v4347_v29, %v3406_v30 }
  0xd0   :  { %1917 = vmatpush.bf16.msra.mxu0 %v2881_v59  ;;  %v5935_v50 = vadd.f32 %v1703_v46, %v1691_v45  ;;  %v1666_v51 = vpop.f32.mrf.mxu0  ;;  %v2942_v59 = vld [vmem:[%s6814_s1 + $0x138] sm:$0xf0]  ;;  %v4411_v43 = vld [vmem:[%s6814_s1 + $0x6cc] sm:$0xf]  ;;  %v3537_v48 = vor.u32 %v4379_v31, %v3534_v39 }
  0xd1   :  { %1930 = vmatpush.bf16.msra.mxu1 %v3009_v61  ;;  %1943 = vmatpush.bf16.msra.mxu2 %v3137_v62  ;;  %v1679_v57 = vpop.f32.mrf.mxu1  ;;  %v3070_v61 = vld [vmem:[%s6814_s1 + $0x238] sm:$0xf0]  ;;  %v4295_v62 = vld [vmem:[%s6814_s1 + $0x32c] sm:$0xf] }
  0xd2   :  { %1956 = vmatpush.bf16.msra.mxu3 %v3265_v3  ;;  %v2945_v3 = vor.u32 %v4231_v56, %v2942_v59  ;;  %v3073_v4 = vor.u32 %v4263_v60, %v3070_v61  ;;  %v4443_v45 = vld [vmem:[%s6814_s1 + $0x7cc] sm:$0xf]  ;;  %v3790_v46 = vld [vmem:[%s6814_s1 + $0x7d8] sm:$0xf0] }
  0xd3   :  { %v4343_v51 = vld [vmem:[%s6814_s1 + $0x4ac] sm:$0xf]  ;;  %v3793_v54 = vor.u32 %v4443_v45, %v3790_v46  ;;  %v3518_v55 = vld [vmem:[%s6814_s1 + $0x5b8] sm:$0xf0] }
  0xd4   :  { %1918 = vmatpush.bf16.msra.mxu0 %v2865_v9  ;;  %v3201_v9 = vor.u32 %v4295_v62, %v3198_v63  ;;  %v4407_v56 = vld [vmem:[%s6814_s1 + $0x6ac] sm:$0xf]  ;;  %v3646_v57 = vld [vmem:[%s6814_s1 + $0x6b8] sm:$0xf0] }
  0xd5   :  { %1931 = vmatpush.bf16.msra.mxu1 %v2993_v11  ;;  %1944 = vmatpush.bf16.msra.mxu2 %v3121_v12  ;;  %v1692_v8 = vpop.f32.mrf.mxu2  ;;  %v4291_v11 = vld [vmem:[%s6814_s1 + $0x30c] sm:$0xf]  ;;  %v3182_v12 = vld [vmem:[%s6814_s1 + $0x318] sm:$0xf0]  ;;  %v3649_v61 = vor.u32 %v4407_v56, %v3646_v57  ;;  %v316_v56 = vperm.slane %v5730_v35, 1 }
  0xd6   :  { %1957 = vmatpush.bf16.msra.mxu3 %v3249_v18  ;;  %v1705_v13 = vpop.f32.mrf.mxu3  ;;  %v3550_v18 = vld [vmem:[%s6814_s1 + $0x5f8] sm:$0xf0]  ;;  %v4339_v62 = vld [vmem:[%s6814_s1 + $0x48c] sm:$0xf] }
  0xd7   :  { %v3374_v63 = vld [vmem:[%s6814_s1 + $0x498] sm:$0xf0]  ;;  %v4435_v2 = vld [vmem:[%s6814_s1 + $0x78c] sm:$0xf] }
  0xd8   :  { %1919 = vmatpush.bf16.msra.mxu0 %v2849_v25  ;;  %v3185_v25 = vor.u32 %v4291_v11, %v3182_v12  ;;  %v3630_v1 = vld [vmem:[%s6814_s1 + $0x698] sm:$0xf0]  ;;  %v4335_v8 = vld [vmem:[%s6814_s1 + $0x46c] sm:$0xf] }
  0xd9   :  { %1932 = vmatpush.bf16.msra.mxu1 %v2977_v26  ;;  %1945 = vmatpush.bf16.msra.mxu2 %v3105_v27  ;;  %v3425_v26 = vor.u32 %v4351_v14, %v3422_v15  ;;  %v3553_v27 = vor.u32 %v4383_v16, %v3550_v18  ;;  %v4367_v10 = vld [vmem:[%s6814_s1 + $0x56c] sm:$0xf]  ;;  %v3486_v13 = vld [vmem:[%s6814_s1 + $0x578] sm:$0xf0] }
  0xda   :  { %1958 = vmatpush.bf16.msra.mxu3 %v3233_v36  ;;  %v3809_v36 = vor.u32 %v4447_v23, %v3806_v24  ;;  %v4399_v14 = vld [vmem:[%s6814_s1 + $0x66c] sm:$0xf]  ;;  %v3614_v15 = vld [vmem:[%s6814_s1 + $0x678] sm:$0xf0]  ;;  %v3489_v19 = vor.u32 %v4367_v10, %v3486_v13 }
  0xdb   :  { %v4431_v16 = vld [vmem:[%s6814_s1 + $0x76c] sm:$0xf]  ;;  %v3617_v20 = vor.u32 %v4399_v14, %v3614_v15  ;;  %v3726_v31 = vld [vmem:[%s6814_s1 + $0x758] sm:$0xf0]  ;;  %v3860_v15 = vld [vmem:[%s6817_s3 + $0x60] sm:$0xf] }
  0xdc   :  { %1920 = vmatpush.bf16.msra.mxu0 %v2833_v49  ;;  %v3665_v49 = vor.u32 %v4411_v43, %v3662_v44  ;;  %v4363_v23 = vld [vmem:[%s6814_s1 + $0x54c] sm:$0xf]  ;;  %v3326_v46 = vld [vmem:[%s6814_s1 + $0x438] sm:$0xf0] }
  0xdd   :  { %1933 = vmatpush.bf16.msra.mxu1 %v2961_v52  ;;  %1946 = vmatpush.bf16.msra.mxu2 %v3089_v53  ;;  %v3390_v52 = vld [vmem:[%s6814_s1 + $0x4b8] sm:$0xf0]  ;;  %v4375_v53 = vld [vmem:[%s6814_s1 + $0x5ac] sm:$0xf] }
  0xde   :  { %1959 = vmatpush.bf16.msra.mxu3 %v3217_v58  ;;  %v4439_v58 = vld [vmem:[%s6814_s1 + $0x7ac] sm:$0xf]  ;;  %v3393_v59 = vor.u32 %v4343_v51, %v3390_v52  ;;  %v3521_v60 = vor.u32 %v4375_v53, %v3518_v55  ;;  %v3454_v51 = vld [vmem:[%s6814_s1 + $0x538] sm:$0xf0] }
  0xdf   :  { %v4427_v30 = vld [vmem:[%s6814_s1 + $0x74c] sm:$0xf]  ;;  %v3582_v53 = vld [vmem:[%s6814_s1 + $0x638] sm:$0xf0] }
  0xe0   :  { %1921 = vmatpush.bf16.msra.mxu0 %v2817_v0  ;;  %v4403_v0 = vld [vmem:[%s6814_s1 + $0x68c] sm:$0xf]  ;;  %v3710_v55 = vld [vmem:[%s6814_s1 + $0x738] sm:$0xf0] }
  0xe1   :  { %1934 = vmatpush.bf16.msra.mxu1 %v2945_v3  ;;  %1947 = vmatpush.bf16.msra.mxu2 %v3073_v4  ;;  %v3758_v3 = vld [vmem:[%s6814_s1 + $0x798] sm:$0xf0]  ;;  %v3377_v4 = vor.u32 %v4339_v62, %v3374_v63  ;;  %v3633_v7 = vor.u32 %v4403_v0, %v3630_v1  ;;  %v4327_v45 = vld [vmem:[%s6814_s1 + $0x42c] sm:$0xf] }
  0xe2   :  { %1960 = vmatpush.bf16.msra.mxu3 %v3201_v9  ;;  %v3358_v9 = vld [vmem:[%s6814_s1 + $0x478] sm:$0xf0]  ;;  %v3761_v12 = vor.u32 %v4435_v2, %v3758_v3  ;;  %v4391_v52 = vld [vmem:[%s6814_s1 + $0x62c] sm:$0xf]  ;;  %v3329_v57 = vor.u32 %v4327_v45, %v3326_v46  ;;  %v3868_v2 = vld [vmem:[%s6817_s3 + $0x70] sm:$0xf] }
  0xe3   :  { %v3361_v18 = vor.u32 %v4335_v8, %v3358_v9  ;;  %v3438_v35 = vld [vmem:[%s6814_s1 + $0x518] sm:$0xf0]  ;;  %v4465_v3 = vld [vmem:[%s6817_s3 + $0x74] sm:$0xf0]  ;;  %v3900_v45 = vld [vmem:[%s6817_s3 + $0xb0] sm:$0xf] }
  0xe4   :  { %1922 = vmatpush.bf16.msra.mxu0 %v2801_v17  ;;  %v6085_v5 = vpop.f32.mrf.mxu0  ;;  %v3742_v17 = vld [vmem:[%s6814_s1 + $0x778] sm:$0xf0]  ;;  %v4481_v8 = vld [vmem:[%s6817_s3 + $0xf4] sm:$0xf0]  ;;  %v3869_v13 = vor.u32 %v4465_v3, %v3868_v2  ;;  %v3884_v2 = vld [vmem:[%s6817_s3 + $0x90] sm:$0xf] }
  0xe5   :  { %1935 = vmatpush.bf16.msra.mxu1 %v2929_v21  ;;  %1948 = vmatpush.bf16.msra.mxu2 %v3057_v22  ;;  %v4331_v21 = vld [vmem:[%s6814_s1 + $0x44c] sm:$0xf]  ;;  %v3342_v22 = vld [vmem:[%s6814_s1 + $0x458] sm:$0xf0] }
  0xe6   :  { %1961 = vmatpush.bf16.msra.mxu3 %v3185_v25  ;;  %v3745_v25 = vor.u32 %v4431_v16, %v3742_v17  ;;  %v3694_v1 = vld [vmem:[%s6814_s1 + $0x718] sm:$0xf0]  ;;  %v4463_v16 = vld [vmem:[%s6817_s3 + $0x64] sm:$0xf0]  ;;  %v3924_v17 = vld [vmem:[%s6817_s3 + $0xe0] sm:$0xf] }
  0xe7   :  { %1923 = vmatmul.bf16.vlgmr.msra.gmra.mxu0 %v4913_v34  ;;  %v4371_v34 = vld [vmem:[%s6814_s1 + $0x58c] sm:$0xf]  ;;  %v6096_v11 = vpop.f32.mrf.mxu1 }
  0xe8   :  { %1967 = vmatpush.bf16.msrb.mxu0 %v3425_v26  ;;  %1949 = vmatmul.bf16.vlgmr.msra.gmra.mxu2 %v4911_v33  ;;  %v3774_v33 = vld [vmem:[%s6814_s1 + $0x7b8] sm:$0xf0] }
  0xe9   :  { %1980 = vmatpush.bf16.msrb.mxu1 %v3553_v27  ;;  %1993 = vmatpush.bf16.msrb.mxu2 %v3681_v28  ;;  %v3470_v26 = vld [vmem:[%s6814_s1 + $0x558] sm:$0xf0]  ;;  %v4395_v27 = vld [vmem:[%s6814_s1 + $0x64c] sm:$0xf] }
  0xea   :  { %2006 = vmatpush.bf16.msrb.mxu3 %v3809_v36  ;;  %1936 = vmatmul.bf16.vlgmr.msra.gmra.mxu1 %v4926_v42  ;;  %v3502_v42 = vld [vmem:[%s6814_s1 + $0x598] sm:$0xf0]  ;;  %v3345_v36 = vor.u32 %v4331_v21, %v3342_v22  ;;  %v3473_v43 = vor.u32 %v4363_v23, %v3470_v26  ;;  %v3852_v21 = vld [vmem:[%s6817_s3 + $0x50] sm:$0xf]  ;;  %v4461_v22 = vld [vmem:[%s6817_s3 + $0x54] sm:$0xf0] }
  0xeb   :  { %1962 = vmatmul.bf16.vlgmr.msra.gmra.mxu3 %v4924_v41  ;;  %v3777_v41 = vor.u32 %v4439_v58, %v3774_v33  ;;  %v3505_v6 = vor.u32 %v4371_v34, %v3502_v42  ;;  %v6122_v24 = vpop.f32.mrf.mxu2  ;;  %v3598_v28 = vld [vmem:[%s6814_s1 + $0x658] sm:$0xf0]  ;;  %v4323_v58 = vld [vmem:[%s6814_s1 + $0x40c] sm:$0xf]  ;;  %v3916_v23 = vld [vmem:[%s6817_s3 + $0xd0] sm:$0xf] }
  0xec   :  { %1968 = vmatpush.bf16.msrb.mxu0 %v3409_v47  ;;  %v1718_v39 = vpop.f32.mrf.mxu0  ;;  %v3601_v44 = vor.u32 %v4395_v27, %v3598_v28  ;;  %v4359_v47 = vld [vmem:[%s6814_s1 + $0x52c] sm:$0xf]  ;;  %v3908_v27 = vld [vmem:[%s6817_s3 + $0xc0] sm:$0xf]  ;;  %v3996_v28 = vld [vmem:[%s6817_s3 + $0x170] sm:$0xf] }
  0xed   :  { %1981 = vmatpush.bf16.msrb.mxu1 %v3537_v48  ;;  %1994 = vmatpush.bf16.msrb.mxu2 %v3665_v49  ;;  %v3729_v49 = vor.u32 %v4427_v30, %v3726_v31  ;;  %v3457_v33 = vor.u32 %v4359_v47, %v3454_v51  ;;  %v4387_v34 = vld [vmem:[%s6814_s1 + $0x60c] sm:$0xf]  ;;  %v4495_v51 = vld [vmem:[%s6817_s3 + $0x164] sm:$0xf0] }
  0xee   :  { %2007 = vmatpush.bf16.msrb.mxu3 %v3793_v54  ;;  %v6133_v29 = vpop.f32.mrf.mxu3  ;;  %v4423_v54 = vld [vmem:[%s6814_s1 + $0x72c] sm:$0xf] }
  0xef   :  { %v1731_v48 = vpop.f32.mrf.mxu1  ;;  %v3713_v63 = vor.u32 %v4423_v54, %v3710_v55  ;;  %v4419_v42 = vld [vmem:[%s6814_s1 + $0x70c] sm:$0xf] }
  0xf0   :  { %1969 = vmatpush.bf16.msrb.mxu0 %v3393_v59  ;;  %v3585_v59 = vor.u32 %v4391_v52, %v3582_v53  ;;  %v4473_v48 = vld [vmem:[%s6817_s3 + $0xb4] sm:$0xf0] }
  0xf1   :  { %1982 = vmatpush.bf16.msrb.mxu1 %v3521_v60  ;;  %1995 = vmatpush.bf16.msrb.mxu2 %v3649_v61  ;;  %v3310_v60 = vld [vmem:[%s6814_s1 + $0x418] sm:$0xf0]  ;;  %v4355_v61 = vld [vmem:[%s6814_s1 + $0x50c] sm:$0xf]  ;;  %v3901_v55 = vor.u32 %v4473_v48, %v3900_v45  ;;  %v4485_v45 = vld [vmem:[%s6817_s3 + $0x114] sm:$0xf0] }
  0xf2   :  { %2008 = vmatpush.bf16.msrb.mxu3 %v3777_v41  ;;  %v3566_v41 = vld [vmem:[%s6814_s1 + $0x618] sm:$0xf0]  ;;  %v3441_v9 = vor.u32 %v4355_v61, %v3438_v35  ;;  %v3980_v61 = vld [vmem:[%s6817_s3 + $0x150] sm:$0xf]  ;;  %v4493_v35 = vld [vmem:[%s6817_s3 + $0x154] sm:$0xf0] }
  0xf3   :  { %v1744_v62 = vpop.f32.mrf.mxu2  ;;  %v3569_v10 = vor.u32 %v4387_v34, %v3566_v41  ;;  %v3854_v48 = vld [vmem:[%s6817_s3 + $0x58] sm:$0xf0] }
  0xf4   :  { %1970 = vmatpush.bf16.msrb.mxu0 %v3377_v4  ;;  %v1717_v4 = vadd.f32 %v6085_v5, %v316_v56  ;;  %v3828_v56 = vld [vmem:[%s6817_s3 + $0x20] sm:$0xf]  ;;  %v3981_v62 = vor.u32 %v4493_v35, %v3980_v61  ;;  %v4474_v61 = vld [vmem:[%s6817_s3 + $0xc4] sm:$0xf]  ;;  %v3910_v35 = vld [vmem:[%s6817_s3 + $0xc8] sm:$0xf0] }
  0xf5   :  { %1983 = vmatpush.bf16.msrb.mxu1 %v3505_v6  ;;  %1996 = vmatpush.bf16.msrb.mxu2 %v3633_v7  ;;  %v3313_v6 = vor.u32 %v4323_v58, %v3310_v60  ;;  %v3932_v7 = vld [vmem:[%s6817_s3 + $0xf0] sm:$0xf]  ;;  %v3892_v58 = vld [vmem:[%s6817_s3 + $0xa0] sm:$0xf] }
  0xf6   :  { %2009 = vmatpush.bf16.msrb.mxu3 %v3761_v12  ;;  %v1757_v0 = vpop.f32.mrf.mxu3  ;;  %v3697_v12 = vor.u32 %v4419_v42, %v3694_v1  ;;  %v3933_v14 = vor.u32 %v4481_v8, %v3932_v7  ;;  %v1730_v5 = vadd.f32 %v6096_v11, %v1717_v4  ;;  %v3861_v11 = vor.u32 %v4463_v16, %v3860_v15  ;;  %v4453_v1 = vld [vmem:[%s6817_s3 + $0x14] sm:$0xf0]  ;;  %v4491_v7 = vld [vmem:[%s6817_s3 + $0x144] sm:$0xf0]  ;;  %v4464_v16 = vld [vmem:[%s6817_s3 + $0x74] sm:$0xf] }
  0xf7   :  { %v3820_v0 = vld [vmem:[%s6817_s3 + $0x10] sm:$0xf]  ;;  %v4469_v4 = vld [vmem:[%s6817_s3 + $0x94] sm:$0xf0]  ;;  %v4467_v15 = vld [vmem:[%s6817_s3 + $0x84] sm:$0xf0] }
  0xf8   :  { %1971 = vmatpush.bf16.msrb.mxu0 %v3361_v18  ;;  %v4479_v18 = vld [vmem:[%s6817_s3 + $0xe4] sm:$0xf0] }
  0xf9   :  { %1984 = vmatpush.bf16.msrb.mxu1 %v3489_v19  ;;  %1997 = vmatpush.bf16.msrb.mxu2 %v3617_v20  ;;  %v3925_v19 = vor.u32 %v4479_v18, %v3924_v17  ;;  %v1743_v20 = vadd.f32 %v6122_v24, %v1730_v5  ;;  %v3853_v24 = vor.u32 %v4461_v22, %v3852_v21  ;;  %v3876_v5 = vld [vmem:[%s6817_s3 + $0x80] sm:$0xf]  ;;  %v3870_v18 = vld [vmem:[%s6817_s3 + $0x78] sm:$0xf0]  ;;  %v4480_v21 = vld [vmem:[%s6817_s3 + $0xf4] sm:$0xf] }
  0xfa   :  { %2010 = vmatpush.bf16.msrb.mxu3 %v3745_v25  ;;  %v3934_v22 = vld [vmem:[%s6817_s3 + $0xf8] sm:$0xf0] }
  0xfb   :  { %v1756_v25 = vadd.f32 %v6133_v29, %v1743_v20  ;;  %v4497_v29 = vld [vmem:[%s6817_s3 + $0x174] sm:$0xf0] }
  0xfc   :  { %1972 = vmatpush.bf16.msrb.mxu0 %v3345_v36  ;;  %v3997_v30 = vor.u32 %v4497_v29, %v3996_v28  ;;  %v4489_v20 = vld [vmem:[%s6817_s3 + $0x134] sm:$0xf0]  ;;  %v3956_v28 = vld [vmem:[%s6817_s3 + $0x120] sm:$0xf]  ;;  %v4478_v29 = vld [vmem:[%s6817_s3 + $0xe4] sm:$0xf] }
  0xfd   :  { %1985 = vmatpush.bf16.msrb.mxu1 %v3473_v43  ;;  %1998 = vmatpush.bf16.msrb.mxu2 %v3601_v44  ;;  %v3836_v43 = vld [vmem:[%s6817_s3 + $0x30] sm:$0xf]  ;;  %v4457_v44 = vld [vmem:[%s6817_s3 + $0x34] sm:$0xf0] }
  0xfe   :  { %2011 = vmatpush.bf16.msrb.mxu3 %v3729_v49  ;;  %v3988_v49 = vld [vmem:[%s6817_s3 + $0x160] sm:$0xf]  ;;  %v3837_v53 = vor.u32 %v4457_v44, %v3836_v43  ;;  %v3948_v44 = vld [vmem:[%s6817_s3 + $0x110] sm:$0xf] }
  0xff   :  { %v3989_v52 = vor.u32 %v4495_v51, %v3988_v49  ;;  %v4476_v49 = vld [vmem:[%s6817_s3 + $0xd4] sm:$0xf]  ;;  %v3949_v51 = vor.u32 %v4485_v45, %v3948_v44  ;;  %v3878_v44 = vld [vmem:[%s6817_s3 + $0x88] sm:$0xf0] }
 0x100   :  { %1973 = vmatpush.bf16.msrb.mxu0 %v3329_v57  ;;  %v4455_v57 = vld [vmem:[%s6817_s3 + $0x24] sm:$0xf0] }
 0x101   :  { %1986 = vmatpush.bf16.msrb.mxu1 %v3457_v33  ;;  %1999 = vmatpush.bf16.msrb.mxu2 %v3585_v59  ;;  %v4471_v59 = vld [vmem:[%s6817_s3 + $0xa4] sm:$0xf0] }
 0x102   :  { %2012 = vmatpush.bf16.msrb.mxu3 %v3713_v63  ;;  %v3829_v63 = vor.u32 %v4455_v57, %v3828_v56  ;;  %v3893_v42 = vor.u32 %v4471_v59, %v3892_v58  ;;  %v3998_v56 = vld [vmem:[%s6817_s3 + $0x178] sm:$0xf0]  ;;  %v3846_v59 = vld [vmem:[%s6817_s3 + $0x48] sm:$0xf0] }
 0x104   :  { %1974 = vmatpush.bf16.msrb.mxu0 %v3313_v6  ;;  %v1768_v36 = vpop.f32.mrf.mxu0  ;;  %v3972_v6 = vld [vmem:[%s6817_s3 + $0x140] sm:$0xf] }
 0x105   :  { %1987 = vmatpush.bf16.msrb.mxu1 %v3441_v9  ;;  %2000 = vmatpush.bf16.msrb.mxu2 %v3569_v10  ;;  %v1769_v46 = vadd.f32 %v1768_v36, %v1756_v25  ;;  %v3973_v8 = vor.u32 %v4491_v7, %v3972_v6  ;;  %v3821_v10 = vor.u32 %v4453_v1, %v3820_v0  ;;  %v2019_v25 = vmax.f32 %v5935_v50, 0.0  ;;  %v4487_v50 = vld [vmem:[%s6817_s3 + $0x124] sm:$0xf0]  ;;  %v4472_v0 = vld [vmem:[%s6817_s3 + $0xb4] sm:$0xf] }
 0x106   :  { %2013 = vmatpush.bf16.msrb.mxu3 %v3697_v12  ;;  %v3812_v12 = vld [vmem:[%s6817_s3] sm:$0xf]  ;;  %v3990_v6 = vld [vmem:[%s6817_s3 + $0x168] sm:$0xf0] }
 0x107   :  { %1975 = vmatmul.bf16.vlgmr.msrb.gmra.mxu0 %v5039_v37  ;;  %v4477_v37 = vld [vmem:[%s6817_s3 + $0xd4] sm:$0xf0]  ;;  %v1781_v47 = vpop.f32.mrf.mxu1 }
 0x108   :  { %2417 = vmatpush.bf16.msra.mxu0 %v3869_v13  ;;  %1988 = vmatmul.bf16.vlgmr.msrb.gmra.mxu1 %v5043_v40  ;;  %v3917_v26 = vor.u32 %v4477_v37, %v3916_v23  ;;  %v4459_v40 = vld [vmem:[%s6817_s3 + $0x44] sm:$0xf0]  ;;  %v1782_v54 = vadd.f32 %v1781_v47, %v1769_v46  ;;  %v4460_v47 = vld [vmem:[%s6817_s3 + $0x54] sm:$0xf] }
 0x109   :  { %2430 = vmatpush.bf16.msra.mxu1 %v3933_v14  ;;  %2001 = vmatmul.bf16.vlgmr.msrb.gmra.mxu2 %v5031_v32  ;;  %v3844_v32 = vld [vmem:[%s6817_s3 + $0x40] sm:$0xf]  ;;  %v4451_v13 = vld [vmem:[%s6817_s3 + $0x4] sm:$0xf0]  ;;  %v3885_v14 = vor.u32 %v4469_v4, %v3884_v2  ;;  %v3857_v57 = vor.u32 %v4460_v47, %v3854_v48  ;;  %v3902_v2 = vld [vmem:[%s6817_s3 + $0xb8] sm:$0xf0] }
 0x10a   :  { %2014 = vmatmul.bf16.vlgmr.msrb.gmra.mxu3 %v5041_v38  ;;  %v4475_v38 = vld [vmem:[%s6817_s3 + $0xc4] sm:$0xf0]  ;;  %v3845_v31 = vor.u32 %v4459_v40, %v3844_v32  ;;  %2443 = vmatpush.bf16.msra.mxu2 %v3997_v30  ;;  %v3873_v32 = vor.u32 %v4464_v16, %v3870_v18  ;;  %v4462_v40 = vld [vmem:[%s6817_s3 + $0x64] sm:$0xf]  ;;  %v3926_v30 = vld [vmem:[%s6817_s3 + $0xe8] sm:$0xf0] }
 0x10b   :  { %v3909_v39 = vor.u32 %v4475_v38, %v3908_v27  ;;  %v1794_v33 = vpop.f32.mrf.mxu2  ;;  %v3937_v27 = vor.u32 %v4480_v21, %v3934_v22  ;;  %v3862_v38 = vld [vmem:[%s6817_s3 + $0x68] sm:$0xf0]  ;;  %v3929_v46 = vor.u32 %v4478_v29, %v3926_v30  ;;  %v4494_v4 = vld [vmem:[%s6817_s3 + $0x164] sm:$0xf]  ;;  %v3982_v16 = vld [vmem:[%s6817_s3 + $0x158] sm:$0xf0] }
 0x10c   :  { %2418 = vmatpush.bf16.msra.mxu0 %v3861_v11  ;;  %v1795_v34 = vadd.f32 %v1794_v33, %v1782_v54  ;;  %v1770_v41 = vpop.f32.mrf.mxu0  ;;  %v3865_v43 = vor.u32 %v4462_v40, %v3862_v38  ;;  %v4483_v54 = vld [vmem:[%s6817_s3 + $0x104] sm:$0xf0]  ;;  %v4458_v33 = vld [vmem:[%s6817_s3 + $0x44] sm:$0xf]  ;;  %v3993_v7 = vor.u32 %v4494_v4, %v3990_v6  ;;  %v3822_v21 = vld [vmem:[%s6817_s3 + $0x18] sm:$0xf0] }
 0x10d   :  { %2431 = vmatpush.bf16.msra.mxu1 %v3925_v19  ;;  %v3964_v19 = vld [vmem:[%s6817_s3 + $0x130] sm:$0xf]  ;;  %v4456_v41 = vld [vmem:[%s6817_s3 + $0x34] sm:$0xf]  ;;  %v3814_v29 = vld [vmem:[%s6817_s3 + $0x8] sm:$0xf0] }
 0x10e   :  { %2444 = vmatpush.bf16.msra.mxu2 %v3989_v52  ;;  %v1807_v60 = vpop.f32.mrf.mxu3  ;;  %v3965_v23 = vor.u32 %v4489_v20, %v3964_v19  ;;  %v3918_v52 = vld [vmem:[%s6817_s3 + $0xd8] sm:$0xf0]  ;;  %v4452_v20 = vld [vmem:[%s6817_s3 + $0x14] sm:$0xf]  ;;  %v4486_v48 = vld [vmem:[%s6817_s3 + $0x124] sm:$0xf] }
 0x10f   :  { %v1783_v3 = vpop.f32.mrf.mxu1  ;;  %v1808_v9 = vadd.f32 %v1807_v60, %v1795_v34  ;;  %v3921_v58 = vor.u32 %v4476_v49, %v3918_v52  ;;  %v3913_v34 = vor.u32 %v4474_v61, %v3910_v35  ;;  %v4468_v22 = vld [vmem:[%s6817_s3 + $0x94] sm:$0xf]  ;;  %v3825_v40 = vor.u32 %v4452_v20, %v3822_v21  ;;  %v3958_v49 = vld [vmem:[%s6817_s3 + $0x128] sm:$0xf0]  ;;  %v4482_v61 = vld [vmem:[%s6817_s3 + $0x104] sm:$0xf] }
 0x110   :  { %2419 = vmatpush.bf16.msra.mxu0 %v3853_v24  ;;  %v3813_v24 = vor.u32 %v4451_v13, %v3812_v12  ;;  %v3830_v12 = vld [vmem:[%s6817_s3 + $0x28] sm:$0xf0]  ;;  %v4470_v13 = vld [vmem:[%s6817_s3 + $0xa4] sm:$0xf]  ;;  %v4488_v30 = vld [vmem:[%s6817_s3 + $0x134] sm:$0xf] }
 0x111   :  { %2432 = vmatpush.bf16.msra.mxu1 %v3917_v26  ;;  %v2020_v37 = vmax.f32 %v1808_v9, 0.0  ;;  %v3877_v26 = vor.u32 %v4467_v15, %v3876_v5  ;;  %v3905_v9 = vor.u32 %v4472_v0, %v3902_v2  ;;  %v4492_v15 = vld [vmem:[%s6817_s3 + $0x154] sm:$0xf]  ;;  %v3942_v35 = vld [vmem:[%s6817_s3 + $0x108] sm:$0xf0] }
 0x112   :  { %2445 = vmatpush.bf16.msra.mxu2 %v3981_v62  ;;  %v3985_v18 = vor.u32 %v4492_v15, %v3982_v16  ;;  %v4044_v0 = vld [vmem:[%s6817_s3 + $0x1d0] sm:$0xf]  ;;  %v4503_v20 = vld [vmem:[%s6817_s3 + $0x1a4] sm:$0xf0] }
 0x113   :  { %v1796_v17 = vpop.f32.mrf.mxu2  ;;  %v6355_v36 = vpack.c.bf16 %v2020_v37, %v2020_v37  ;;  %v3886_v37 = vld [vmem:[%s6817_s3 + $0x98] sm:$0xf0] }
 0x114   :  { %2420 = vmatpush.bf16.msra.mxu0 %v3845_v31  ;;  %v3957_v31 = vor.u32 %v4487_v50, %v3956_v28  ;;  %v4450_v28 = vld [vmem:[%s6817_s3 + $0x4] sm:$0xf]  ;;  %v3889_v50 = vor.u32 %v4468_v22, %v3886_v37 }
 0x115   :  { %2433 = vmatpush.bf16.msra.mxu1 %v3909_v39  ;;  %v6357_v39 = vpack.c.bf16 %v2019_v25, %v2019_v25  ;;  %v4490_v25 = vld [vmem:[%s6817_s3 + $0x144] sm:$0xf] }
 0x116   :  { %2446 = vmatpush.bf16.msra.mxu2 %v3973_v8  ;;  %v1809_v11 = vpop.f32.mrf.mxu3 }
 0x118   :  { %2421 = vmatpush.bf16.msra.mxu0 %v3837_v53  ;;  %v3940_v53 = vld [vmem:[%s6817_s3 + $0x100] sm:$0xf] }
 0x119   :  { %2434 = vmatpush.bf16.msra.mxu1 %v3901_v55  ;;  %v4496_v55 = vld [vmem:[%s6817_s3 + $0x174] sm:$0xf]  ;;  %v3941_v60 = vor.u32 %v4483_v54, %v3940_v53  ;;  %v3817_v53 = vor.u32 %v4450_v28, %v3814_v29  ;;  %v4513_v54 = vld [vmem:[%s6817_s3 + $0x1f4] sm:$0xf0] }
 0x11a   :  { %2447 = vmatpush.bf16.msra.mxu2 %v3965_v23  ;;  %v4001_v62 = vor.u32 %v4496_v55, %v3998_v56  ;;  %v4512_v28 = vld [vmem:[%s6817_s3 + $0x1f4] sm:$0xf] }
 0x11c   :  { %2422 = vmatpush.bf16.msra.mxu0 %v3829_v63  ;;  %v3849_v63 = vor.u32 %v4458_v33, %v3846_v59  ;;  %v3950_v33 = vld [vmem:[%s6817_s3 + $0x118] sm:$0xf0] }
 0x11d   :  { %2435 = vmatpush.bf16.msra.mxu1 %v3893_v42  ;;  %v3838_v42 = vld [vmem:[%s6817_s3 + $0x38] sm:$0xf0] }
 0x11e   :  { %2448 = vmatpush.bf16.msra.mxu2 %v3957_v31  ;;  %v3841_v8 = vor.u32 %v4456_v41, %v3838_v42  ;;  %v3966_v31 = vld [vmem:[%s6817_s3 + $0x138] sm:$0xf0]  ;;  %v4052_v41 = vld [vmem:[%s6817_s3 + $0x1e0] sm:$0xf] }
 0x120   :  { %2423 = vmatpush.bf16.msra.mxu0 %v3821_v10  ;;  %v4454_v10 = vld [vmem:[%s6817_s3 + $0x24] sm:$0xf] }
 0x121   :  { %2436 = vmatpush.bf16.msra.mxu1 %v3885_v14  ;;  %v3894_v14 = vld [vmem:[%s6817_s3 + $0xa8] sm:$0xf0]  ;;  %v3833_v11 = vor.u32 %v4454_v10, %v3830_v12 }
 0x122   :  { %2449 = vmatpush.bf16.msra.mxu2 %v3949_v51  ;;  %v3897_v19 = vor.u32 %v4470_v13, %v3894_v14  ;;  %v4060_v51 = vld [vmem:[%s6817_s3 + $0x1f0] sm:$0xf] }
 0x123   :  { %v4061_v56 = vor.u32 %v4513_v54, %v4060_v51  ;;  %v4028_v14 = vld [vmem:[%s6817_s3 + $0x1b0] sm:$0xf] }
 0x124   :  { %2424 = vmatpush.bf16.msra.mxu0 %v3813_v24  ;;  %v1820_v1 = vpop.f32.mrf.mxu0 }
 0x125   :  { %2437 = vmatpush.bf16.msra.mxu1 %v3877_v26  ;;  %v3974_v26 = vld [vmem:[%s6817_s3 + $0x148] sm:$0xf0]  ;;  %2456 = vmatpush.bf16.msra.mxu3 %v4061_v56 }
 0x126   :  { %2450 = vmatpush.bf16.msra.mxu2 %v3941_v60 }
 0x127   :  { %2425 = vmatmul.bf16.vlgmr.msra.gmra.mxu0 %v6357_v39  ;;  %v6415_v3 = vpop.f32.mrf.mxu1 }
 0x128   :  { %2469 = vmatpush.bf16.msrb.mxu0 %v3873_v32  ;;  %2438 = vmatmul.bf16.vlgmr.msra.gmra.mxu1 %v6355_v36  ;;  %v3977_v32 = vor.u32 %v4490_v25, %v3974_v26  ;;  %v4501_v25 = vld [vmem:[%s6817_s3 + $0x194] sm:$0xf0] }
 0x129   :  { %2482 = vmatpush.bf16.msrb.mxu1 %v3937_v27  ;;  %v6462_v27 = vld [vmem:[%s6816_s2] sm:$0xf] }
 0x12a   :  { %2495 = vmatpush.bf16.msrb.mxu2 %v4001_v62  ;;  %v317_v38 = vperm.slane %v6462_v27, 2 }
 0x12b   :  { %v1846_v5 = vpop.f32.mrf.mxu2 }
 0x12c   :  { %2470 = vmatpush.bf16.msrb.mxu0 %v3865_v43  ;;  %v1822_v23 = vpop.f32.mrf.mxu0  ;;  %v4466_v43 = vld [vmem:[%s6817_s3 + $0x84] sm:$0xf]  ;;  %v1821_v52 = vadd.f32 %v1820_v1, %v317_v38 }
 0x12d   :  { %2483 = vmatpush.bf16.msrb.mxu1 %v3929_v46  ;;  %v3969_v46 = vor.u32 %v4488_v30, %v3966_v31  ;;  %v3881_v55 = vor.u32 %v4466_v43, %v3878_v44  ;;  %v4510_v30 = vld [vmem:[%s6817_s3 + $0x1e4] sm:$0xf]  ;;  %v4054_v31 = vld [vmem:[%s6817_s3 + $0x1e8] sm:$0xf0] }
 0x12e   :  { %2496 = vmatpush.bf16.msrb.mxu2 %v3993_v7  ;;  %v1859_v17 = vpop.f32.mrf.mxu3  ;;  %v1834_v59 = vadd.f32 %v6415_v3, %v1821_v52  ;;  %v4036_v7 = vld [vmem:[%s6817_s3 + $0x1c0] sm:$0xf]  ;;  %v4057_v44 = vor.u32 %v4510_v30, %v4054_v31  ;;  %v4506_v52 = vld [vmem:[%s6817_s3 + $0x1c4] sm:$0xf]  ;;  %v4529_v30 = vld [vmem:[%s6819_s5 + $0x74] sm:$0xf0] }
 0x12f   :  { %v1835_v24 = vpop.f32.mrf.mxu1  ;;  %v4528_v31 = vld [vmem:[%s6819_s5 + $0x74] sm:$0xf] }
 0x130   :  { %2471 = vmatpush.bf16.msrb.mxu0 %v3857_v57  ;;  %v3961_v57 = vor.u32 %v4486_v48, %v3958_v49  ;;  %v1847_v62 = vadd.f32 %v1846_v5, %v1834_v59  ;;  %v4505_v5 = vld [vmem:[%s6817_s3 + $0x1b4] sm:$0xf0]  ;;  %v4012_v24 = vld [vmem:[%s6817_s3 + $0x190] sm:$0xf] }
 0x131   :  { %2484 = vmatpush.bf16.msrb.mxu1 %v3921_v58  ;;  %v4484_v58 = vld [vmem:[%s6817_s3 + $0x114] sm:$0xf]  ;;  %v4013_v26 = vor.u32 %v4501_v25, %v4012_v24 }
 0x132   :  { %2497 = vmatpush.bf16.msrb.mxu2 %v3985_v18  ;;  %v3953_v60 = vor.u32 %v4484_v58, %v3950_v33  ;;  %v4029_v18 = vor.u32 %v4505_v5, %v4028_v14  ;;  %v4030_v58 = vld [vmem:[%s6817_s3 + $0x1b8] sm:$0xf0]  ;;  %v318_v33 = vperm.slane %v6462_v27, 3 }
 0x133   :  { %v1848_v45 = vpop.f32.mrf.mxu2  ;;  %v4014_v27 = vld [vmem:[%s6817_s3 + $0x198] sm:$0xf0] }
 0x134   :  { %2472 = vmatpush.bf16.msrb.mxu0 %v3849_v63  ;;  %v3945_v63 = vor.u32 %v4482_v61, %v3942_v35  ;;  %v4022_v61 = vld [vmem:[%s6817_s3 + $0x1a8] sm:$0xf0] }
 0x135   :  { %2485 = vmatpush.bf16.msrb.mxu1 %v3913_v34  ;;  %v1860_v34 = vadd.f32 %v1859_v17, %v1847_v62 }
 0x136   :  { %2498 = vmatpush.bf16.msrb.mxu2 %v3977_v32  ;;  %v1861_v47 = vpop.f32.mrf.mxu3  ;;  %v4004_v32 = vld [vmem:[%s6817_s3 + $0x180] sm:$0xf] }
 0x137   :  { %v4046_v47 = vld [vmem:[%s6817_s3 + $0x1d8] sm:$0xf0] }
 0x138   :  { %2473 = vmatpush.bf16.msrb.mxu0 %v3841_v8  ;;  %v4507_v8 = vld [vmem:[%s6817_s3 + $0x1c4] sm:$0xf0] }
 0x139   :  { %2486 = vmatpush.bf16.msrb.mxu1 %v3905_v9  ;;  %v4037_v10 = vor.u32 %v4507_v8, %v4036_v7 }
 0x13a   :  { %2499 = vmatpush.bf16.msrb.mxu2 %v3969_v46  ;;  %v4508_v46 = vld [vmem:[%s6817_s3 + $0x1d4] sm:$0xf] }
 0x13b   :  { %v4049_v48 = vor.u32 %v4508_v46, %v4046_v47  ;;  %v4527_v46 = vld [vmem:[%s6819_s5 + $0x64] sm:$0xf0] }
 0x13c   :  { %2474 = vmatpush.bf16.msrb.mxu0 %v3833_v11 }
 0x13d   :  { %2487 = vmatpush.bf16.msrb.mxu1 %v3897_v19  ;;  %v4020_v19 = vld [vmem:[%s6817_s3 + $0x1a0] sm:$0xf] }
 0x13e   :  { %2500 = vmatpush.bf16.msrb.mxu2 %v3961_v57  ;;  %v4021_v23 = vor.u32 %v4503_v20, %v4020_v19  ;;  %v4504_v57 = vld [vmem:[%s6817_s3 + $0x1b4] sm:$0xf] }
 0x13f   :  { %v4033_v59 = vor.u32 %v4504_v57, %v4030_v58  ;;  %v4188_v57 = vld [vmem:[%s6819_s5 + $0xf0] sm:$0xf]  ;;  %v4545_v58 = vld [vmem:[%s6819_s5 + $0xf4] sm:$0xf0] }
 0x140   :  { %2475 = vmatpush.bf16.msrb.mxu0 %v3825_v40  ;;  %v4499_v40 = vld [vmem:[%s6817_s3 + $0x184] sm:$0xf0] }
 0x141   :  { %2488 = vmatpush.bf16.msrb.mxu1 %v3889_v50  ;;  %v4005_v38 = vor.u32 %v4499_v40, %v4004_v32  ;;  %v4062_v50 = vld [vmem:[%s6817_s3 + $0x1f8] sm:$0xf0] }
 0x142   :  { %2501 = vmatpush.bf16.msrb.mxu2 %v3953_v60  ;;  %v4065_v29 = vor.u32 %v4512_v28, %v4062_v50  ;;  %v4502_v60 = vld [vmem:[%s6817_s3 + $0x1a4] sm:$0xf] }
 0x144   :  { %2476 = vmatpush.bf16.msrb.mxu0 %v3817_v53  ;;  %v1872_v1 = vpop.f32.mrf.mxu0  ;;  %v4038_v53 = vld [vmem:[%s6817_s3 + $0x1c8] sm:$0xf0] }
 0x145   :  { %2489 = vmatpush.bf16.msrb.mxu1 %v3881_v55  ;;  %v1873_v2 = vadd.f32 %v1872_v1, %v1860_v34  ;;  %v4041_v55 = vor.u32 %v4506_v52, %v4038_v53  ;;  %v4500_v34 = vld [vmem:[%s6817_s3 + $0x194] sm:$0xf]  ;;  %v4108_v53 = vld [vmem:[%s6819_s5 + $0x50] sm:$0xf] }
 0x146   :  { %2502 = vmatpush.bf16.msrb.mxu2 %v3945_v63  ;;  %v4025_v63 = vor.u32 %v4502_v60, %v4022_v61  ;;  %v4544_v60 = vld [vmem:[%s6819_s5 + $0xf4] sm:$0xf]  ;;  %v4190_v61 = vld [vmem:[%s6819_s5 + $0xf8] sm:$0xf0] }
 0x147   :  { %2477 = vmatmul.bf16.vlgmr.msrb.gmra.mxu0 %v6357_v39  ;;  %v4511_v39 = vld [vmem:[%s6817_s3 + $0x1e4] sm:$0xf0]  ;;  %v1885_v3 = vpop.f32.mrf.mxu1 }
 0x148   :  { %2490 = vmatmul.bf16.vlgmr.msrb.gmra.mxu1 %v6355_v36  ;;  %v4053_v42 = vor.u32 %v4511_v39, %v4052_v41  ;;  %v4509_v36 = vld [vmem:[%s6817_s3 + $0x1d4] sm:$0xf0]  ;;  %v1886_v6 = vadd.f32 %v1885_v3, %v1873_v2  ;;  %v4017_v39 = vor.u32 %v4500_v34, %v4014_v27  ;;  %v4523_v34 = vld [vmem:[%s6819_s5 + $0x44] sm:$0xf0]  ;;  %v4193_v27 = vor.u32 %v4544_v60, %v4190_v61  ;;  %v4148_v60 = vld [vmem:[%s6819_s5 + $0xa0] sm:$0xf] }
 0x149   :  { %v4045_v4 = vor.u32 %v4509_v36, %v4044_v0  ;;  %v4006_v0 = vld [vmem:[%s6817_s3 + $0x188] sm:$0xf0]  ;;  %v4535_v61 = vld [vmem:[%s6819_s5 + $0xa4] sm:$0xf0] }
 0x14a   :  { %2457 = vmatpush.bf16.msra.mxu3 %v4053_v42  ;;  %v4498_v42 = vld [vmem:[%s6817_s3 + $0x184] sm:$0xf] }
 0x14b   :  { %v1898_v9 = vpop.f32.mrf.mxu2  ;;  %v4009_v1 = vor.u32 %v4498_v42, %v4006_v0  ;;  %v4102_v42 = vld [vmem:[%s6819_s5 + $0x48] sm:$0xf0]  ;;  %v4543_v0 = vld [vmem:[%s6819_s5 + $0xe4] sm:$0xf0] }
 0x14c   :  { %v1899_v12 = vadd.f32 %v1898_v9, %v1886_v6  ;;  %v1874_v16 = vpop.f32.mrf.mxu0 }
 0x14e   :  { %2458 = vmatpush.bf16.msra.mxu3 %v4045_v4  ;;  %v1911_v13 = vpop.f32.mrf.mxu3 }
 0x14f   :  { %v1912_v15 = vadd.f32 %v1911_v13, %v1899_v12  ;;  %v1887_v17 = vpop.f32.mrf.mxu1 }
 0x151   :  { %v2021_v11 = vmax.f32 %v1912_v15, 0.0 }
 0x152   :  { %2459 = vmatpush.bf16.msra.mxu3 %v4037_v10 }
 0x153   :  { %v2025_v21 = vpack.c.bf16 %v2021_v11, %v2021_v11  ;;  %v1900_v22 = vpop.f32.mrf.mxu2  ;;  %v2091_v11 = vld [vmem:[%s6818_s4] sm:$0x3] }
 0x154   :  { %v2093_v19 = vperm.slane %v2091_v11, 0  ;;  %v2094_v25 = vperm.slane %v2091_v11, 1 }
 0x155   :  { %2451 = vmatmul.bf16.vlgmr.msra.gmra.mxu2 %v2025_v21 }
 0x156   :  { %2460 = vmatpush.bf16.msra.mxu3 %v4029_v18  ;;  %v1913_v37 = vpop.f32.mrf.mxu3 }
 0x15a   :  { %2461 = vmatpush.bf16.msra.mxu3 %v4021_v23 }
 0x15e   :  { %2462 = vmatpush.bf16.msra.mxu3 %v4013_v26 }
 0x162   :  { %2463 = vmatpush.bf16.msra.mxu3 %v4005_v38 }
 0x164   :  { %v1924_v43 = vpop.f32.mrf.mxu0 }
 0x165   :  { %2503 = vmatmul.bf16.vlgmr.msrb.gmra.mxu2 %v2025_v21  ;;  %v1925_v41 = vadd.f32 %v1924_v43, %v318_v33 }
 0x166   :  { %2508 = vmatpush.bf16.msrb.mxu3 %v4065_v29  ;;  %v4124_v29 = vld [vmem:[%s6819_s5 + $0x70] sm:$0xf] }
 0x167   :  { %v1937_v45 = vpop.f32.mrf.mxu1  ;;  %v4125_v43 = vor.u32 %v4529_v30, %v4124_v29  ;;  %v4174_v29 = vld [vmem:[%s6819_s5 + $0xd8] sm:$0xf0] }
 0x168   :  { %v1938_v36 = vadd.f32 %v1937_v45, %v1925_v41  ;;  %v4116_v45 = vld [vmem:[%s6819_s5 + $0x60] sm:$0xf] }
 0x169   :  { %2723 = vmatpush.bf16.msra.mxu0 %v4125_v43  ;;  %v4180_v41 = vld [vmem:[%s6819_s5 + $0xe0] sm:$0xf]  ;;  %v4515_v43 = vld [vmem:[%s6819_s5 + $0x4] sm:$0xf0] }
 0x16a   :  { %2509 = vmatpush.bf16.msrb.mxu3 %v4057_v44  ;;  %v4126_v44 = vld [vmem:[%s6819_s5 + $0x78] sm:$0xf0] }
 0x16b   :  { %v1950_v49 = vpop.f32.mrf.mxu2  ;;  %v4129_v47 = vor.u32 %v4528_v31, %v4126_v44  ;;  %v4068_v31 = vld [vmem:[%s6819_s5] sm:$0xf] }
 0x16c   :  { %v1926_v54 = vpop.f32.mrf.mxu0  ;;  %v1951_v2 = vadd.f32 %v1950_v49, %v1938_v36  ;;  %v4118_v49 = vld [vmem:[%s6819_s5 + $0x68] sm:$0xf0]  ;;  %v4181_v36 = vor.u32 %v4543_v0, %v4180_v41  ;;  %v4164_v44 = vld [vmem:[%s6819_s5 + $0xc0] sm:$0xf]  ;;  %v4140_v41 = vld [vmem:[%s6819_s5 + $0x90] sm:$0xf] }
 0x16d   :  { %2749 = vmatpush.bf16.msra.mxu2 %v4129_v47  ;;  %v4525_v54 = vld [vmem:[%s6819_s5 + $0x54] sm:$0xf0]  ;;  %v4514_v47 = vld [vmem:[%s6819_s5 + $0x4] sm:$0xf] }
 0x16e   :  { %v1963_v51 = vpop.f32.mrf.mxu3  ;;  %2510 = vmatpush.bf16.msrb.mxu3 %v4049_v48  ;;  %v4526_v48 = vld [vmem:[%s6819_s5 + $0x64] sm:$0xf]  ;;  %v4109_v33 = vor.u32 %v4525_v54, %v4108_v53  ;;  %v4166_v53 = vld [vmem:[%s6819_s5 + $0xc8] sm:$0xf0] }
 0x16f   :  { %v1939_v56 = vpop.f32.mrf.mxu1  ;;  %v1964_v3 = vadd.f32 %v1963_v51, %v1951_v2  ;;  %v4117_v51 = vor.u32 %v4527_v46, %v4116_v45  ;;  %v4121_v52 = vor.u32 %v4526_v48, %v4118_v49  ;;  %v4182_v2 = vld [vmem:[%s6819_s5 + $0xe8] sm:$0xf0]  ;;  %v4069_v45 = vor.u32 %v4515_v43, %v4068_v31  ;;  %v4539_v46 = vld [vmem:[%s6819_s5 + $0xc4] sm:$0xf0] }
 0x170   :  { %v4110_v56 = vld [vmem:[%s6819_s5 + $0x58] sm:$0xf0]  ;;  %v4070_v48 = vld [vmem:[%s6819_s5 + $0x8] sm:$0xf0]  ;;  %v4165_v49 = vor.u32 %v4539_v46, %v4164_v44 }
 0x171   :  { %2724 = vmatpush.bf16.msra.mxu0 %v4117_v51  ;;  %2750 = vmatpush.bf16.msra.mxu2 %v4121_v52  ;;  %v4073_v51 = vor.u32 %v4514_v47, %v4070_v48  ;;  %v4538_v52 = vld [vmem:[%s6819_s5 + $0xc4] sm:$0xf] }
 0x172   :  { %2511 = vmatpush.bf16.msrb.mxu3 %v4041_v55  ;;  %v4524_v55 = vld [vmem:[%s6819_s5 + $0x54] sm:$0xf]  ;;  %v4169_v54 = vor.u32 %v4538_v52, %v4166_v53 }
 0x173   :  { %v1952_v35 = vpop.f32.mrf.mxu2 }
 0x175   :  { %2725 = vmatpush.bf16.msra.mxu0 %v4109_v33  ;;  %v4158_v33 = vld [vmem:[%s6819_s5 + $0xb8] sm:$0xf0] }
 0x176   :  { %v1965_v62 = vpop.f32.mrf.mxu3  ;;  %2512 = vmatpush.bf16.msrb.mxu3 %v4033_v59  ;;  %v4189_v59 = vor.u32 %v4545_v58, %v4188_v57  ;;  %v4536_v57 = vld [vmem:[%s6819_s5 + $0xb4] sm:$0xf] }
 0x177   :  { %v4113_v62 = vor.u32 %v4524_v55, %v4110_v56  ;;  %v4156_v55 = vld [vmem:[%s6819_s5 + $0xb0] sm:$0xf]  ;;  %v4537_v56 = vld [vmem:[%s6819_s5 + $0xb4] sm:$0xf0] }
 0x178   :  { %2736 = vmatpush.bf16.msra.mxu1 %v4189_v59  ;;  %v4157_v58 = vor.u32 %v4537_v56, %v4156_v55  ;;  %v4161_v59 = vor.u32 %v4536_v57, %v4158_v33 }
 0x179   :  { %2751 = vmatpush.bf16.msra.mxu2 %v4113_v62  ;;  %v4534_v62 = vld [vmem:[%s6819_s5 + $0xa4] sm:$0xf] }
 0x17a   :  { %2513 = vmatpush.bf16.msrb.mxu3 %v4025_v63  ;;  %v4100_v63 = vld [vmem:[%s6819_s5 + $0x40] sm:$0xf] }
 0x17c   :  { %2737 = vmatpush.bf16.msra.mxu1 %v4181_v36  ;;  %v4142_v36 = vld [vmem:[%s6819_s5 + $0x98] sm:$0xf0] }
 0x17e   :  { %2514 = vmatpush.bf16.msrb.mxu3 %v4017_v39  ;;  %v4522_v39 = vld [vmem:[%s6819_s5 + $0x44] sm:$0xf] }
 0x182   :  { %2515 = vmatpush.bf16.msrb.mxu3 %v4009_v1  ;;  %v4542_v1 = vld [vmem:[%s6819_s5 + $0xe4] sm:$0xf] }
 0x184   :  { %v1976_v4 = vpop.f32.mrf.mxu0 }
 0x185   :  { %v1989_v6 = vpop.f32.mrf.mxu1  ;;  %v1977_v7 = vadd.f32 %v1976_v4, %v1964_v3  ;;  %v4101_v3 = vor.u32 %v4523_v34, %v4100_v63  ;;  %v4185_v4 = vor.u32 %v4542_v1, %v4182_v2  ;;  %v4150_v63 = vld [vmem:[%s6819_s5 + $0xa8] sm:$0xf0]  ;;  %v4149_v34 = vor.u32 %v4535_v61, %v4148_v60  ;;  %v4132_v2 = vld [vmem:[%s6819_s5 + $0x80] sm:$0xf] }
 0x187   :  { %v1990_v8 = vadd.f32 %v1989_v6, %v1977_v7  ;;  %v4105_v6 = vor.u32 %v4522_v39, %v4102_v42  ;;  %v4092_v7 = vld [vmem:[%s6819_s5 + $0x30] sm:$0xf]  ;;  %2726 = vmatpush.bf16.msra.mxu0 %v4101_v3  ;;  %v4533_v39 = vld [vmem:[%s6819_s5 + $0x94] sm:$0xf0]  ;;  %v4532_v42 = vld [vmem:[%s6819_s5 + $0x94] sm:$0xf] }
 0x188   :  { %v4141_v0 = vor.u32 %v4533_v39, %v4140_v41  ;;  %v4145_v1 = vor.u32 %v4532_v42, %v4142_v36  ;;  %v4531_v3 = vld [vmem:[%s6819_s5 + $0x84] sm:$0xf0] }
 0x189   :  { %2752 = vmatpush.bf16.msra.mxu2 %v4105_v6  ;;  %v4133_v6 = vor.u32 %v4531_v3, %v4132_v2 }
 0x18c   :  { %v2002_v9 = vpop.f32.mrf.mxu2  ;;  %v1978_v13 = vpop.f32.mrf.mxu0 }
 0x18d   :  { %v2003_v10 = vadd.f32 %v2002_v9, %v1990_v8  ;;  %v2015_v12 = vpop.f32.mrf.mxu3  ;;  %v1991_v14 = vpop.f32.mrf.mxu1  ;;  %v4521_v8 = vld [vmem:[%s6819_s5 + $0x34] sm:$0xf0]  ;;  %v4520_v9 = vld [vmem:[%s6819_s5 + $0x34] sm:$0xf] }
 0x18f   :  { %v2016_v5 = vadd.f32 %v2015_v12, %v2003_v10  ;;  %v4094_v10 = vld [vmem:[%s6819_s5 + $0x38] sm:$0xf0]  ;;  %v4093_v12 = vor.u32 %v4521_v8, %v4092_v7  ;;  %v4134_v7 = vld [vmem:[%s6819_s5 + $0x88] sm:$0xf0] }
 0x190   :  { %v4097_v14 = vor.u32 %v4520_v9, %v4094_v10 }
 0x191   :  { %v2022_v15 = vmax.f32 %v2016_v5, 0.0  ;;  %v4084_v5 = vld [vmem:[%s6819_s5 + $0x20] sm:$0xf]  ;;  %2727 = vmatpush.bf16.msra.mxu0 %v4093_v12 }
 0x192   :  { %2753 = vmatpush.bf16.msra.mxu2 %v4097_v14 }
 0x193   :  { %v2026_v16 = vpack.c.bf16 %v2022_v15, %v2022_v15  ;;  %v4519_v15 = vld [vmem:[%s6819_s5 + $0x24] sm:$0xf0] }
 0x194   :  { %v2004_v17 = vpop.f32.mrf.mxu2 }
 0x195   :  { %v2017_v18 = vpop.f32.mrf.mxu3  ;;  %2464 = vmatmul.bf16.vlgmr.msra.gmra.mxu3 %v2026_v16  ;;  %v4086_v17 = vld [vmem:[%s6819_s5 + $0x28] sm:$0xf0] }
 0x196   :  { %2762 = vmatpush.bf16.msra.mxu3 %v4193_v27  ;;  %v4085_v18 = vor.u32 %v4519_v15, %v4084_v5  ;;  %v4153_v27 = vor.u32 %v4534_v62, %v4150_v63 }
 0x198   :  { %2728 = vmatpush.bf16.msra.mxu0 %v4085_v18 }
 0x19a   :  { %2763 = vmatpush.bf16.msra.mxu3 %v4185_v4  ;;  %v4530_v4 = vld [vmem:[%s6819_s5 + $0x84] sm:$0xf] }
 0x19b   :  { %v4137_v8 = vor.u32 %v4530_v4, %v4134_v7 }
 0x1a4   :  { %v2426_v20 = vpop.f32.mrf.mxu0 }
 0x1a5   :  { %v2427_v21 = vadd.f32 %v2426_v20, %v2093_v19  ;;  %v2439_v22 = vpop.f32.mrf.mxu1  ;;  %2516 = vmatmul.bf16.vlgmr.msrb.gmra.mxu3 %v2026_v16  ;;  %v4518_v16 = vld [vmem:[%s6819_s5 + $0x24] sm:$0xf] }
 0x1a6   :  { %v4089_v11 = vor.u32 %v4518_v16, %v4086_v17 }
 0x1a7   :  { %v6604_v23 = vadd.f32 %v2439_v22, %v2427_v21  ;;  %v4076_v21 = vld [vmem:[%s6819_s5 + $0x10] sm:$0xf]  ;;  %v4517_v22 = vld [vmem:[%s6819_s5 + $0x14] sm:$0xf0] }
 0x1a8   :  { %2754 = vmatpush.bf16.msra.mxu2 %v4089_v11 }
 0x1ac   :  { %v2428_v37 = vpop.f32.mrf.mxu0 }
 0x1ad   :  { %v2441_v24 = vpop.f32.mrf.mxu1  ;;  %v4172_v37 = vld [vmem:[%s6819_s5 + $0xd0] sm:$0xf] }
 0x1ae   :  { %v4077_v24 = vor.u32 %v4517_v22, %v4076_v21 }
 0x1b0   :  { %2729 = vmatpush.bf16.msra.mxu0 %v4077_v24 }
 0x1b4   :  { %2730 = vmatpush.bf16.msra.mxu0 %v4069_v45 }
 0x1c4   :  { %v2478_v26 = vpop.f32.mrf.mxu0 }
 0x1c5   :  { %v2479_v32 = vadd.f32 %v2478_v26, %v2094_v25  ;;  %v2491_v40 = vpop.f32.mrf.mxu1  ;;  %v4541_v25 = vld [vmem:[%s6819_s5 + $0xd4] sm:$0xf0]  ;;  %v4516_v26 = vld [vmem:[%s6819_s5 + $0x14] sm:$0xf] }
 0x1c7   :  { %v6606_v38 = vadd.f32 %v2491_v40, %v2479_v32  ;;  %v4078_v32 = vld [vmem:[%s6819_s5 + $0x18] sm:$0xf0]  ;;  %v4173_v40 = vor.u32 %v4541_v25, %v4172_v37  ;;  %v2557_v37 = vld [vmem:[%s6820_s6] sm:$0x3] }
 0x1c8   :  { %v2560_v25 = vperm.slane %v2557_v37, 1 }
 0x1c9   :  { %2738 = vmatpush.bf16.msra.mxu1 %v4173_v40 }
 0x1cc   :  { %v2480_v28 = vpop.f32.mrf.mxu0 }
 0x1cd   :  { %v2493_v50 = vpop.f32.mrf.mxu1  ;;  %v4081_v28 = vor.u32 %v4516_v26, %v4078_v32  ;;  %2739 = vmatpush.bf16.msra.mxu1 %v4165_v49  ;;  %v2559_v26 = vperm.slane %v2557_v37, 0 }
 0x1ce   :  { %v4540_v50 = vld [vmem:[%s6819_s5 + $0xd4] sm:$0xf] }
 0x1cf   :  { %v4177_v30 = vor.u32 %v4540_v50, %v4174_v29  ;;  %2755 = vmatpush.bf16.msra.mxu2 %v4081_v28 }
 0x1d1   :  { %2764 = vmatpush.bf16.msra.mxu3 %v4177_v30  ;;  %2740 = vmatpush.bf16.msra.mxu1 %v4157_v58 }
 0x1d3   :  { %2756 = vmatpush.bf16.msra.mxu2 %v4073_v51 }
 0x1d5   :  { %2765 = vmatpush.bf16.msra.mxu3 %v4169_v54  ;;  %2741 = vmatpush.bf16.msra.mxu1 %v4149_v34 }
 0x1d8   :  { %v6656_v35 = vpop.f32.mrf.mxu2 }
 0x1d9   :  { %2766 = vmatpush.bf16.msra.mxu3 %v4161_v59  ;;  %2742 = vmatpush.bf16.msra.mxu1 %v4141_v0  ;;  %v2453_v9 = vadd.f32 %v6656_v35, %v6604_v23 }
 0x1dd   :  { %2767 = vmatpush.bf16.msra.mxu3 %v4153_v27  ;;  %2743 = vmatpush.bf16.msra.mxu1 %v4133_v6 }
 0x1e0   :  { %v2454_v13 = vpop.f32.mrf.mxu2 }
 0x1e1   :  { %2768 = vmatpush.bf16.msra.mxu3 %v4145_v1 }
 0x1e5   :  { %2769 = vmatpush.bf16.msra.mxu3 %v4137_v8 }
 0x1e8   :  { %v6706_v19 = vpop.f32.mrf.mxu2 }
 0x1e9   :  { %v2505_v15 = vadd.f32 %v6706_v19, %v6606_v38 }
 0x1f0   :  { %v2506_v20 = vpop.f32.mrf.mxu2 }
 0x218   :  { %v2465_v10 = vpop.f32.mrf.mxu3 }
 0x219   :  { %v2466_v12 = vadd.f32 %v2465_v10, %v2453_v9 }
 0x21b   :  { %v2521_v13 = vmax.f32 %v2466_v12, 0.0 }
 0x21d   :  { %v2523_v14 = vpack.c.bf16 %v2521_v13, %v2521_v13 }
 0x21f   :  { %2731 = vmatmul.bf16.vlgmr.msra.gmra.mxu0 %v2523_v14  ;;  %2757 = vmatmul.bf16.vlgmr.msra.gmra.mxu2 %v2523_v14 }
 0x220   :  { %v2467_v5 = vpop.f32.mrf.mxu3 }
 0x228   :  { %v2517_v16 = vpop.f32.mrf.mxu3 }
 0x229   :  { %v2518_v17 = vadd.f32 %v2517_v16, %v2505_v15 }
 0x22b   :  { %v2522_v18 = vmax.f32 %v2518_v17, 0.0 }
 0x22d   :  { %v2524_v11 = vpack.c.bf16 %v2522_v18, %v2522_v18 }
 0x22f   :  { %2744 = vmatmul.bf16.vlgmr.msra.gmra.mxu1 %v2524_v11  ;;  %2770 = vmatmul.bf16.vlgmr.msra.gmra.mxu3 %v2524_v11 }
 0x230   :  { %v2519_v20 = vpop.f32.mrf.mxu3 }
 0x29c   :  { %v2732_v21 = vpop.f32.mrf.mxu0 }
 0x29d   :  { %v2733_v19 = vadd.f32 %v2732_v21, %v2559_v26 }
 0x2a2   :  { %v2758_v22 = vpop.f32.mrf.mxu2 }
 0x2a3   :  { %v2759_v32 = vadd.f32 %v2758_v22, %v2560_v25 }
 0x2a4   :  { %v2734_v23 = vpop.f32.mrf.mxu0 }
 0x2aa   :  { %v2760_v35 = vpop.f32.mrf.mxu2 }
 0x2ac   :  { %v2745_v24 = vpop.f32.mrf.mxu1 }
 0x2ad   :  { %v2746_v50 = vadd.f32 %v2745_v24, %v2733_v19 }
 0x2b2   :  { %v2771_v38 = vpop.f32.mrf.mxu3 }
 0x2b3   :  { %v2772_v40 = vadd.f32 %v2771_v38, %v2759_v32 }
 0x2b4   :  { %v2747_v28 = vpop.f32.mrf.mxu1 }
 0x2b5   :  { %v2777_v29 = vrot.slane %v2772_v40, 6 }
 0x2b7   :  { %v2779_v30 = vsel %vm2778_vm0, %v2746_v50, %v2777_v29 }
 0x2b8   :  { %2781 = vst [vmem:[%s6821_s7] sm:$0xf] %v2779_v30 }
 0x2ba   :  { %v2773_v31 = vpop.f32.mrf.mxu3 }

</bundles_post_ra>
